<compile_context>
chip_gen: v7x
topology: tpu7x:2x2x1
jax: 0.10.0
libtpu: 0.0.40
codegen_flags: <defaults>
</compile_context>

<pallas_src>
import jax
import jax.numpy as jnp
from jax.experimental import pallas as pl
from jax.experimental.pallas import tpu as pltpu

# ---------------- small model config (consistent with VisionTransformer.__init__) ---
IMG = 16            # img_size
PATCH = 4           # patch_size
IN_CHANS = 4        # in_chans
EMBED = 32          # embed_dim
DEPTH = 2           # depth
HEADS = 4           # num_heads
HEAD_DIM = EMBED // HEADS
MLP_RATIO = 4.0
HIDDEN = int(EMBED * MLP_RATIO)          # 128
NUM_CLASSES = 10
CLS_PAD = 128                            # lane-dense classifier output width
NUM_PATCHES = (IMG // PATCH) * (IMG // PATCH)   # 16
NUM_REG = 6
SEQ = NUM_REG + 1 + NUM_PATCHES          # 6 reg tokens + cls + patches = 23
SEQ_PAD = 24                             # token rows padded to a sublane multiple of 8
PATCH_VEC = IN_CHANS * PATCH * PATCH     # 64
SCALE = HEAD_DIM ** (-0.5)


# ---------------- in-kernel helpers ---------------------------------------------------
def _layernorm(x, g, b, eps):
    mean = jnp.mean(x, axis=-1, keepdims=True)
    var = jnp.mean((x - mean) ** 2, axis=-1, keepdims=True)   # biased var (torch LN)
    return (x - mean) * jax.lax.rsqrt(var + eps) * g + b


def _gelu(y):
    # exact (erf-based) GELU, matching torch.nn.GELU() default
    return 0.5 * y * (1.0 + jax.lax.erf(y * 0.7071067811865475))


# ---------------- fused whole-forward kernel (one grid step == one batch element) -----
def _vit_kernel(
    patches_ref, tokbase_ref, pw_ref,
    n1g_ref, n1b_ref, qkvw_ref, qkvb_ref, pjw_ref, pjb_ref,
    n2g_ref, n2b_ref, f1w_ref, f1b_ref, f2w_ref, f2b_ref,
    ng_ref, nb_ref, hw_ref, hb_ref,
    out_ref,
):
    f32 = jnp.float32

    # ---- PatchEmbed + token assembly in one matmul ------------------------------------
    # patches_ref rows 0..6 and 23 are zero, so their matmul output is zero and
    # token_base supplies [regs+reg_embed | cls+pos0 | conv_bias+pos1.. | 0] directly.
    x = jnp.dot(patches_ref[0], pw_ref[...], preferred_element_type=f32) + tokbase_ref[...]

    # key-column mask: padded key columns get -inf before the softmax (hoisted once)
    col = jax.lax.broadcasted_iota(jnp.int32, (SEQ_PAD, SEQ_PAD), 1)
    key_bias = jnp.where(col < SEQ, 0.0, -1e30).astype(f32)

    # ---- transformer blocks (static unroll, weights indexed by static d) ---------------
    for d in range(DEPTH):
        # attention branch: LN1 -> qkv -> per-head softmax(QK^T)V -> proj -> residual
        h = _layernorm(x, n1g_ref[d], n1b_ref[d], 1e-6)
        qkv = jnp.dot(h, qkvw_ref[d], preferred_element_type=f32) + qkvb_ref[d]
        heads = []
        for hd in range(HEADS):                                  # 'b n (qkv h d)' head layout
            lo = hd * HEAD_DIM
            qh = qkv[:, lo:lo + HEAD_DIM]
            kh = qkv[:, EMBED + lo:EMBED + lo + HEAD_DIM]
            vh = qkv[:, 2 * EMBED + lo:2 * EMBED + lo + HEAD_DIM]
            s = jnp.dot(qh, kh.T, preferred_element_type=f32) * SCALE + key_bias
            m = jnp.max(s, axis=-1, keepdims=True)
            e = jnp.exp(s - m)
            denom = jnp.sum(e, axis=-1, keepdims=True)
            oh = jnp.dot(e, vh, preferred_element_type=f32)      # scale AFTER p@v
            heads.append(oh * pl.reciprocal(denom, approx=True))
        attn_out = jnp.concatenate(heads, axis=-1)               # (SEQ_PAD, EMBED), in vregs
        x = x + jnp.dot(attn_out, pjw_ref[d], preferred_element_type=f32) + pjb_ref[d]

        # MLP branch: LN2 -> fc1 + GELU -> fc2 -> residual
        h2 = _layernorm(x, n2g_ref[d], n2b_ref[d], 1e-6)
        mid = _gelu(jnp.dot(h2, f1w_ref[d], preferred_element_type=f32) + f1b_ref[d])
        x = x + jnp.dot(mid, f2w_ref[d], preferred_element_type=f32) + f2b_ref[d]

    # ---- final norm (eps=1e-5, torch default), pool token 6, lane-padded head ----------
    xf = _layernorm(x, ng_ref[...], nb_ref[...], 1e-5)
    pooled = xf[NUM_REG:NUM_REG + 1, :]                          # IndexSelect(dim=1, idx=6)
    out_ref[0] = jnp.dot(pooled, hw_ref[...], preferred_element_type=f32) + hb_ref[...]


# ---------------- parameters (deterministic synthetic init) ---------------------------
def init_params(key):
    def tn(k, shape, std=0.02):
        return std * jax.random.truncated_normal(k, -2.0, 2.0, shape, jnp.float32)

    keys = iter(jax.random.split(key, 64))
    params = dict(
        # conv weight (D, C, P, P) pre-flattened to (C*P*P, D); bias zeros
        patch_w=tn(next(keys), (PATCH_VEC, EMBED)),
        patch_b=jnp.zeros((1, EMBED), jnp.float32),
        pos_embed=tn(next(keys), (1, NUM_PATCHES + 1, EMBED)),
        cls_token=tn(next(keys), (1, 1, EMBED)),
        reg_tokens=jnp.zeros((1, NUM_REG, EMBED), jnp.float32),   # not re-initialized
        reg_embed=jnp.zeros((1, NUM_REG, EMBED), jnp.float32),
        norm_g=jnp.ones((1, EMBED), jnp.float32),
        norm_b=jnp.zeros((1, EMBED), jnp.float32),
        head_w=tn(next(keys), (EMBED, NUM_CLASSES)),
        head_b=jnp.zeros((1, NUM_CLASSES), jnp.float32),
        # per-block params stacked along a leading DEPTH axis (static-indexed in-kernel)
        n1g=jnp.ones((DEPTH, 1, EMBED), jnp.float32),
        n1b=jnp.zeros((DEPTH, 1, EMBED), jnp.float32),
        qkv_w=jnp.stack([tn(next(keys), (EMBED, 3 * EMBED)) for _ in range(DEPTH)]),
        qkv_b=jnp.zeros((DEPTH, 1, 3 * EMBED), jnp.float32),      # qkv_bias=False
        proj_w=jnp.stack([tn(next(keys), (EMBED, EMBED)) for _ in range(DEPTH)]),
        proj_b=jnp.zeros((DEPTH, 1, EMBED), jnp.float32),
        n2g=jnp.ones((DEPTH, 1, EMBED), jnp.float32),
        n2b=jnp.zeros((DEPTH, 1, EMBED), jnp.float32),
        fc1_w=jnp.stack([tn(next(keys), (EMBED, HIDDEN)) for _ in range(DEPTH)]),
        fc1_b=jnp.zeros((DEPTH, 1, HIDDEN), jnp.float32),
        fc2_w=jnp.stack([tn(next(keys), (HIDDEN, EMBED)) for _ in range(DEPTH)]),
        fc2_b=jnp.zeros((DEPTH, 1, EMBED), jnp.float32),
    )
    return params


# ---------------- forward --------------------------------------------------------------
@jax.jit
def vit_forward(x, params):
    B, C, H, W = x.shape
    nH, nW = H // PATCH, W // PATCH

    # unfold NCHW -> (B, num_patches, C*P*P) patch vectors (pure layout, done once),
    # then zero-pad to (B, SEQ_PAD, C*P*P) so the patch-embed matmul also covers the
    # prefix/pad token rows (their rows are zero -> matmul output zero there).
    patches = x.reshape(B, C, nH, PATCH, nW, PATCH)
    patches = patches.transpose(0, 2, 4, 1, 3, 5).reshape(B, nH * nW, PATCH_VEC)
    patches_pad = jnp.zeros((B, SEQ_PAD, PATCH_VEC), jnp.float32)
    patches_pad = patches_pad.at[:, NUM_REG + 1:SEQ, :].set(patches)

    # token_base slab (SEQ_PAD, D):
    #   rows 0..5 : reg_tokens + reg_embed
    #   row  6    : cls_token + pos_embed[:, 0]
    #   rows 7..22: pos_embed[:, 1:] + conv bias
    #   row  23   : zeros (sublane pad)
    regs = (params["reg_tokens"] + params["reg_embed"])[0]                  # (6, D)
    cls = params["cls_token"][:, 0] + params["pos_embed"][:, 0]             # (1, D)
    patch_rows = params["pos_embed"][0, 1:] + params["patch_b"]             # (16, D)
    token_base = jnp.concatenate(
        [regs, cls, patch_rows, jnp.zeros((SEQ_PAD - SEQ, EMBED), jnp.float32)], axis=0)

    # lane-pad the 10-class head to 128 output lanes (dense stores; slice afterwards)
    head_w = jnp.zeros((EMBED, CLS_PAD), jnp.float32).at[:, :NUM_CLASSES].set(params["head_w"])
    head_b = jnp.zeros((1, CLS_PAD), jnp.float32).at[:, :NUM_CLASSES].set(params["head_b"])

    def wspec(shape):
        n = len(shape)
        return pl.BlockSpec(shape, lambda b, _n=n: (0,) * _n)   # constant -> VMEM-resident

    out = pl.pallas_call(
        _vit_kernel,
        out_shape=jax.ShapeDtypeStruct((B, 1, CLS_PAD), jnp.float32),
        grid=(B,),
        in_specs=[
            pl.BlockSpec((1, SEQ_PAD, PATCH_VEC), lambda b: (b, 0, 0)),      # padded patches
            wspec((SEQ_PAD, EMBED)),                                         # token_base slab
            wspec((PATCH_VEC, EMBED)),                                       # patch proj weight
            wspec((DEPTH, 1, EMBED)), wspec((DEPTH, 1, EMBED)),              # norm1 g/b
            wspec((DEPTH, EMBED, 3 * EMBED)), wspec((DEPTH, 1, 3 * EMBED)),  # qkv
            wspec((DEPTH, EMBED, EMBED)), wspec((DEPTH, 1, EMBED)),          # proj
            wspec((DEPTH, 1, EMBED)), wspec((DEPTH, 1, EMBED)),              # norm2 g/b
            wspec((DEPTH, EMBED, HIDDEN)), wspec((DEPTH, 1, HIDDEN)),        # fc1
            wspec((DEPTH, HIDDEN, EMBED)), wspec((DEPTH, 1, EMBED)),         # fc2
            wspec((1, EMBED)), wspec((1, EMBED)),                            # final norm
            wspec((EMBED, CLS_PAD)), wspec((1, CLS_PAD)),                    # head (padded)
        ],
        out_specs=pl.BlockSpec((1, 1, CLS_PAD), lambda b: (b, 0, 0)),
        compiler_params=pltpu.CompilerParams(
            dimension_semantics=("parallel",)),          # batch split across TCs on v7x
    )(
        patches_pad, token_base, params["patch_w"],
        params["n1g"], params["n1b"], params["qkv_w"], params["qkv_b"],
        params["proj_w"], params["proj_b"], params["n2g"], params["n2b"],
        params["fc1_w"], params["fc1_b"], params["fc2_w"], params["fc2_b"],
        params["norm_g"], params["norm_b"], head_w, head_b,
    )
    return out.reshape(B, CLS_PAD)[:, :NUM_CLASSES]


if __name__ == "__main__":
    key = jax.random.PRNGKey(0)
    pkey, xkey = jax.random.split(key)
    params = init_params(pkey)
    x = jax.random.normal(xkey, (2, IN_CHANS, IMG, IMG), jnp.float32)
    out = vit_forward(x, params)
    jax.block_until_ready(out)
    assert out.shape == (2, NUM_CLASSES)
    assert bool(jnp.all(jnp.isfinite(out)))
    print("KERNEL_OK")
</pallas_src>

<mosaic_0001>
module attributes {stable_mosaic.version = 11 : i64} {
  func.func @_vit_kernel(%arg0: i32, %arg1: memref<1x24x64xf32, #tpu.memory_space<vmem>>, %arg2: memref<24x32xf32, #tpu.memory_space<vmem>>, %arg3: memref<64x32xf32, #tpu.memory_space<vmem>>, %arg4: memref<2x1x32xf32, #tpu.memory_space<vmem>>, %arg5: memref<2x1x32xf32, #tpu.memory_space<vmem>>, %arg6: memref<2x32x96xf32, #tpu.memory_space<vmem>>, %arg7: memref<2x1x96xf32, #tpu.memory_space<vmem>>, %arg8: memref<2x32x32xf32, #tpu.memory_space<vmem>>, %arg9: memref<2x1x32xf32, #tpu.memory_space<vmem>>, %arg10: memref<2x1x32xf32, #tpu.memory_space<vmem>>, %arg11: memref<2x1x32xf32, #tpu.memory_space<vmem>>, %arg12: memref<2x32x128xf32, #tpu.memory_space<vmem>>, %arg13: memref<2x1x128xf32, #tpu.memory_space<vmem>>, %arg14: memref<2x128x32xf32, #tpu.memory_space<vmem>>, %arg15: memref<2x1x32xf32, #tpu.memory_space<vmem>>, %arg16: memref<1x32xf32, #tpu.memory_space<vmem>>, %arg17: memref<1x32xf32, #tpu.memory_space<vmem>>, %arg18: memref<32x128xf32, #tpu.memory_space<vmem>>, %arg19: memref<1x128xf32, #tpu.memory_space<vmem>>, %arg20: memref<1x1x128xf32, #tpu.memory_space<vmem>>) attributes {dimension_semantics = [#tpu.dimension_semantics<parallel>], iteration_bounds = array<i64: 2>, scalar_prefetch = 0 : i64, scratch_operands = 0 : i64, tpu.core_type = #tpu.core_type<tc>, window_params = [{transform_indices = @transform_0, window_bounds = array<i64: 1, 24, 64>}, {pipeline_mode = #tpu.pipeline_mode<synchronous>, transform_indices = @transform_1, window_bounds = array<i64: 24, 32>}, {pipeline_mode = #tpu.pipeline_mode<synchronous>, transform_indices = @transform_2, window_bounds = array<i64: 64, 32>}, {pipeline_mode = #tpu.pipeline_mode<synchronous>, transform_indices = @transform_3, window_bounds = array<i64: 2, 1, 32>}, {pipeline_mode = #tpu.pipeline_mode<synchronous>, transform_indices = @transform_4, window_bounds = array<i64: 2, 1, 32>}, {pipeline_mode = #tpu.pipeline_mode<synchronous>, transform_indices = @transform_5, window_bounds = array<i64: 2, 32, 96>}, {pipeline_mode = #tpu.pipeline_mode<synchronous>, transform_indices = @transform_6, window_bounds = array<i64: 2, 1, 96>}, {pipeline_mode = #tpu.pipeline_mode<synchronous>, transform_indices = @transform_7, window_bounds = array<i64: 2, 32, 32>}, {pipeline_mode = #tpu.pipeline_mode<synchronous>, transform_indices = @transform_8, window_bounds = array<i64: 2, 1, 32>}, {pipeline_mode = #tpu.pipeline_mode<synchronous>, transform_indices = @transform_9, window_bounds = array<i64: 2, 1, 32>}, {pipeline_mode = #tpu.pipeline_mode<synchronous>, transform_indices = @transform_10, window_bounds = array<i64: 2, 1, 32>}, {pipeline_mode = #tpu.pipeline_mode<synchronous>, transform_indices = @transform_11, window_bounds = array<i64: 2, 32, 128>}, {pipeline_mode = #tpu.pipeline_mode<synchronous>, transform_indices = @transform_12, window_bounds = array<i64: 2, 1, 128>}, {pipeline_mode = #tpu.pipeline_mode<synchronous>, transform_indices = @transform_13, window_bounds = array<i64: 2, 128, 32>}, {pipeline_mode = #tpu.pipeline_mode<synchronous>, transform_indices = @transform_14, window_bounds = array<i64: 2, 1, 32>}, {pipeline_mode = #tpu.pipeline_mode<synchronous>, transform_indices = @transform_15, window_bounds = array<i64: 1, 32>}, {pipeline_mode = #tpu.pipeline_mode<synchronous>, transform_indices = @transform_16, window_bounds = array<i64: 1, 32>}, {pipeline_mode = #tpu.pipeline_mode<synchronous>, transform_indices = @transform_17, window_bounds = array<i64: 32, 128>}, {pipeline_mode = #tpu.pipeline_mode<synchronous>, transform_indices = @transform_18, window_bounds = array<i64: 1, 128>}, {transform_indices = @transform_19, window_bounds = array<i64: 1, 1, 128>}]} {
    %c0 = arith.constant 0 : index
    %c0_0 = arith.constant 0 : index
    %c0_1 = arith.constant 0 : index
    %0 = vector.load %arg1[%c0, %c0_0, %c0_1] : memref<1x24x64xf32, #tpu.memory_space<vmem>>, vector<1x24x64xf32>
    %1 = vector.shape_cast %0 : vector<1x24x64xf32> to vector<24x64xf32>
    %c0_2 = arith.constant 0 : index
    %c0_3 = arith.constant 0 : index
    %2 = vector.load %arg3[%c0_2, %c0_3] : memref<64x32xf32, #tpu.memory_space<vmem>>, vector<64x32xf32>
    %cst = arith.constant dense<0.000000e+00> : vector<24x32xf32>
    %3 = tpu.matmul %1, %2, %cst {dimension_numbers = #tpu.dot_dimension_numbers<[1], [0], [0], [1], [0, 0, 1, 1], [], []>} : vector<24x64xf32>, vector<64x32xf32>, vector<24x32xf32> -> vector<24x32xf32>
    %c0_4 = arith.constant 0 : index
    %c0_5 = arith.constant 0 : index
    %4 = vector.load %arg2[%c0_4, %c0_5] : memref<24x32xf32, #tpu.memory_space<vmem>>, vector<24x32xf32>
    %5 = arith.addf %3, %4 : vector<24x32xf32>
    %6 = tpu.iota {dimensions = array<i32: 1>} : vector<24x24xi32>
    %c23_i32 = arith.constant 23 : i32
    %7 = vector.broadcast %c23_i32 : i32 to vector<24x24xi32>
    %8 = arith.cmpi slt, %6, %7 : vector<24x24xi32>
    %cst_6 = arith.constant 0.000000e+00 : f32
    %cst_7 = arith.constant -1.000000e+30 : f32
    %9 = vector.broadcast %cst_6 : f32 to vector<24x24xf32>
    %10 = vector.broadcast %cst_7 : f32 to vector<24x24xf32>
    %11 = arith.select %8, %9, %10 : vector<24x24xi1>, vector<24x24xf32>
    %c0_8 = arith.constant 0 : index
    %c0_9 = arith.constant 0 : index
    %c0_10 = arith.constant 0 : index
    %12 = vector.load %arg4[%c0_8, %c0_9, %c0_10] : memref<2x1x32xf32, #tpu.memory_space<vmem>>, vector<1x1x32xf32>
    %13 = vector.shape_cast %12 : vector<1x1x32xf32> to vector<1x32xf32>
    %c0_11 = arith.constant 0 : index
    %c0_12 = arith.constant 0 : index
    %c0_13 = arith.constant 0 : index
    %14 = vector.load %arg5[%c0_11, %c0_12, %c0_13] : memref<2x1x32xf32, #tpu.memory_space<vmem>>, vector<1x1x32xf32>
    %15 = vector.shape_cast %14 : vector<1x1x32xf32> to vector<1x32xf32>
    %cst_14 = arith.constant dense<0.000000e+00> : vector<24xf32>
    %16 = vector.multi_reduction <add>, %5, %cst_14 [1] : vector<24x32xf32> to vector<24xf32>
    %17 = vector.shape_cast %16 : vector<24xf32> to vector<24x1xf32>
    %cst_15 = arith.constant 3.200000e+01 : f32
    %18 = vector.broadcast %cst_15 : f32 to vector<24x1xf32>
    %19 = arith.divf %17, %18 : vector<24x1xf32>
    %20 = vector.broadcast %19 : vector<24x1xf32> to vector<24x32xf32>
    %21 = arith.subf %5, %20 : vector<24x32xf32>
    %22 = arith.mulf %21, %21 : vector<24x32xf32>
    %cst_16 = arith.constant dense<0.000000e+00> : vector<24xf32>
    %23 = vector.multi_reduction <add>, %22, %cst_16 [1] : vector<24x32xf32> to vector<24xf32>
    %24 = vector.shape_cast %23 : vector<24xf32> to vector<24x1xf32>
    %cst_17 = arith.constant 3.200000e+01 : f32
    %25 = vector.broadcast %cst_17 : f32 to vector<24x1xf32>
    %26 = arith.divf %24, %25 : vector<24x1xf32>
    %27 = vector.broadcast %19 : vector<24x1xf32> to vector<24x32xf32>
    %28 = arith.subf %5, %27 : vector<24x32xf32>
    %cst_18 = arith.constant 9.99999997E-7 : f32
    %29 = vector.broadcast %cst_18 : f32 to vector<24x1xf32>
    %30 = arith.addf %26, %29 : vector<24x1xf32>
    %31 = math.rsqrt %30 : vector<24x1xf32>
    %32 = vector.broadcast %31 : vector<24x1xf32> to vector<24x32xf32>
    %33 = arith.mulf %28, %32 : vector<24x32xf32>
    %34 = vector.broadcast %13 : vector<1x32xf32> to vector<24x32xf32>
    %35 = arith.mulf %33, %34 : vector<24x32xf32>
    %36 = vector.broadcast %15 : vector<1x32xf32> to vector<24x32xf32>
    %37 = arith.addf %35, %36 : vector<24x32xf32>
    %c0_19 = arith.constant 0 : index
    %c0_20 = arith.constant 0 : index
    %c0_21 = arith.constant 0 : index
    %38 = vector.load %arg6[%c0_19, %c0_20, %c0_21] : memref<2x32x96xf32, #tpu.memory_space<vmem>>, vector<1x32x96xf32>
    %39 = vector.shape_cast %38 : vector<1x32x96xf32> to vector<32x96xf32>
    %cst_22 = arith.constant dense<0.000000e+00> : vector<24x96xf32>
    %40 = tpu.matmul %37, %39, %cst_22 {dimension_numbers = #tpu.dot_dimension_numbers<[1], [0], [0], [1], [0, 0, 1, 1], [], []>} : vector<24x32xf32>, vector<32x96xf32>, vector<24x96xf32> -> vector<24x96xf32>
    %c0_23 = arith.constant 0 : index
    %c0_24 = arith.constant 0 : index
    %c0_25 = arith.constant 0 : index
    %41 = vector.load %arg7[%c0_23, %c0_24, %c0_25] : memref<2x1x96xf32, #tpu.memory_space<vmem>>, vector<1x1x96xf32>
    %42 = vector.shape_cast %41 : vector<1x1x96xf32> to vector<1x96xf32>
    %43 = vector.broadcast %42 : vector<1x96xf32> to vector<24x96xf32>
    %44 = arith.addf %40, %43 : vector<24x96xf32>
    %45 = vector.extract_strided_slice %44 {offsets = [0, 0], sizes = [24, 8], strides = [1, 1]} : vector<24x96xf32> to vector<24x8xf32>
    %46 = vector.extract_strided_slice %44 {offsets = [0, 32], sizes = [24, 8], strides = [1, 1]} : vector<24x96xf32> to vector<24x8xf32>
    %47 = vector.extract_strided_slice %44 {offsets = [0, 64], sizes = [24, 8], strides = [1, 1]} : vector<24x96xf32> to vector<24x8xf32>
    %48 = tpu.transpose %46, [1, 0] : vector<24x8xf32> -> vector<8x24xf32>
    %cst_26 = arith.constant dense<0.000000e+00> : vector<24x24xf32>
    %49 = tpu.matmul %45, %48, %cst_26 {dimension_numbers = #tpu.dot_dimension_numbers<[1], [0], [0], [1], [0, 0, 1, 1], [], []>} : vector<24x8xf32>, vector<8x24xf32>, vector<24x24xf32> -> vector<24x24xf32>
    %cst_27 = arith.constant 0.353553385 : f32
    %50 = vector.broadcast %cst_27 : f32 to vector<24x24xf32>
    %51 = arith.mulf %49, %50 : vector<24x24xf32>
    %52 = arith.addf %51, %11 : vector<24x24xf32>
    %cst_28 = arith.constant dense<0xFF800000> : vector<24xf32>
    %53 = vector.multi_reduction <maximumf>, %52, %cst_28 [1] : vector<24x24xf32> to vector<24xf32>
    %54 = vector.shape_cast %53 : vector<24xf32> to vector<24x1xf32>
    %55 = vector.broadcast %54 : vector<24x1xf32> to vector<24x24xf32>
    %56 = arith.subf %52, %55 : vector<24x24xf32>
    %57 = math.exp %56 : vector<24x24xf32>
    %cst_29 = arith.constant dense<0.000000e+00> : vector<24xf32>
    %58 = vector.multi_reduction <add>, %57, %cst_29 [1] : vector<24x24xf32> to vector<24xf32>
    %59 = vector.shape_cast %58 : vector<24xf32> to vector<24x1xf32>
    %cst_30 = arith.constant dense<0.000000e+00> : vector<24x8xf32>
    %60 = tpu.matmul %57, %47, %cst_30 {dimension_numbers = #tpu.dot_dimension_numbers<[1], [0], [0], [1], [0, 0, 1, 1], [], []>} : vector<24x24xf32>, vector<24x8xf32>, vector<24x8xf32> -> vector<24x8xf32>
    %61 = tpu.reciprocal %59 {approx = true} : vector<24x1xf32> -> vector<24x1xf32>
    %62 = vector.broadcast %61 : vector<24x1xf32> to vector<24x8xf32>
    %63 = arith.mulf %60, %62 : vector<24x8xf32>
    %64 = vector.extract_strided_slice %44 {offsets = [0, 8], sizes = [24, 8], strides = [1, 1]} : vector<24x96xf32> to vector<24x8xf32>
    %65 = vector.extract_strided_slice %44 {offsets = [0, 40], sizes = [24, 8], strides = [1, 1]} : vector<24x96xf32> to vector<24x8xf32>
    %66 = vector.extract_strided_slice %44 {offsets = [0, 72], sizes = [24, 8], strides = [1, 1]} : vector<24x96xf32> to vector<24x8xf32>
    %67 = tpu.transpose %65, [1, 0] : vector<24x8xf32> -> vector<8x24xf32>
    %cst_31 = arith.constant dense<0.000000e+00> : vector<24x24xf32>
    %68 = tpu.matmul %64, %67, %cst_31 {dimension_numbers = #tpu.dot_dimension_numbers<[1], [0], [0], [1], [0, 0, 1, 1], [], []>} : vector<24x8xf32>, vector<8x24xf32>, vector<24x24xf32> -> vector<24x24xf32>
    %cst_32 = arith.constant 0.353553385 : f32
    %69 = vector.broadcast %cst_32 : f32 to vector<24x24xf32>
    %70 = arith.mulf %68, %69 : vector<24x24xf32>
    %71 = arith.addf %70, %11 : vector<24x24xf32>
    %cst_33 = arith.constant dense<0xFF800000> : vector<24xf32>
    %72 = vector.multi_reduction <maximumf>, %71, %cst_33 [1] : vector<24x24xf32> to vector<24xf32>
    %73 = vector.shape_cast %72 : vector<24xf32> to vector<24x1xf32>
    %74 = vector.broadcast %73 : vector<24x1xf32> to vector<24x24xf32>
    %75 = arith.subf %71, %74 : vector<24x24xf32>
    %76 = math.exp %75 : vector<24x24xf32>
    %cst_34 = arith.constant dense<0.000000e+00> : vector<24xf32>
    %77 = vector.multi_reduction <add>, %76, %cst_34 [1] : vector<24x24xf32> to vector<24xf32>
    %78 = vector.shape_cast %77 : vector<24xf32> to vector<24x1xf32>
    %cst_35 = arith.constant dense<0.000000e+00> : vector<24x8xf32>
    %79 = tpu.matmul %76, %66, %cst_35 {dimension_numbers = #tpu.dot_dimension_numbers<[1], [0], [0], [1], [0, 0, 1, 1], [], []>} : vector<24x24xf32>, vector<24x8xf32>, vector<24x8xf32> -> vector<24x8xf32>
    %80 = tpu.reciprocal %78 {approx = true} : vector<24x1xf32> -> vector<24x1xf32>
    %81 = vector.broadcast %80 : vector<24x1xf32> to vector<24x8xf32>
    %82 = arith.mulf %79, %81 : vector<24x8xf32>
    %83 = vector.extract_strided_slice %44 {offsets = [0, 16], sizes = [24, 8], strides = [1, 1]} : vector<24x96xf32> to vector<24x8xf32>
    %84 = vector.extract_strided_slice %44 {offsets = [0, 48], sizes = [24, 8], strides = [1, 1]} : vector<24x96xf32> to vector<24x8xf32>
    %85 = vector.extract_strided_slice %44 {offsets = [0, 80], sizes = [24, 8], strides = [1, 1]} : vector<24x96xf32> to vector<24x8xf32>
    %86 = tpu.transpose %84, [1, 0] : vector<24x8xf32> -> vector<8x24xf32>
    %cst_36 = arith.constant dense<0.000000e+00> : vector<24x24xf32>
    %87 = tpu.matmul %83, %86, %cst_36 {dimension_numbers = #tpu.dot_dimension_numbers<[1], [0], [0], [1], [0, 0, 1, 1], [], []>} : vector<24x8xf32>, vector<8x24xf32>, vector<24x24xf32> -> vector<24x24xf32>
    %cst_37 = arith.constant 0.353553385 : f32
    %88 = vector.broadcast %cst_37 : f32 to vector<24x24xf32>
    %89 = arith.mulf %87, %88 : vector<24x24xf32>
    %90 = arith.addf %89, %11 : vector<24x24xf32>
    %cst_38 = arith.constant dense<0xFF800000> : vector<24xf32>
    %91 = vector.multi_reduction <maximumf>, %90, %cst_38 [1] : vector<24x24xf32> to vector<24xf32>
    %92 = vector.shape_cast %91 : vector<24xf32> to vector<24x1xf32>
    %93 = vector.broadcast %92 : vector<24x1xf32> to vector<24x24xf32>
    %94 = arith.subf %90, %93 : vector<24x24xf32>
    %95 = math.exp %94 : vector<24x24xf32>
    %cst_39 = arith.constant dense<0.000000e+00> : vector<24xf32>
    %96 = vector.multi_reduction <add>, %95, %cst_39 [1] : vector<24x24xf32> to vector<24xf32>
    %97 = vector.shape_cast %96 : vector<24xf32> to vector<24x1xf32>
    %cst_40 = arith.constant dense<0.000000e+00> : vector<24x8xf32>
    %98 = tpu.matmul %95, %85, %cst_40 {dimension_numbers = #tpu.dot_dimension_numbers<[1], [0], [0], [1], [0, 0, 1, 1], [], []>} : vector<24x24xf32>, vector<24x8xf32>, vector<24x8xf32> -> vector<24x8xf32>
    %99 = tpu.reciprocal %97 {approx = true} : vector<24x1xf32> -> vector<24x1xf32>
    %100 = vector.broadcast %99 : vector<24x1xf32> to vector<24x8xf32>
    %101 = arith.mulf %98, %100 : vector<24x8xf32>
    %102 = vector.extract_strided_slice %44 {offsets = [0, 24], sizes = [24, 8], strides = [1, 1]} : vector<24x96xf32> to vector<24x8xf32>
    %103 = vector.extract_strided_slice %44 {offsets = [0, 56], sizes = [24, 8], strides = [1, 1]} : vector<24x96xf32> to vector<24x8xf32>
    %104 = vector.extract_strided_slice %44 {offsets = [0, 88], sizes = [24, 8], strides = [1, 1]} : vector<24x96xf32> to vector<24x8xf32>
    %105 = tpu.transpose %103, [1, 0] : vector<24x8xf32> -> vector<8x24xf32>
    %cst_41 = arith.constant dense<0.000000e+00> : vector<24x24xf32>
    %106 = tpu.matmul %102, %105, %cst_41 {dimension_numbers = #tpu.dot_dimension_numbers<[1], [0], [0], [1], [0, 0, 1, 1], [], []>} : vector<24x8xf32>, vector<8x24xf32>, vector<24x24xf32> -> vector<24x24xf32>
    %cst_42 = arith.constant 0.353553385 : f32
    %107 = vector.broadcast %cst_42 : f32 to vector<24x24xf32>
    %108 = arith.mulf %106, %107 : vector<24x24xf32>
    %109 = arith.addf %108, %11 : vector<24x24xf32>
    %cst_43 = arith.constant dense<0xFF800000> : vector<24xf32>
    %110 = vector.multi_reduction <maximumf>, %109, %cst_43 [1] : vector<24x24xf32> to vector<24xf32>
    %111 = vector.shape_cast %110 : vector<24xf32> to vector<24x1xf32>
    %112 = vector.broadcast %111 : vector<24x1xf32> to vector<24x24xf32>
    %113 = arith.subf %109, %112 : vector<24x24xf32>
    %114 = math.exp %113 : vector<24x24xf32>
    %cst_44 = arith.constant dense<0.000000e+00> : vector<24xf32>
    %115 = vector.multi_reduction <add>, %114, %cst_44 [1] : vector<24x24xf32> to vector<24xf32>
    %116 = vector.shape_cast %115 : vector<24xf32> to vector<24x1xf32>
    %cst_45 = arith.constant dense<0.000000e+00> : vector<24x8xf32>
    %117 = tpu.matmul %114, %104, %cst_45 {dimension_numbers = #tpu.dot_dimension_numbers<[1], [0], [0], [1], [0, 0, 1, 1], [], []>} : vector<24x24xf32>, vector<24x8xf32>, vector<24x8xf32> -> vector<24x8xf32>
    %118 = tpu.reciprocal %116 {approx = true} : vector<24x1xf32> -> vector<24x1xf32>
    %119 = vector.broadcast %118 : vector<24x1xf32> to vector<24x8xf32>
    %120 = arith.mulf %117, %119 : vector<24x8xf32>
    %121 = tpu.concatenate %63, %82, %101, %120 in 1 : vector<24x8xf32>, vector<24x8xf32>, vector<24x8xf32>, vector<24x8xf32> -> vector<24x32xf32>
    %c0_46 = arith.constant 0 : index
    %c0_47 = arith.constant 0 : index
    %c0_48 = arith.constant 0 : index
    %122 = vector.load %arg8[%c0_46, %c0_47, %c0_48] : memref<2x32x32xf32, #tpu.memory_space<vmem>>, vector<1x32x32xf32>
    %123 = vector.shape_cast %122 : vector<1x32x32xf32> to vector<32x32xf32>
    %cst_49 = arith.constant dense<0.000000e+00> : vector<24x32xf32>
    %124 = tpu.matmul %121, %123, %cst_49 {dimension_numbers = #tpu.dot_dimension_numbers<[1], [0], [0], [1], [0, 0, 1, 1], [], []>} : vector<24x32xf32>, vector<32x32xf32>, vector<24x32xf32> -> vector<24x32xf32>
    %125 = arith.addf %5, %124 : vector<24x32xf32>
    %c0_50 = arith.constant 0 : index
    %c0_51 = arith.constant 0 : index
    %c0_52 = arith.constant 0 : index
    %126 = vector.load %arg9[%c0_50, %c0_51, %c0_52] : memref<2x1x32xf32, #tpu.memory_space<vmem>>, vector<1x1x32xf32>
    %127 = vector.shape_cast %126 : vector<1x1x32xf32> to vector<1x32xf32>
    %128 = vector.broadcast %127 : vector<1x32xf32> to vector<24x32xf32>
    %129 = arith.addf %125, %128 : vector<24x32xf32>
    %c0_53 = arith.constant 0 : index
    %c0_54 = arith.constant 0 : index
    %c0_55 = arith.constant 0 : index
    %130 = vector.load %arg10[%c0_53, %c0_54, %c0_55] : memref<2x1x32xf32, #tpu.memory_space<vmem>>, vector<1x1x32xf32>
    %131 = vector.shape_cast %130 : vector<1x1x32xf32> to vector<1x32xf32>
    %c0_56 = arith.constant 0 : index
    %c0_57 = arith.constant 0 : index
    %c0_58 = arith.constant 0 : index
    %132 = vector.load %arg11[%c0_56, %c0_57, %c0_58] : memref<2x1x32xf32, #tpu.memory_space<vmem>>, vector<1x1x32xf32>
    %133 = vector.shape_cast %132 : vector<1x1x32xf32> to vector<1x32xf32>
    %cst_59 = arith.constant dense<0.000000e+00> : vector<24xf32>
    %134 = vector.multi_reduction <add>, %129, %cst_59 [1] : vector<24x32xf32> to vector<24xf32>
    %135 = vector.shape_cast %134 : vector<24xf32> to vector<24x1xf32>
    %cst_60 = arith.constant 3.200000e+01 : f32
    %136 = vector.broadcast %cst_60 : f32 to vector<24x1xf32>
    %137 = arith.divf %135, %136 : vector<24x1xf32>
    %138 = vector.broadcast %137 : vector<24x1xf32> to vector<24x32xf32>
    %139 = arith.subf %129, %138 : vector<24x32xf32>
    %140 = arith.mulf %139, %139 : vector<24x32xf32>
    %cst_61 = arith.constant dense<0.000000e+00> : vector<24xf32>
    %141 = vector.multi_reduction <add>, %140, %cst_61 [1] : vector<24x32xf32> to vector<24xf32>
    %142 = vector.shape_cast %141 : vector<24xf32> to vector<24x1xf32>
    %cst_62 = arith.constant 3.200000e+01 : f32
    %143 = vector.broadcast %cst_62 : f32 to vector<24x1xf32>
    %144 = arith.divf %142, %143 : vector<24x1xf32>
    %145 = vector.broadcast %137 : vector<24x1xf32> to vector<24x32xf32>
    %146 = arith.subf %129, %145 : vector<24x32xf32>
    %cst_63 = arith.constant 9.99999997E-7 : f32
    %147 = vector.broadcast %cst_63 : f32 to vector<24x1xf32>
    %148 = arith.addf %144, %147 : vector<24x1xf32>
    %149 = math.rsqrt %148 : vector<24x1xf32>
    %150 = vector.broadcast %149 : vector<24x1xf32> to vector<24x32xf32>
    %151 = arith.mulf %146, %150 : vector<24x32xf32>
    %152 = vector.broadcast %131 : vector<1x32xf32> to vector<24x32xf32>
    %153 = arith.mulf %151, %152 : vector<24x32xf32>
    %154 = vector.broadcast %133 : vector<1x32xf32> to vector<24x32xf32>
    %155 = arith.addf %153, %154 : vector<24x32xf32>
    %c0_64 = arith.constant 0 : index
    %c0_65 = arith.constant 0 : index
    %c0_66 = arith.constant 0 : index
    %156 = vector.load %arg12[%c0_64, %c0_65, %c0_66] : memref<2x32x128xf32, #tpu.memory_space<vmem>>, vector<1x32x128xf32>
    %157 = vector.shape_cast %156 : vector<1x32x128xf32> to vector<32x128xf32>
    %cst_67 = arith.constant dense<0.000000e+00> : vector<24x128xf32>
    %158 = tpu.matmul %155, %157, %cst_67 {dimension_numbers = #tpu.dot_dimension_numbers<[1], [0], [0], [1], [0, 0, 1, 1], [], []>} : vector<24x32xf32>, vector<32x128xf32>, vector<24x128xf32> -> vector<24x128xf32>
    %c0_68 = arith.constant 0 : index
    %c0_69 = arith.constant 0 : index
    %c0_70 = arith.constant 0 : index
    %159 = vector.load %arg13[%c0_68, %c0_69, %c0_70] : memref<2x1x128xf32, #tpu.memory_space<vmem>>, vector<1x1x128xf32>
    %160 = vector.shape_cast %159 : vector<1x1x128xf32> to vector<1x128xf32>
    %161 = vector.broadcast %160 : vector<1x128xf32> to vector<24x128xf32>
    %162 = arith.addf %158, %161 : vector<24x128xf32>
    %cst_71 = arith.constant 5.000000e-01 : f32
    %163 = vector.broadcast %cst_71 : f32 to vector<24x128xf32>
    %164 = arith.mulf %163, %162 : vector<24x128xf32>
    %cst_72 = arith.constant 0.707106769 : f32
    %165 = vector.broadcast %cst_72 : f32 to vector<24x128xf32>
    %166 = arith.mulf %162, %165 : vector<24x128xf32>
    %167 = math.erf %166 : vector<24x128xf32>
    %cst_73 = arith.constant 1.000000e+00 : f32
    %168 = vector.broadcast %cst_73 : f32 to vector<24x128xf32>
    %169 = arith.addf %168, %167 : vector<24x128xf32>
    %170 = arith.mulf %164, %169 : vector<24x128xf32>
    %c0_74 = arith.constant 0 : index
    %c0_75 = arith.constant 0 : index
    %c0_76 = arith.constant 0 : index
    %171 = vector.load %arg14[%c0_74, %c0_75, %c0_76] : memref<2x128x32xf32, #tpu.memory_space<vmem>>, vector<1x128x32xf32>
    %172 = vector.shape_cast %171 : vector<1x128x32xf32> to vector<128x32xf32>
    %cst_77 = arith.constant dense<0.000000e+00> : vector<24x32xf32>
    %173 = tpu.matmul %170, %172, %cst_77 {dimension_numbers = #tpu.dot_dimension_numbers<[1], [0], [0], [1], [0, 0, 1, 1], [], []>} : vector<24x128xf32>, vector<128x32xf32>, vector<24x32xf32> -> vector<24x32xf32>
    %174 = arith.addf %129, %173 : vector<24x32xf32>
    %c0_78 = arith.constant 0 : index
    %c0_79 = arith.constant 0 : index
    %c0_80 = arith.constant 0 : index
    %175 = vector.load %arg15[%c0_78, %c0_79, %c0_80] : memref<2x1x32xf32, #tpu.memory_space<vmem>>, vector<1x1x32xf32>
    %176 = vector.shape_cast %175 : vector<1x1x32xf32> to vector<1x32xf32>
    %177 = vector.broadcast %176 : vector<1x32xf32> to vector<24x32xf32>
    %178 = arith.addf %174, %177 : vector<24x32xf32>
    %c1 = arith.constant 1 : index
    %c0_81 = arith.constant 0 : index
    %c0_82 = arith.constant 0 : index
    %179 = vector.load %arg4[%c1, %c0_81, %c0_82] : memref<2x1x32xf32, #tpu.memory_space<vmem>>, vector<1x1x32xf32>
    %180 = vector.shape_cast %179 : vector<1x1x32xf32> to vector<1x32xf32>
    %c1_83 = arith.constant 1 : index
    %c0_84 = arith.constant 0 : index
    %c0_85 = arith.constant 0 : index
    %181 = vector.load %arg5[%c1_83, %c0_84, %c0_85] : memref<2x1x32xf32, #tpu.memory_space<vmem>>, vector<1x1x32xf32>
    %182 = vector.shape_cast %181 : vector<1x1x32xf32> to vector<1x32xf32>
    %cst_86 = arith.constant dense<0.000000e+00> : vector<24xf32>
    %183 = vector.multi_reduction <add>, %178, %cst_86 [1] : vector<24x32xf32> to vector<24xf32>
    %184 = vector.shape_cast %183 : vector<24xf32> to vector<24x1xf32>
    %cst_87 = arith.constant 3.200000e+01 : f32
    %185 = vector.broadcast %cst_87 : f32 to vector<24x1xf32>
    %186 = arith.divf %184, %185 : vector<24x1xf32>
    %187 = vector.broadcast %186 : vector<24x1xf32> to vector<24x32xf32>
    %188 = arith.subf %178, %187 : vector<24x32xf32>
    %189 = arith.mulf %188, %188 : vector<24x32xf32>
    %cst_88 = arith.constant dense<0.000000e+00> : vector<24xf32>
    %190 = vector.multi_reduction <add>, %189, %cst_88 [1] : vector<24x32xf32> to vector<24xf32>
    %191 = vector.shape_cast %190 : vector<24xf32> to vector<24x1xf32>
    %cst_89 = arith.constant 3.200000e+01 : f32
    %192 = vector.broadcast %cst_89 : f32 to vector<24x1xf32>
    %193 = arith.divf %191, %192 : vector<24x1xf32>
    %194 = vector.broadcast %186 : vector<24x1xf32> to vector<24x32xf32>
    %195 = arith.subf %178, %194 : vector<24x32xf32>
    %cst_90 = arith.constant 9.99999997E-7 : f32
    %196 = vector.broadcast %cst_90 : f32 to vector<24x1xf32>
    %197 = arith.addf %193, %196 : vector<24x1xf32>
    %198 = math.rsqrt %197 : vector<24x1xf32>
    %199 = vector.broadcast %198 : vector<24x1xf32> to vector<24x32xf32>
    %200 = arith.mulf %195, %199 : vector<24x32xf32>
    %201 = vector.broadcast %180 : vector<1x32xf32> to vector<24x32xf32>
    %202 = arith.mulf %200, %201 : vector<24x32xf32>
    %203 = vector.broadcast %182 : vector<1x32xf32> to vector<24x32xf32>
    %204 = arith.addf %202, %203 : vector<24x32xf32>
    %c1_91 = arith.constant 1 : index
    %c0_92 = arith.constant 0 : index
    %c0_93 = arith.constant 0 : index
    %205 = vector.load %arg6[%c1_91, %c0_92, %c0_93] : memref<2x32x96xf32, #tpu.memory_space<vmem>>, vector<1x32x96xf32>
    %206 = vector.shape_cast %205 : vector<1x32x96xf32> to vector<32x96xf32>
    %cst_94 = arith.constant dense<0.000000e+00> : vector<24x96xf32>
    %207 = tpu.matmul %204, %206, %cst_94 {dimension_numbers = #tpu.dot_dimension_numbers<[1], [0], [0], [1], [0, 0, 1, 1], [], []>} : vector<24x32xf32>, vector<32x96xf32>, vector<24x96xf32> -> vector<24x96xf32>
    %c1_95 = arith.constant 1 : index
    %c0_96 = arith.constant 0 : index
    %c0_97 = arith.constant 0 : index
    %208 = vector.load %arg7[%c1_95, %c0_96, %c0_97] : memref<2x1x96xf32, #tpu.memory_space<vmem>>, vector<1x1x96xf32>
    %209 = vector.shape_cast %208 : vector<1x1x96xf32> to vector<1x96xf32>
    %210 = vector.broadcast %209 : vector<1x96xf32> to vector<24x96xf32>
    %211 = arith.addf %207, %210 : vector<24x96xf32>
    %212 = vector.extract_strided_slice %211 {offsets = [0, 0], sizes = [24, 8], strides = [1, 1]} : vector<24x96xf32> to vector<24x8xf32>
    %213 = vector.extract_strided_slice %211 {offsets = [0, 32], sizes = [24, 8], strides = [1, 1]} : vector<24x96xf32> to vector<24x8xf32>
    %214 = vector.extract_strided_slice %211 {offsets = [0, 64], sizes = [24, 8], strides = [1, 1]} : vector<24x96xf32> to vector<24x8xf32>
    %215 = tpu.transpose %213, [1, 0] : vector<24x8xf32> -> vector<8x24xf32>
    %cst_98 = arith.constant dense<0.000000e+00> : vector<24x24xf32>
    %216 = tpu.matmul %212, %215, %cst_98 {dimension_numbers = #tpu.dot_dimension_numbers<[1], [0], [0], [1], [0, 0, 1, 1], [], []>} : vector<24x8xf32>, vector<8x24xf32>, vector<24x24xf32> -> vector<24x24xf32>
    %cst_99 = arith.constant 0.353553385 : f32
    %217 = vector.broadcast %cst_99 : f32 to vector<24x24xf32>
    %218 = arith.mulf %216, %217 : vector<24x24xf32>
    %219 = arith.addf %218, %11 : vector<24x24xf32>
    %cst_100 = arith.constant dense<0xFF800000> : vector<24xf32>
    %220 = vector.multi_reduction <maximumf>, %219, %cst_100 [1] : vector<24x24xf32> to vector<24xf32>
    %221 = vector.shape_cast %220 : vector<24xf32> to vector<24x1xf32>
    %222 = vector.broadcast %221 : vector<24x1xf32> to vector<24x24xf32>
    %223 = arith.subf %219, %222 : vector<24x24xf32>
    %224 = math.exp %223 : vector<24x24xf32>
    %cst_101 = arith.constant dense<0.000000e+00> : vector<24xf32>
    %225 = vector.multi_reduction <add>, %224, %cst_101 [1] : vector<24x24xf32> to vector<24xf32>
    %226 = vector.shape_cast %225 : vector<24xf32> to vector<24x1xf32>
    %cst_102 = arith.constant dense<0.000000e+00> : vector<24x8xf32>
    %227 = tpu.matmul %224, %214, %cst_102 {dimension_numbers = #tpu.dot_dimension_numbers<[1], [0], [0], [1], [0, 0, 1, 1], [], []>} : vector<24x24xf32>, vector<24x8xf32>, vector<24x8xf32> -> vector<24x8xf32>
    %228 = tpu.reciprocal %226 {approx = true} : vector<24x1xf32> -> vector<24x1xf32>
    %229 = vector.broadcast %228 : vector<24x1xf32> to vector<24x8xf32>
    %230 = arith.mulf %227, %229 : vector<24x8xf32>
    %231 = vector.extract_strided_slice %211 {offsets = [0, 8], sizes = [24, 8], strides = [1, 1]} : vector<24x96xf32> to vector<24x8xf32>
    %232 = vector.extract_strided_slice %211 {offsets = [0, 40], sizes = [24, 8], strides = [1, 1]} : vector<24x96xf32> to vector<24x8xf32>
    %233 = vector.extract_strided_slice %211 {offsets = [0, 72], sizes = [24, 8], strides = [1, 1]} : vector<24x96xf32> to vector<24x8xf32>
    %234 = tpu.transpose %232, [1, 0] : vector<24x8xf32> -> vector<8x24xf32>
    %cst_103 = arith.constant dense<0.000000e+00> : vector<24x24xf32>
    %235 = tpu.matmul %231, %234, %cst_103 {dimension_numbers = #tpu.dot_dimension_numbers<[1], [0], [0], [1], [0, 0, 1, 1], [], []>} : vector<24x8xf32>, vector<8x24xf32>, vector<24x24xf32> -> vector<24x24xf32>
    %cst_104 = arith.constant 0.353553385 : f32
    %236 = vector.broadcast %cst_104 : f32 to vector<24x24xf32>
    %237 = arith.mulf %235, %236 : vector<24x24xf32>
    %238 = arith.addf %237, %11 : vector<24x24xf32>
    %cst_105 = arith.constant dense<0xFF800000> : vector<24xf32>
    %239 = vector.multi_reduction <maximumf>, %238, %cst_105 [1] : vector<24x24xf32> to vector<24xf32>
    %240 = vector.shape_cast %239 : vector<24xf32> to vector<24x1xf32>
    %241 = vector.broadcast %240 : vector<24x1xf32> to vector<24x24xf32>
    %242 = arith.subf %238, %241 : vector<24x24xf32>
    %243 = math.exp %242 : vector<24x24xf32>
    %cst_106 = arith.constant dense<0.000000e+00> : vector<24xf32>
    %244 = vector.multi_reduction <add>, %243, %cst_106 [1] : vector<24x24xf32> to vector<24xf32>
    %245 = vector.shape_cast %244 : vector<24xf32> to vector<24x1xf32>
    %cst_107 = arith.constant dense<0.000000e+00> : vector<24x8xf32>
    %246 = tpu.matmul %243, %233, %cst_107 {dimension_numbers = #tpu.dot_dimension_numbers<[1], [0], [0], [1], [0, 0, 1, 1], [], []>} : vector<24x24xf32>, vector<24x8xf32>, vector<24x8xf32> -> vector<24x8xf32>
    %247 = tpu.reciprocal %245 {approx = true} : vector<24x1xf32> -> vector<24x1xf32>
    %248 = vector.broadcast %247 : vector<24x1xf32> to vector<24x8xf32>
    %249 = arith.mulf %246, %248 : vector<24x8xf32>
    %250 = vector.extract_strided_slice %211 {offsets = [0, 16], sizes = [24, 8], strides = [1, 1]} : vector<24x96xf32> to vector<24x8xf32>
    %251 = vector.extract_strided_slice %211 {offsets = [0, 48], sizes = [24, 8], strides = [1, 1]} : vector<24x96xf32> to vector<24x8xf32>
    %252 = vector.extract_strided_slice %211 {offsets = [0, 80], sizes = [24, 8], strides = [1, 1]} : vector<24x96xf32> to vector<24x8xf32>
    %253 = tpu.transpose %251, [1, 0] : vector<24x8xf32> -> vector<8x24xf32>
    %cst_108 = arith.constant dense<0.000000e+00> : vector<24x24xf32>
    %254 = tpu.matmul %250, %253, %cst_108 {dimension_numbers = #tpu.dot_dimension_numbers<[1], [0], [0], [1], [0, 0, 1, 1], [], []>} : vector<24x8xf32>, vector<8x24xf32>, vector<24x24xf32> -> vector<24x24xf32>
    %cst_109 = arith.constant 0.353553385 : f32
    %255 = vector.broadcast %cst_109 : f32 to vector<24x24xf32>
    %256 = arith.mulf %254, %255 : vector<24x24xf32>
    %257 = arith.addf %256, %11 : vector<24x24xf32>
    %cst_110 = arith.constant dense<0xFF800000> : vector<24xf32>
    %258 = vector.multi_reduction <maximumf>, %257, %cst_110 [1] : vector<24x24xf32> to vector<24xf32>
    %259 = vector.shape_cast %258 : vector<24xf32> to vector<24x1xf32>
    %260 = vector.broadcast %259 : vector<24x1xf32> to vector<24x24xf32>
    %261 = arith.subf %257, %260 : vector<24x24xf32>
    %262 = math.exp %261 : vector<24x24xf32>
    %cst_111 = arith.constant dense<0.000000e+00> : vector<24xf32>
    %263 = vector.multi_reduction <add>, %262, %cst_111 [1] : vector<24x24xf32> to vector<24xf32>
    %264 = vector.shape_cast %263 : vector<24xf32> to vector<24x1xf32>
    %cst_112 = arith.constant dense<0.000000e+00> : vector<24x8xf32>
    %265 = tpu.matmul %262, %252, %cst_112 {dimension_numbers = #tpu.dot_dimension_numbers<[1], [0], [0], [1], [0, 0, 1, 1], [], []>} : vector<24x24xf32>, vector<24x8xf32>, vector<24x8xf32> -> vector<24x8xf32>
    %266 = tpu.reciprocal %264 {approx = true} : vector<24x1xf32> -> vector<24x1xf32>
    %267 = vector.broadcast %266 : vector<24x1xf32> to vector<24x8xf32>
    %268 = arith.mulf %265, %267 : vector<24x8xf32>
    %269 = vector.extract_strided_slice %211 {offsets = [0, 24], sizes = [24, 8], strides = [1, 1]} : vector<24x96xf32> to vector<24x8xf32>
    %270 = vector.extract_strided_slice %211 {offsets = [0, 56], sizes = [24, 8], strides = [1, 1]} : vector<24x96xf32> to vector<24x8xf32>
    %271 = vector.extract_strided_slice %211 {offsets = [0, 88], sizes = [24, 8], strides = [1, 1]} : vector<24x96xf32> to vector<24x8xf32>
    %272 = tpu.transpose %270, [1, 0] : vector<24x8xf32> -> vector<8x24xf32>
    %cst_113 = arith.constant dense<0.000000e+00> : vector<24x24xf32>
    %273 = tpu.matmul %269, %272, %cst_113 {dimension_numbers = #tpu.dot_dimension_numbers<[1], [0], [0], [1], [0, 0, 1, 1], [], []>} : vector<24x8xf32>, vector<8x24xf32>, vector<24x24xf32> -> vector<24x24xf32>
    %cst_114 = arith.constant 0.353553385 : f32
    %274 = vector.broadcast %cst_114 : f32 to vector<24x24xf32>
    %275 = arith.mulf %273, %274 : vector<24x24xf32>
    %276 = arith.addf %275, %11 : vector<24x24xf32>
    %cst_115 = arith.constant dense<0xFF800000> : vector<24xf32>
    %277 = vector.multi_reduction <maximumf>, %276, %cst_115 [1] : vector<24x24xf32> to vector<24xf32>
    %278 = vector.shape_cast %277 : vector<24xf32> to vector<24x1xf32>
    %279 = vector.broadcast %278 : vector<24x1xf32> to vector<24x24xf32>
    %280 = arith.subf %276, %279 : vector<24x24xf32>
    %281 = math.exp %280 : vector<24x24xf32>
    %cst_116 = arith.constant dense<0.000000e+00> : vector<24xf32>
    %282 = vector.multi_reduction <add>, %281, %cst_116 [1] : vector<24x24xf32> to vector<24xf32>
    %283 = vector.shape_cast %282 : vector<24xf32> to vector<24x1xf32>
    %cst_117 = arith.constant dense<0.000000e+00> : vector<24x8xf32>
    %284 = tpu.matmul %281, %271, %cst_117 {dimension_numbers = #tpu.dot_dimension_numbers<[1], [0], [0], [1], [0, 0, 1, 1], [], []>} : vector<24x24xf32>, vector<24x8xf32>, vector<24x8xf32> -> vector<24x8xf32>
    %285 = tpu.reciprocal %283 {approx = true} : vector<24x1xf32> -> vector<24x1xf32>
    %286 = vector.broadcast %285 : vector<24x1xf32> to vector<24x8xf32>
    %287 = arith.mulf %284, %286 : vector<24x8xf32>
    %288 = tpu.concatenate %230, %249, %268, %287 in 1 : vector<24x8xf32>, vector<24x8xf32>, vector<24x8xf32>, vector<24x8xf32> -> vector<24x32xf32>
    %c1_118 = arith.constant 1 : index
    %c0_119 = arith.constant 0 : index
    %c0_120 = arith.constant 0 : index
    %289 = vector.load %arg8[%c1_118, %c0_119, %c0_120] : memref<2x32x32xf32, #tpu.memory_space<vmem>>, vector<1x32x32xf32>
    %290 = vector.shape_cast %289 : vector<1x32x32xf32> to vector<32x32xf32>
    %cst_121 = arith.constant dense<0.000000e+00> : vector<24x32xf32>
    %291 = tpu.matmul %288, %290, %cst_121 {dimension_numbers = #tpu.dot_dimension_numbers<[1], [0], [0], [1], [0, 0, 1, 1], [], []>} : vector<24x32xf32>, vector<32x32xf32>, vector<24x32xf32> -> vector<24x32xf32>
    %292 = arith.addf %178, %291 : vector<24x32xf32>
    %c1_122 = arith.constant 1 : index
    %c0_123 = arith.constant 0 : index
    %c0_124 = arith.constant 0 : index
    %293 = vector.load %arg9[%c1_122, %c0_123, %c0_124] : memref<2x1x32xf32, #tpu.memory_space<vmem>>, vector<1x1x32xf32>
    %294 = vector.shape_cast %293 : vector<1x1x32xf32> to vector<1x32xf32>
    %295 = vector.broadcast %294 : vector<1x32xf32> to vector<24x32xf32>
    %296 = arith.addf %292, %295 : vector<24x32xf32>
    %c1_125 = arith.constant 1 : index
    %c0_126 = arith.constant 0 : index
    %c0_127 = arith.constant 0 : index
    %297 = vector.load %arg10[%c1_125, %c0_126, %c0_127] : memref<2x1x32xf32, #tpu.memory_space<vmem>>, vector<1x1x32xf32>
    %298 = vector.shape_cast %297 : vector<1x1x32xf32> to vector<1x32xf32>
    %c1_128 = arith.constant 1 : index
    %c0_129 = arith.constant 0 : index
    %c0_130 = arith.constant 0 : index
    %299 = vector.load %arg11[%c1_128, %c0_129, %c0_130] : memref<2x1x32xf32, #tpu.memory_space<vmem>>, vector<1x1x32xf32>
    %300 = vector.shape_cast %299 : vector<1x1x32xf32> to vector<1x32xf32>
    %cst_131 = arith.constant dense<0.000000e+00> : vector<24xf32>
    %301 = vector.multi_reduction <add>, %296, %cst_131 [1] : vector<24x32xf32> to vector<24xf32>
    %302 = vector.shape_cast %301 : vector<24xf32> to vector<24x1xf32>
    %cst_132 = arith.constant 3.200000e+01 : f32
    %303 = vector.broadcast %cst_132 : f32 to vector<24x1xf32>
    %304 = arith.divf %302, %303 : vector<24x1xf32>
    %305 = vector.broadcast %304 : vector<24x1xf32> to vector<24x32xf32>
    %306 = arith.subf %296, %305 : vector<24x32xf32>
    %307 = arith.mulf %306, %306 : vector<24x32xf32>
    %cst_133 = arith.constant dense<0.000000e+00> : vector<24xf32>
    %308 = vector.multi_reduction <add>, %307, %cst_133 [1] : vector<24x32xf32> to vector<24xf32>
    %309 = vector.shape_cast %308 : vector<24xf32> to vector<24x1xf32>
    %cst_134 = arith.constant 3.200000e+01 : f32
    %310 = vector.broadcast %cst_134 : f32 to vector<24x1xf32>
    %311 = arith.divf %309, %310 : vector<24x1xf32>
    %312 = vector.broadcast %304 : vector<24x1xf32> to vector<24x32xf32>
    %313 = arith.subf %296, %312 : vector<24x32xf32>
    %cst_135 = arith.constant 9.99999997E-7 : f32
    %314 = vector.broadcast %cst_135 : f32 to vector<24x1xf32>
    %315 = arith.addf %311, %314 : vector<24x1xf32>
    %316 = math.rsqrt %315 : vector<24x1xf32>
    %317 = vector.broadcast %316 : vector<24x1xf32> to vector<24x32xf32>
    %318 = arith.mulf %313, %317 : vector<24x32xf32>
    %319 = vector.broadcast %298 : vector<1x32xf32> to vector<24x32xf32>
    %320 = arith.mulf %318, %319 : vector<24x32xf32>
    %321 = vector.broadcast %300 : vector<1x32xf32> to vector<24x32xf32>
    %322 = arith.addf %320, %321 : vector<24x32xf32>
    %c1_136 = arith.constant 1 : index
    %c0_137 = arith.constant 0 : index
    %c0_138 = arith.constant 0 : index
    %323 = vector.load %arg12[%c1_136, %c0_137, %c0_138] : memref<2x32x128xf32, #tpu.memory_space<vmem>>, vector<1x32x128xf32>
    %324 = vector.shape_cast %323 : vector<1x32x128xf32> to vector<32x128xf32>
    %cst_139 = arith.constant dense<0.000000e+00> : vector<24x128xf32>
    %325 = tpu.matmul %322, %324, %cst_139 {dimension_numbers = #tpu.dot_dimension_numbers<[1], [0], [0], [1], [0, 0, 1, 1], [], []>} : vector<24x32xf32>, vector<32x128xf32>, vector<24x128xf32> -> vector<24x128xf32>
    %c1_140 = arith.constant 1 : index
    %c0_141 = arith.constant 0 : index
    %c0_142 = arith.constant 0 : index
    %326 = vector.load %arg13[%c1_140, %c0_141, %c0_142] : memref<2x1x128xf32, #tpu.memory_space<vmem>>, vector<1x1x128xf32>
    %327 = vector.shape_cast %326 : vector<1x1x128xf32> to vector<1x128xf32>
    %328 = vector.broadcast %327 : vector<1x128xf32> to vector<24x128xf32>
    %329 = arith.addf %325, %328 : vector<24x128xf32>
    %cst_143 = arith.constant 5.000000e-01 : f32
    %330 = vector.broadcast %cst_143 : f32 to vector<24x128xf32>
    %331 = arith.mulf %330, %329 : vector<24x128xf32>
    %cst_144 = arith.constant 0.707106769 : f32
    %332 = vector.broadcast %cst_144 : f32 to vector<24x128xf32>
    %333 = arith.mulf %329, %332 : vector<24x128xf32>
    %334 = math.erf %333 : vector<24x128xf32>
    %cst_145 = arith.constant 1.000000e+00 : f32
    %335 = vector.broadcast %cst_145 : f32 to vector<24x128xf32>
    %336 = arith.addf %335, %334 : vector<24x128xf32>
    %337 = arith.mulf %331, %336 : vector<24x128xf32>
    %c1_146 = arith.constant 1 : index
    %c0_147 = arith.constant 0 : index
    %c0_148 = arith.constant 0 : index
    %338 = vector.load %arg14[%c1_146, %c0_147, %c0_148] : memref<2x128x32xf32, #tpu.memory_space<vmem>>, vector<1x128x32xf32>
    %339 = vector.shape_cast %338 : vector<1x128x32xf32> to vector<128x32xf32>
    %cst_149 = arith.constant dense<0.000000e+00> : vector<24x32xf32>
    %340 = tpu.matmul %337, %339, %cst_149 {dimension_numbers = #tpu.dot_dimension_numbers<[1], [0], [0], [1], [0, 0, 1, 1], [], []>} : vector<24x128xf32>, vector<128x32xf32>, vector<24x32xf32> -> vector<24x32xf32>
    %341 = arith.addf %296, %340 : vector<24x32xf32>
    %c1_150 = arith.constant 1 : index
    %c0_151 = arith.constant 0 : index
    %c0_152 = arith.constant 0 : index
    %342 = vector.load %arg15[%c1_150, %c0_151, %c0_152] : memref<2x1x32xf32, #tpu.memory_space<vmem>>, vector<1x1x32xf32>
    %343 = vector.shape_cast %342 : vector<1x1x32xf32> to vector<1x32xf32>
    %344 = vector.broadcast %343 : vector<1x32xf32> to vector<24x32xf32>
    %345 = arith.addf %341, %344 : vector<24x32xf32>
    %c0_153 = arith.constant 0 : index
    %c0_154 = arith.constant 0 : index
    %346 = vector.load %arg16[%c0_153, %c0_154] : memref<1x32xf32, #tpu.memory_space<vmem>>, vector<1x32xf32>
    %c0_155 = arith.constant 0 : index
    %c0_156 = arith.constant 0 : index
    %347 = vector.load %arg17[%c0_155, %c0_156] : memref<1x32xf32, #tpu.memory_space<vmem>>, vector<1x32xf32>
    %cst_157 = arith.constant dense<0.000000e+00> : vector<24xf32>
    %348 = vector.multi_reduction <add>, %345, %cst_157 [1] : vector<24x32xf32> to vector<24xf32>
    %349 = vector.shape_cast %348 : vector<24xf32> to vector<24x1xf32>
    %cst_158 = arith.constant 3.200000e+01 : f32
    %350 = vector.broadcast %cst_158 : f32 to vector<24x1xf32>
    %351 = arith.divf %349, %350 : vector<24x1xf32>
    %352 = vector.broadcast %351 : vector<24x1xf32> to vector<24x32xf32>
    %353 = arith.subf %345, %352 : vector<24x32xf32>
    %354 = arith.mulf %353, %353 : vector<24x32xf32>
    %cst_159 = arith.constant dense<0.000000e+00> : vector<24xf32>
    %355 = vector.multi_reduction <add>, %354, %cst_159 [1] : vector<24x32xf32> to vector<24xf32>
    %356 = vector.shape_cast %355 : vector<24xf32> to vector<24x1xf32>
    %cst_160 = arith.constant 3.200000e+01 : f32
    %357 = vector.broadcast %cst_160 : f32 to vector<24x1xf32>
    %358 = arith.divf %356, %357 : vector<24x1xf32>
    %359 = vector.broadcast %351 : vector<24x1xf32> to vector<24x32xf32>
    %360 = arith.subf %345, %359 : vector<24x32xf32>
    %cst_161 = arith.constant 9.99999974E-6 : f32
    %361 = vector.broadcast %cst_161 : f32 to vector<24x1xf32>
    %362 = arith.addf %358, %361 : vector<24x1xf32>
    %363 = math.rsqrt %362 : vector<24x1xf32>
    %364 = vector.broadcast %363 : vector<24x1xf32> to vector<24x32xf32>
    %365 = arith.mulf %360, %364 : vector<24x32xf32>
    %366 = vector.broadcast %346 : vector<1x32xf32> to vector<24x32xf32>
    %367 = arith.mulf %365, %366 : vector<24x32xf32>
    %368 = vector.broadcast %347 : vector<1x32xf32> to vector<24x32xf32>
    %369 = arith.addf %367, %368 : vector<24x32xf32>
    %370 = vector.extract_strided_slice %369 {offsets = [6, 0], sizes = [1, 32], strides = [1, 1]} : vector<24x32xf32> to vector<1x32xf32>
    %c0_162 = arith.constant 0 : index
    %c0_163 = arith.constant 0 : index
    %371 = vector.load %arg18[%c0_162, %c0_163] : memref<32x128xf32, #tpu.memory_space<vmem>>, vector<32x128xf32>
    %cst_164 = arith.constant dense<0.000000e+00> : vector<1x128xf32>
    %372 = tpu.matmul %370, %371, %cst_164 {dimension_numbers = #tpu.dot_dimension_numbers<[1], [0], [0], [1], [0, 0, 1, 1], [], []>} : vector<1x32xf32>, vector<32x128xf32>, vector<1x128xf32> -> vector<1x128xf32>
    %c0_165 = arith.constant 0 : index
    %c0_166 = arith.constant 0 : index
    %373 = vector.load %arg19[%c0_165, %c0_166] : memref<1x128xf32, #tpu.memory_space<vmem>>, vector<1x128xf32>
    %374 = arith.addf %372, %373 : vector<1x128xf32>
    %c0_167 = arith.constant 0 : index
    %c0_168 = arith.constant 0 : index
    %c0_169 = arith.constant 0 : index
    %375 = vector.load %arg20[%c0_167, %c0_168, %c0_169] : memref<1x1x128xf32, #tpu.memory_space<vmem>>, vector<1x1x128xf32>
    %376 = vector.shape_cast %375 : vector<1x1x128xf32> to vector<1x128xf32>
    %377 = vector.shape_cast %374 : vector<1x128xf32> to vector<1x1x128xf32>
    tpu.vector_store %arg20[%c0_167, %c0_168, %c0_169], %377 {strides = array<i32>} : memref<1x1x128xf32, #tpu.memory_space<vmem>>, vector<1x1x128xf32>,
    return
  }
  func.func @transform_0(%arg0: i32) -> (i32, i32, i32) {
    %c0_i32 = arith.constant 0 : i32
    %c0_i32_0 = arith.constant 0 : i32
    %c0_i32_1 = arith.constant 0 : i32
    return %arg0, %c0_i32, %c0_i32_0 : i32, i32, i32
  }
  func.func @transform_1(%arg0: i32) -> (i32, i32) {
    %c0_i32 = arith.constant 0 : i32
    %c0_i32_0 = arith.constant 0 : i32
    %c0_i32_1 = arith.constant 0 : i32
    return %c0_i32, %c0_i32_0 : i32, i32
  }
  func.func @transform_2(%arg0: i32) -> (i32, i32) {
    %c0_i32 = arith.constant 0 : i32
    %c0_i32_0 = arith.constant 0 : i32
    %c0_i32_1 = arith.constant 0 : i32
    return %c0_i32, %c0_i32_0 : i32, i32
  }
  func.func @transform_3(%arg0: i32) -> (i32, i32, i32) {
    %c0_i32 = arith.constant 0 : i32
    %c0_i32_0 = arith.constant 0 : i32
    %c0_i32_1 = arith.constant 0 : i32
    %c0_i32_2 = arith.constant 0 : i32
    return %c0_i32, %c0_i32_0, %c0_i32_1 : i32, i32, i32
  }
  func.func @transform_4(%arg0: i32) -> (i32, i32, i32) {
    %c0_i32 = arith.constant 0 : i32
    %c0_i32_0 = arith.constant 0 : i32
    %c0_i32_1 = arith.constant 0 : i32
    %c0_i32_2 = arith.constant 0 : i32
    return %c0_i32, %c0_i32_0, %c0_i32_1 : i32, i32, i32
  }
  func.func @transform_5(%arg0: i32) -> (i32, i32, i32) {
    %c0_i32 = arith.constant 0 : i32
    %c0_i32_0 = arith.constant 0 : i32
    %c0_i32_1 = arith.constant 0 : i32
    %c0_i32_2 = arith.constant 0 : i32
    return %c0_i32, %c0_i32_0, %c0_i32_1 : i32, i32, i32
  }
  func.func @transform_6(%arg0: i32) -> (i32, i32, i32) {
    %c0_i32 = arith.constant 0 : i32
    %c0_i32_0 = arith.constant 0 : i32
    %c0_i32_1 = arith.constant 0 : i32
    %c0_i32_2 = arith.constant 0 : i32
    return %c0_i32, %c0_i32_0, %c0_i32_1 : i32, i32, i32
  }
  func.func @transform_7(%arg0: i32) -> (i32, i32, i32) {
    %c0_i32 = arith.constant 0 : i32
    %c0_i32_0 = arith.constant 0 : i32
    %c0_i32_1 = arith.constant 0 : i32
    %c0_i32_2 = arith.constant 0 : i32
    return %c0_i32, %c0_i32_0, %c0_i32_1 : i32, i32, i32
  }
  func.func @transform_8(%arg0: i32) -> (i32, i32, i32) {
    %c0_i32 = arith.constant 0 : i32
    %c0_i32_0 = arith.constant 0 : i32
    %c0_i32_1 = arith.constant 0 : i32
    %c0_i32_2 = arith.constant 0 : i32
    return %c0_i32, %c0_i32_0, %c0_i32_1 : i32, i32, i32
  }
  func.func @transform_9(%arg0: i32) -> (i32, i32, i32) {
    %c0_i32 = arith.constant 0 : i32
    %c0_i32_0 = arith.constant 0 : i32
    %c0_i32_1 = arith.constant 0 : i32
    %c0_i32_2 = arith.constant 0 : i32
    return %c0_i32, %c0_i32_0, %c0_i32_1 : i32, i32, i32
  }
  func.func @transform_10(%arg0: i32) -> (i32, i32, i32) {
    %c0_i32 = arith.constant 0 : i32
    %c0_i32_0 = arith.constant 0 : i32
    %c0_i32_1 = arith.constant 0 : i32
    %c0_i32_2 = arith.constant 0 : i32
    return %c0_i32, %c0_i32_0, %c0_i32_1 : i32, i32, i32
  }
  func.func @transform_11(%arg0: i32) -> (i32, i32, i32) {
    %c0_i32 = arith.constant 0 : i32
    %c0_i32_0 = arith.constant 0 : i32
    %c0_i32_1 = arith.constant 0 : i32
    %c0_i32_2 = arith.constant 0 : i32
    return %c0_i32, %c0_i32_0, %c0_i32_1 : i32, i32, i32
  }
  func.func @transform_12(%arg0: i32) -> (i32, i32, i32) {
    %c0_i32 = arith.constant 0 : i32
    %c0_i32_0 = arith.constant 0 : i32
    %c0_i32_1 = arith.constant 0 : i32
    %c0_i32_2 = arith.constant 0 : i32
    return %c0_i32, %c0_i32_0, %c0_i32_1 : i32, i32, i32
  }
  func.func @transform_13(%arg0: i32) -> (i32, i32, i32) {
    %c0_i32 = arith.constant 0 : i32
    %c0_i32_0 = arith.constant 0 : i32
    %c0_i32_1 = arith.constant 0 : i32
    %c0_i32_2 = arith.constant 0 : i32
    return %c0_i32, %c0_i32_0, %c0_i32_1 : i32, i32, i32
  }
  func.func @transform_14(%arg0: i32) -> (i32, i32, i32) {
    %c0_i32 = arith.constant 0 : i32
    %c0_i32_0 = arith.constant 0 : i32
    %c0_i32_1 = arith.constant 0 : i32
    %c0_i32_2 = arith.constant 0 : i32
    return %c0_i32, %c0_i32_0, %c0_i32_1 : i32, i32, i32
  }
  func.func @transform_15(%arg0: i32) -> (i32, i32) {
    %c0_i32 = arith.constant 0 : i32
    %c0_i32_0 = arith.constant 0 : i32
    %c0_i32_1 = arith.constant 0 : i32
    return %c0_i32, %c0_i32_0 : i32, i32
  }
  func.func @transform_16(%arg0: i32) -> (i32, i32) {
    %c0_i32 = arith.constant 0 : i32
    %c0_i32_0 = arith.constant 0 : i32
    %c0_i32_1 = arith.constant 0 : i32
    return %c0_i32, %c0_i32_0 : i32, i32
  }
  func.func @transform_17(%arg0: i32) -> (i32, i32) {
    %c0_i32 = arith.constant 0 : i32
    %c0_i32_0 = arith.constant 0 : i32
    %c0_i32_1 = arith.constant 0 : i32
    return %c0_i32, %c0_i32_0 : i32, i32
  }
  func.func @transform_18(%arg0: i32) -> (i32, i32) {
    %c0_i32 = arith.constant 0 : i32
    %c0_i32_0 = arith.constant 0 : i32
    %c0_i32_1 = arith.constant 0 : i32
    return %c0_i32, %c0_i32_0 : i32, i32
  }
  func.func @transform_19(%arg0: i32) -> (i32, i32, i32) {
    %c0_i32 = arith.constant 0 : i32
    %c0_i32_0 = arith.constant 0 : i32
    %c0_i32_1 = arith.constant 0 : i32
    return %arg0, %c0_i32, %c0_i32_0 : i32, i32, i32
  }
}

</mosaic_0001>

<bundles_post_ra>
// kernel: vit_forward.1
= control target key start
LH: loop header
LB: loop body
LE: loop exit
PB: predicated region body
PF: predicated region fallthrough
CT: control target
= control target key end

     0   :  { %s6585_s0 = inlined_call_operand.vmem [shape: f32[2,24,64], index: 0, kind: input, shape index: {}]   ;;  %s6586_s1 = inlined_call_operand.vmem [shape: f32[24,32], index: 1, kind: input, shape index: {}]   ;;  %s6587_s2 = inlined_call_operand.vmem [shape: f32[64,32], index: 2, kind: input, shape index: {}]   ;;  %s6588_s3 = inlined_call_operand.vmem [shape: f32[2,1,32], index: 3, kind: input, shape index: {}]   ;;  %s6589_s4 = inlined_call_operand.vmem [shape: f32[2,1,32], index: 4, kind: input, shape index: {}]   ;;  %s6590_s5 = inlined_call_operand.vmem [shape: f32[2,32,96], index: 5, kind: input, shape index: {}]   ;;  %s6591_s6 = inlined_call_operand.vmem [shape: f32[2,1,96], index: 6, kind: input, shape index: {}]   ;;  %s6592_s7 = inlined_call_operand.vmem [shape: f32[2,32,32], index: 7, kind: input, shape index: {}]   ;;  %s6593_s8 = inlined_call_operand.vmem [shape: f32[2,1,32], index: 8, kind: input, shape index: {}]   ;;  %s6594_s9 = inlined_call_operand.vmem [shape: f32[2,1,32], index: 9, kind: input, shape index: {}]   ;;  %s6595_s10 = inlined_call_operand.vmem [shape: f32[2,1,32], index: 10, kind: input, shape index: {}]   ;;  %s6596_s11 = inlined_call_operand.vmem [shape: f32[2,32,128], index: 11, kind: input, shape index: {}]   ;;  %s6597_s12 = inlined_call_operand.vmem [shape: f32[2,1,128], index: 12, kind: input, shape index: {}]   ;;  %s6598_s13 = inlined_call_operand.vmem [shape: f32[2,128,32], index: 13, kind: input, shape index: {}]   ;;  %s6599_s14 = inlined_call_operand.vmem [shape: f32[2,1,32], index: 14, kind: input, shape index: {}]   ;;  %s6600_s15 = inlined_call_operand.vmem [shape: f32[1,32], index: 15, kind: input, shape index: {}]   ;;  %s6601_s16 = inlined_call_operand.vmem [shape: f32[1,32], index: 16, kind: input, shape index: {}]   ;;  %s6602_s17 = inlined_call_operand.vmem [shape: f32[32,128], index: 17, kind: input, shape index: {}]   ;;  %s6603_s18 = inlined_call_operand.vmem [shape: f32[1,128], index: 18, kind: input, shape index: {}]   ;;  %s6604_s19 = inlined_call_operand.hbm [shape: f32[2,1,128], index: 19, kind: output, shape index: {}]  }
   0x1   :  { %6644 = sst [smem:[#allocation10_spill]] %s6585_s0 }
   0x2   :  { %6645 = sst [smem:[#allocation11_spill]] %s6586_s1 }
   0x3   :  { %6646 = sst [smem:[#allocation12_spill]] %s6587_s2 }
   0x4   :  { %6647 = sst [smem:[#allocation13_spill]] %s6588_s3 }
   0x5   :  { %24 = vsyncpa [#allocation3], 0 }
   0x6   :  { %26 = vsyncpa [#allocation3 + $0x1], 0  ;;  %s5425_s0 = smov 0   ;;  %s5427_s30 = smov 0  }
   0x7   :  { %s5429_s20 = smov 0   ;;  %s5431_s21 = smov 0  }
   0x8 LB: > { %6648 = sst [smem:[#allocation5_spill]] %s5292_s0  ;;  %s5446_s1 = sadd.s32 4294967295, %s5304_s21   ;;  %s5304_s21 = sphi %s5431_s21, %s6678_s21   ;;  %s5300_s20 = sphi %s5429_s20, %s6683_s20   ;;  %s5296_s30 = sphi %s5427_s30, %s6682_s30   ;;  %s5292_s0 = sphi %s5425_s0, %s6681_s0  }
   0x9   : > { %6649 = sst [smem:[#allocation6_spill]] %s5300_s20  ;;  %s4004_s22 = sadd.s32 4294967294, %s5304_s21  }
   0xa   : > { %s5450_s2 = sadd.s32 1, %s5304_s21   ;;  %s443_s23 = sadd.s32 1, %s5300_s20 }
   0xb   : > { %6650 = sst [smem:[#allocation7_spill]] %s5450_s2  ;;  %s440_s24 = ssub.s32 %s5304_s21, %s5450_s2 }
   0xc   : > { %p453_p0 = scmp.ne.s32.totalorder %s5300_s20, %s5296_s30  ;;  %p441_p1 = scmp.eq.s32.totalorder %s440_s24, 0 }
   0xd   : > { %p454_p2 = scmp.eq.s32.totalorder %s5446_s1, 1  ;;  %p459_p3 = scmp.ne.s32.totalorder %s5296_s30, %s5292_s0 }
   0xe   : > { %p460_p4 = scmp.eq.s32.totalorder %s4004_s22, 1  ;;  %p4007_p7 = scmp.ge.s32.totalorder %s5304_s21, 1 }
   0xf   : > { %s5461_s25 = scalar_select %p441_p1, %s5300_s20, %s443_s23  }
  0x10   : > { %p5463_p5 = por %p454_p2, %p453_p0  ;;  %p5467_p6 = por %p460_p4, %p459_p3 }
  0x11   : > { %6651 = sst [smem:[#allocation8_spill]] %s5461_s25  ;;  %p540_p8 = scmp.lt.s32.totalorder %s5304_s21, 3 }
  0x12   : > { %s6653_s26 = scalar_select %p5467_p6, 1, 0 }
  0x13   : > { %p541_p9 = pnand %p4007_p7, %p540_p8 }
  0x14   : > { %6654 = sst [smem:[#allocation9_spill]] %s6653_s26  ;;  %s6655_s29 = sld [smem:[#allocation12_spill]] (!%p541_p9)  ;;  %v5306_v3 = vmov (!%p541_p9), 0.0|0.0   ;;  %vm5307_vm0 = vmmov (!%p541_p9), 0   ;;  %v5308_v6 = vmov (!%p541_p9), 0.0   ;;  %vm614_vm1 = vcmask (!%p541_p9), 523264  }
  0x15   : > { %544 = sbr.rel (%p541_p9) target bundleno = 5688 (0x1638), region = 96  ;;  %4812 = vmatprep.subr.bf16.mxu0 (!%p541_p9), %v5306_v3  ;;  %4368 = vmatprep.mubr.msk.f32.mxu0 (!%p541_p9), %vm5307_vm0, %v5308_v6  ;;  %p595_p10 = scmp.lt.s32.totalorder (!%p541_p9), %s5446_s1, 1  ;;  %vm710_vm2 = vcmask (!%p541_p9), 261120   ;;  %v769_v47 = vld [vmem:[%s6590_s5] sm:$0xff] (!%p541_p9)  ;;  %v770_v48 = vld [vmem:[%s6590_s5 + $0x8] sm:$0xff] (!%p541_p9)  ;;  %v771_v50 = vld [vmem:[%s6590_s5 + $0x10] sm:$0xff] (!%p541_p9) }
  0x16   : > { %4830 = vmatprep.subr.bf16.mxu1 (!%p541_p9), %v5306_v3  ;;  %4400 = vmatprep.mubr.msk.f32.mxu1 (!%p541_p9), %vm5307_vm0, %v5308_v6  ;;  %s6656_s20 = sld [smem:[#allocation10_spill]] (!%p541_p9)  ;;  %v4825_v49 = vpack.c.bf16 (!%p541_p9), %v770_v48, %v769_v47  ;;  %v772_v51 = vld [vmem:[%s6590_s5 + $0x18] sm:$0xff] (!%p541_p9)  ;;  %s6633_s24 = smov (!%p541_p9), 96   ;;  %vm878_vm3 = vcmask (!%p541_p9), 64512   ;;  %vm977_vm6 = vcmask (!%p541_p9), 195584   ;;  %vm1871_vm7 = vcmask (!%p541_p9), 130048  }
  0x17   : > { %v4828_v52 = vpack.c.bf16 (!%p541_p9), %v772_v51, %v771_v50  ;;  %s6631_s25 = smov (!%p541_p9), 80   ;;  %s6613_s27 = smov (!%p541_p9), 88   ;;  %vm5627_vm4 = vmpackc.low (!%p541_p9), %vm878_vm3, %vm878_vm3 }
  0x18   : > { %s6625_s26 = smov (!%p541_p9), 72   ;;  %s6627_s22 = smov (!%p541_p9), 104  }
  0x19   : > { %s6617_s23 = smov (!%p541_p9), 48  }
  0x1a   : > { %v603_v0 = vld [vmem:[%s6655_s29] sm:$0xff] (!%p541_p9)  ;;  %v604_v1 = vld [vmem:[%s6655_s29 + $0x8] sm:$0xff] (!%p541_p9)  ;;  %v605_v2 = vld [vmem:[%s6655_s29 + $0x10] sm:$0xff] (!%p541_p9) }
  0x1b   : > { %v4813_v4 = vpack.c.bf16 (!%p541_p9), %v604_v1, %v603_v0  ;;  %v606_v5 = vld [vmem:[%s6655_s29 + $0x18] sm:$0xff] (!%p541_p9)  ;;  %v607_v8 = vld [vmem:[%s6655_s29 + $0x20] sm:$0xff] (!%p541_p9)  ;;  %v608_v9 = vld [vmem:[%s6655_s29 + $0x28] sm:$0xff] (!%p541_p9) }
  0x1c   : > { %v4816_v7 = vpack.c.bf16 %v606_v5, %v605_v2  ;;  %s596_s28 = scalar_select %p595_p10, %s5446_s1, 1  ;;  %v4819_v10 = vpack.c.bf16 %v608_v9, %v607_v8  ;;  %v609_v11 = vld [vmem:[%s6655_s29 + $0x30] sm:$0xff]  ;;  %v610_v12 = vld [vmem:[%s6655_s29 + $0x38] sm:$0xff]  ;;  %v4013_v1 = vld [vmem:[%s6589_s4] ss:$0 sm:$0xff] }
  0x1d   : > { %4814 = vmatpush3.bf16.msra.mxu0 %v4813_v4  ;;  %v4822_v13 = vpack.c.bf16 %v610_v12, %v609_v11  ;;  %s6670_s29 = smov 56  }
  0x1e   : > { %4815 = vmatprep.subr.bf16.mxu0 %v5306_v3  ;;  %s4970_s0 = smul.u32 24, %s596_s28  ;;  %s6657_s28 = sld [smem:[#allocation11_spill]] }
  0x20   : > { %s599_s2 = scalar_lea.vmem %s6656_s20, %s4970_s0  ;;  %s6658_s20 = sld [smem:[#allocation13_spill]] }
  0x21   : > { %4817 = vmatpush3.bf16.msra.mxu0 %v4816_v7  ;;  %v600_v14 = vld [vmem:[%s599_s2] sm:$0xff]  ;;  %v601_v15 = vld [vmem:[%s599_s2 + $0x8] sm:$0xff]  ;;  %v602_v16 = vld [vmem:[%s599_s2 + $0x10] sm:$0xff]  ;;  %s6615_s0 = smov 112  }
  0x22   : > { %4818 = vmatprep.subr.bf16.mxu0 %v5306_v3 }
  0x24   : > { %v611_v17 = vld [vmem:[%s6657_s28] sm:$0xff]  ;;  %v612_v21 = vld [vmem:[%s6657_s28 + $0x8] sm:$0xff]  ;;  %v613_v26 = vld [vmem:[%s6657_s28 + $0x10] sm:$0xff]  ;;  %s6640_s28 = smov 8  }
  0x25   : > { %4820 = vmatpush3.bf16.msra.mxu0 %v4819_v10 }
  0x26   : > { %4821 = vmatprep.subr.bf16.mxu0 %v5306_v3  ;;  %s6659_s2 = smov %s6658_s20  ;;  %v4012_v63 = vld [vmem:[%s6658_s20] ss:$0 sm:$0xff]  ;;  %s6629_s20 = smov 120  }
  0x29   : > { %4823 = vmatpush3.bf16.msra.mxu0 %v4822_v13 }
  0x2a   : > { %4824 = vmatprep.subr.bf16.mxu0 %v5306_v3 }
  0x2c   : > { %4369 = vmatmul.mubr.msk.f32.vlgmr.msra.gmra.mrb[0].mxu0 %vm614_vm1, %v600_v14 }
  0x2d   : > { %4371 = vmatprep.mubr.msk.f32.mxu0 %vm5307_vm0, %v5308_v6  ;;  %4826 = vmatpush3.bf16.msra.mxu0 %v4825_v49 }
  0x2e   : > { %4827 = vmatprep.subr.bf16.mxu0 %v5306_v3 }
  0x30   : > { %4372 = vmatmul.mubr.msk.f32.gmra.mrb[2].mxu0 %vm614_vm1, %v601_v15 }
  0x31   : > { %4374 = vmatprep.mubr.msk.f32.mxu0 %vm5307_vm0, %v5308_v6  ;;  %4829 = vmatpush3.bf16.msra.mxu0 %v4828_v52 }
  0x32   : > { %4834 = vmatprep.subr.bf16.mxu0 %v5306_v3 }
  0x34   : > { %4375 = vmatmul.mubr.msk.f32.gmra.mrb[4].mxu0 %vm614_vm1, %v602_v16  ;;  %v4014_v16 = vld [vmem:[%s6591_s6] ss:$0 sm:$0xff] }
  0x35   : > { %4385 = vmatprep.mubr.msk.f32.mxu0 %vm5307_vm0, %v5308_v6 }
  0xff   : > { %v690_v18 = vpop.f32.mrb[0].mxu0 }
 0x100   : > { %v5521_v19 = vadd.f32 %v690_v18, %v611_v17  ;;  %v4370_v20 = vpop.f32.mrb[1].mxu0 }
 0x102   : > { %v711_v22 = vsel %vm710_vm2, %v5521_v19, 0.0 }
 0x103   : > { %712 = vadd.xlane.f32.xlu0 %v711_v22  ;;  %v695_v23 = vpop.f32.mrb[2].mxu0 }
 0x104   : > { %v5528_v24 = vadd.f32 %v695_v23, %v612_v21  ;;  %v4373_v25 = vpop.f32.mrb[3].mxu0 }
 0x106   : > { %v714_v27 = vsel %vm710_vm2, %v5528_v24, 0.0 }
 0x107   : > { %715 = vadd.xlane.f32.xlu0 %v714_v27  ;;  %v700_v28 = vpop.f32.mrb[4].mxu0 }
 0x108   : > { %v5535_v29 = vadd.f32 %v700_v28, %v613_v26  ;;  %v4376_v30 = vpop.f32.mrb[5].mxu0 }
 0x10a   : > { %v717_v31 = vsel %vm710_vm2, %v5535_v29, 0.0 }
 0x10b   : > { %718 = vadd.xlane.f32.xlu1 %v717_v31 }
 0x190   : > { %v713_v32 = vpop.xlane.xlu0 %712 }
 0x191   : > { %v721_v33 = vmul.f32 0.03125, %v713_v32 }
 0x193   : > { %v724_v34 = vsub.f32 %v5521_v19, %v721_v33 }
 0x194   : > { %v716_v35 = vpop.xlane.xlu0 %715 }
 0x195   : > { %v722_v36 = vmul.f32 0.03125, %v716_v35  ;;  %v727_v37 = vmul.f32 %v724_v34, %v724_v34 }
 0x197   : > { %v725_v38 = vsub.f32 %v5528_v24, %v722_v36  ;;  %v730_v39 = vsel %vm710_vm2, %v727_v37, 0.0 }
 0x198   : > { %731 = vadd.xlane.f32.xlu1 %v730_v39  ;;  %v719_v40 = vpop.xlane.xlu1 %718 }
 0x199   : > { %v723_v41 = vmul.f32 0.03125, %v719_v40  ;;  %v728_v42 = vmul.f32 %v725_v38, %v725_v38 }
 0x19b   : > { %v726_v43 = vsub.f32 %v5535_v29, %v723_v41  ;;  %v733_v44 = vsel %vm710_vm2, %v728_v42, 0.0 }
 0x19c   : > { %734 = vadd.xlane.f32.xlu0 %v733_v44 }
 0x19d   : > { %v729_v45 = vmul.f32 %v726_v43, %v726_v43 }
 0x19f   : > { %v736_v46 = vsel %vm710_vm2, %v729_v45, 0.0 }
 0x1a0   : > { %737 = vadd.xlane.f32.xlu1 %v736_v46 }
 0x225   : > { %v732_v53 = vpop.xlane.xlu1 %731 }
 0x226   : > { %v739_v54 = vmul.f32 0.03125, %v732_v53 }
 0x228   : > { %v742_v55 = vadd.f32 1e-06, %v739_v54 }
 0x229   : > { %v735_v56 = vpop.xlane.xlu0 %734 }
 0x22a   : > { %5108 = vrsqrt.f32 %v742_v55  ;;  %v740_v57 = vmul.f32 0.03125, %v735_v56 }
 0x22c   : > { %v743_v58 = vadd.f32 1e-06, %v740_v57 }
 0x22d   : > { %v738_v59 = vpop.xlane.xlu1 %737 }
 0x22e   : > { %5110 = vrsqrt.f32 %v743_v58  ;;  %v741_v60 = vmul.f32 0.03125, %v738_v59 }
 0x230   : > { %v744_v61 = vadd.f32 1e-06, %v741_v60 }
 0x232   : > { %5112 = vrsqrt.f32 %v744_v61 }
 0x234   : > { %v5109_v62 = vpop.eup %5108 }
 0x235   : > { %v748_v0 = vmul.f32 %v5109_v62, %v724_v34 }
 0x237   : > { %v757_v2 = vmul.f32 %v4012_v63, %v748_v0  ;;  %v704_v0 = vlaneseq }
 0x238   : > { %v5111_v4 = vpop.eup %5110 }
 0x239   : > { %v766_v5 = vadd.f32 %v4013_v1, %v757_v2  ;;  %v749_v7 = vmul.f32 %v5111_v4, %v725_v38  ;;  %v5319_v4 = vmov -1e+30  }
 0x23b   : > { %4386 = vmatmul.mubr.msk.f32.vlgmr.msra.gmra.mrb[6].mxu0 %vm710_vm2, %v766_v5  ;;  %v758_v8 = vmul.f32 %v4012_v63, %v749_v7 }
 0x23c   : > { %v5113_v9 = vpop.eup %5112  ;;  %4388 = vmatprep.mubr.msk.f32.mxu0 %vm5307_vm0, %v5308_v6 }
 0x23d   : > { %v767_v10 = vadd.f32 %v4013_v1, %v758_v8  ;;  %v750_v11 = vmul.f32 %v5113_v9, %v726_v43 }
 0x23f   : > { %4389 = vmatmul.mubr.msk.f32.gmra.mrb[8].mxu0 %vm710_vm2, %v767_v10  ;;  %v759_v12 = vmul.f32 %v4012_v63, %v750_v11 }
 0x240   : > { %4391 = vmatprep.mubr.msk.f32.mxu0 %vm5307_vm0, %v5308_v6 }
 0x241   : > { %v768_v13 = vadd.f32 %v4013_v1, %v759_v12  ;;  %v705_v1 = vand.u32 127, %v704_v0 }
 0x243   : > { %4392 = vmatmul.mubr.msk.f32.gmra.mrb[10].mxu0 %vm710_vm2, %v768_v13  ;;  %vm706_vm5 = vcmp.lt.s32.totalorder %v705_v1, 23 }
 0x244   : > { %4415 = vmatprep.mubr.msk.f32.mxu0 %vm5307_vm0, %v5308_v6  ;;  %v5693_v5 = vsel %vm706_vm5, 0.0, %v5319_v4 }
 0x30e   : > { %v855_v14 = vpop.f32.mrb[6].mxu0 }
 0x30f   : > { %v4387_v15 = vpop.f32.mrb[7].mxu0  ;;  %v856_v18 = vadd.f32 %v4014_v16, %v855_v14 }
 0x312   : > { %v860_v17 = vpop.f32.mrb[8].mxu0 }
 0x313   : > { %v5577_v20 = vadd.f32 %v4014_v16, %v860_v17  ;;  %v4390_v21 = vpop.f32.mrb[9].mxu0 }
 0x315   : > { %v5580_v22 = vpack.i.bf16 %v5577_v20, %v856_v18 }
 0x316   : > { %v865_v23 = vpop.f32.mrb[10].mxu0 }
 0x317   : > { %v5582_v25 = vadd.f32 %v4014_v16, %v865_v23  ;;  %5029 = vrot.lane.b32.xlu0 %v5580_v22, %s6633_s24  ;;  %v4393_v26 = vpop.f32.mrb[11].mxu0 }
 0x319   : > { %876 = vrot.lane.b32.xlu1 %v5582_v25, %s6633_s24  ;;  %s6638_s24 = smov 16  }
 0x31b   : > { %5039 = vrot.lane.b32.xlu0 %v5580_v22, %s6631_s25 }
 0x31d   : > { %5034 = vrot.lane.b32.xlu1 %v5580_v22, %s6613_s27 }
 0x31f   : > { %1111 = vrot.lane.b32.xlu0 %v5577_v20, %s6629_s20 }
 0x321   : > { %1119 = vrot.lane.b32.xlu1 %v5582_v25, %s6613_s27  ;;  %s6623_s27 = smov 64  }
 0x323   : > { %1360 = vrot.lane.b32.xlu0 %v5582_v25, %s6631_s25  ;;  %s6636_s25 = smov 24  }
 0x325   : > { %1109 = vrot.lane.b32.xlu1 %v856_v18, %s6629_s20 }
 0x327   : > { %1350 = vrot.lane.b32.xlu0 %v856_v18, %s6615_s0 }
 0x329   : > { %1113 = vrot.lane.b32.xlu1 %v5582_v25, %s6629_s20  ;;  %s6667_s20 = smov 104  }
 0x32b   : > { %1354 = vrot.lane.b32.xlu0 %v5582_v25, %s6615_s0 }
 0x32d   : > { %5044 = vrot.lane.b32.xlu1 %v5580_v22, %s6625_s26 }
 0x32f   : > { %1591 = vrot.lane.b32.xlu0 %v856_v18, %s6627_s22 }
 0x331   : > { %1352 = vrot.lane.b32.xlu1 %v5577_v20, %s6615_s0  ;;  %s6621_s0 = smov 56  }
 0x333   : > { %1595 = vrot.lane.b32.xlu0 %v5582_v25, %s6627_s22 }
 0x335   : > { %1601 = vrot.lane.b32.xlu1 %v5582_v25, %s6625_s26  ;;  %s6669_s26 = smov 64  }
 0x337   : > { %5059 = vrot.lane.b32.xlu0 %v5580_v22, %s6617_s23 }
 0x339   : > { %1593 = vrot.lane.b32.xlu1 %v5577_v20, %s6627_s22  ;;  %s6662_s22 = smov 96  }
 0x33b   : > { %1009 = vrot.lane.b32.xlu0 %v5582_v25, %s6623_s27 }
 0x33d   : > { %5049 = vrot.lane.b32.xlu1 %v5580_v22, %s6623_s27  ;;  %s6664_s27 = smov 120  }
 0x33f   : > { %1250 = vrot.lane.b32.xlu0 %v5582_v25, %s6621_s0 }
 0x341   : > { %5054 = vrot.lane.b32.xlu1 %v5580_v22, %s6621_s0  ;;  %s6668_s0 = smov 72  }
 0x389   : > { %v5030_v27 = vpop.permute.xlu0 %5029 }
 0x38a   : > { %v5032_v28 = vunpack.i.h.bf16 %v5030_v27  ;;  %v5031_v30 = vunpack.i.l.bf16 %v5030_v27 }
 0x38b   : > { %v877_v31 = vpop.permute.xlu1 %876 }
 0x38c   : > { %v4831_v33 = vpack.c.bf16 %v5032_v28, %v5031_v30 }
 0x38d   : > { %v5040_v34 = vpop.permute.xlu0 %5039 }
 0x38e   : > { %4833 = vmatpush3.bf16.xpose.msk.msra.mxu1 %vm5627_vm4, %v4831_v33  ;;  %v5042_v47 = vunpack.i.h.bf16 %v5040_v34  ;;  %v5041_v48 = vunpack.i.l.bf16 %v5040_v34 }
 0x38f   : > { %v5035_v35 = vpop.permute.xlu1 %5034  ;;  %4398 = vmatprep.subr.mxu1 %v5308_v6 }
 0x390   : > { %v5037_v38 = vunpack.i.h.bf16 %v5035_v35  ;;  %v5036_v39 = vunpack.i.l.bf16 %v5035_v35  ;;  %v4845_v50 = vpack.c.bf16 %v5042_v47, %v5041_v48 }
 0x391   : > { %v1112_v36 = vpop.permute.xlu0 %1111 }
 0x392   : > { %v4838_v42 = vpack.c.bf16 %v5037_v38, %v5036_v39 }
 0x393   : > { %v1120_v37 = vpop.permute.xlu1 %1119 }
 0x395   : > { %v1361_v40 = vpop.permute.xlu0 %1360 }
 0x396   : > { %4399 = vmatpush3.xpose.msk.msra.mxu1 %vm878_vm3, %v877_v31 }
 0x397   : > { %v1110_v41 = vpop.permute.xlu1 %1109  ;;  %4837 = vmatprep.subr.bf16.mxu1 %v5306_v3 }
 0x399   : > { %v1351_v43 = vpop.permute.xlu0 %1350  ;;  %4401 = vmatmul.mubr.msk.f32.vlgmr.msra.gmra.mrb[0].mxu1 %vm878_vm3, %v856_v18 }
 0x39a   : > { %4840 = vmatpush3.bf16.xpose.msk.msra.mxu1 %vm5627_vm4, %v4838_v42  ;;  %4403 = vmatprep.mubr.msk.f32.mxu1 %vm5307_vm0, %v5308_v6 }
 0x39b   : > { %v1114_v44 = vpop.permute.xlu1 %1113  ;;  %4428 = vmatprep.subr.mxu1 %v5308_v6 }
 0x39d   : > { %4404 = vmatmul.mubr.msk.f32.gmra.mrb[2].mxu1 %vm878_vm3, %v5577_v20  ;;  %v1355_v45 = vpop.permute.xlu0 %1354 }
 0x39e   : > { %4406 = vmatprep.mubr.msk.f32.mxu1 %vm5307_vm0, %v5308_v6 }
 0x39f   : > { %v5045_v46 = vpop.permute.xlu1 %5044 }
 0x3a0   : > { %v5047_v55 = vunpack.i.h.bf16 %v5045_v46  ;;  %v5046_v56 = vunpack.i.l.bf16 %v5045_v46 }
 0x3a1   : > { %4407 = vmatmul.mubr.msk.f32.gmra.mrb[4].mxu1 %vm878_vm3, %v5582_v25  ;;  %v1592_v51 = vpop.permute.xlu0 %1591 }
 0x3a2   : > { %4429 = vmatpush3.xpose.msk.msra.mxu1 %vm878_vm3, %v1120_v37  ;;  %4430 = vmatprep.mubr.msk.f32.mxu1 %vm5307_vm0, %v5308_v6  ;;  %v4852_v58 = vpack.c.bf16 %v5047_v55, %v5046_v56 }
 0x3a3   : > { %v1353_v49 = vpop.permute.xlu1 %1352  ;;  %4844 = vmatprep.subr.bf16.mxu1 %v5306_v3 }
 0x3a5   : > { %4431 = vmatmul.mubr.msk.f32.vlgmr.msra.gmra.mrb[6].mxu1 %vm878_vm3, %v1110_v41  ;;  %v1596_v53 = vpop.permute.xlu0 %1595 }
 0x3a6   : > { %4847 = vmatpush3.bf16.xpose.msk.msra.mxu1 %vm5627_vm4, %v4845_v50  ;;  %4433 = vmatprep.mubr.msk.f32.mxu1 %vm5307_vm0, %v5308_v6 }
 0x3a7   : > { %v1602_v52 = vpop.permute.xlu1 %1601  ;;  %4458 = vmatprep.subr.mxu1 %v5308_v6 }
 0x3a9   : > { %4434 = vmatmul.mubr.msk.f32.gmra.mrb[8].mxu1 %vm878_vm3, %v1112_v36  ;;  %v5666_v61 = vpop.permute.xlu0 %5059 }
 0x3aa   : > { %4436 = vmatprep.mubr.msk.f32.mxu1 %vm5307_vm0, %v5308_v6 }
 0x3ab   : > { %v1594_v54 = vpop.permute.xlu1 %1593 }
 0x3ad   : > { %4437 = vmatmul.mubr.msk.f32.gmra.mrb[10].mxu1 %vm878_vm3, %v1114_v44  ;;  %v1010_v63 = vpop.permute.xlu0 %1009 }
 0x3ae   : > { %4459 = vmatpush3.xpose.msk.msra.mxu1 %vm878_vm3, %v1361_v40  ;;  %4460 = vmatprep.mubr.msk.f32.mxu1 %vm5307_vm0, %v5308_v6 }
 0x3af   : > { %v5050_v57 = vpop.permute.xlu1 %5049  ;;  %4851 = vmatprep.subr.bf16.mxu1 %v5306_v3 }
 0x3b0   : > { %v5052_v59 = vunpack.i.h.bf16 %v5050_v57  ;;  %v5051_v60 = vunpack.i.l.bf16 %v5050_v57 }
 0x3b1   : > { %4461 = vmatmul.mubr.msk.f32.vlgmr.msra.gmra.mrb[12].mxu1 %vm878_vm3, %v1351_v43 }
 0x3b2   : > { %v4835_v62 = vpack.c.bf16 %v5052_v59, %v5051_v60  ;;  %4854 = vmatpush3.bf16.xpose.msk.msra.mxu1 %vm5627_vm4, %v4852_v58  ;;  %4463 = vmatprep.mubr.msk.f32.mxu1 %vm5307_vm0, %v5308_v6 }
 0x3b3   : > { %4488 = vmatprep.subr.mxu1 %v5308_v6 }
 0x3b4   : > { %4836 = vmatpush3.bf16.msra.mxu0 %v4835_v62 }
 0x3b5   : > { %4464 = vmatmul.mubr.msk.f32.gmra.mrb[14].mxu1 %vm878_vm3, %v1353_v49  ;;  %4413 = vmatprep.subr.mxu0 %v5308_v6 }
 0x3b6   : > { %4466 = vmatprep.mubr.msk.f32.mxu1 %vm5307_vm0, %v5308_v6 }
 0x3b8   : > { %4414 = vmatpush3.msra.mxu0 %v1010_v63 }
 0x3b9   : > { %4467 = vmatmul.mubr.msk.f32.gmra.mrb[16].mxu1 %vm878_vm3, %v1355_v45  ;;  %4841 = vmatprep.subr.bf16.mxu0 %v5306_v3 }
 0x3ba   : > { %4489 = vmatpush3.xpose.msk.msra.mxu1 %vm878_vm3, %v1602_v52  ;;  %4490 = vmatprep.mubr.msk.f32.mxu1 %vm5307_vm0, %v5308_v6 }
 0x3bb   : > { %4858 = vmatprep.subr.bf16.mxu1 %v5306_v3 }
 0x3bd   : > { %4491 = vmatmul.mubr.msk.f32.vlgmr.msra.gmra.mrb[18].mxu1 %vm878_vm3, %v1592_v51 }
 0x3be   : > { %4493 = vmatprep.mubr.msk.f32.mxu1 %vm5307_vm0, %v5308_v6 }
 0x3c1   : > { %4494 = vmatmul.mubr.msk.f32.gmra.mrb[20].mxu1 %vm878_vm3, %v1594_v54 }
 0x3c2   : > { %4496 = vmatprep.mubr.msk.f32.mxu1 %vm5307_vm0, %v5308_v6 }
 0x3c5   : > { %4497 = vmatmul.mubr.msk.f32.gmra.mrb[22].mxu1 %vm878_vm3, %v1596_v53 }
 0x3c6   : > { %4522 = vmatprep.mubr.msk.f32.mxu1 %vm5307_vm0, %v5308_v6 }
 0x46c   : > { %v957_v2 = vpop.f32.mrb[0].mxu1 }
 0x46d   : > { %v971_v7 = vmul.f32 0.35355338, %v957_v2  ;;  %v4402_v8 = vpop.f32.mrb[1].mxu1 }
 0x46f   : > { %v5696_v9 = vadd.f32 %v971_v7, %v5693_v5 }
 0x470   : > { %v962_v10 = vpop.f32.mrb[2].mxu1 }
 0x471   : > { %v972_v11 = vmul.f32 0.35355338, %v962_v10  ;;  %v4405_v12 = vpop.f32.mrb[3].mxu1  ;;  %v978_v13 = vsel %vm977_vm6, %v5696_v9, -inf }
 0x472   : > { %979 = vmax.xlane.f32.xlu1 %v978_v13  ;;  %v5055_v13 = vpop.permute.xlu1 %5054 }
 0x473   : > { %v5701_v14 = vadd.f32 %v972_v11, %v5693_v5 }
 0x474   : > { %v967_v15 = vpop.f32.mrb[4].mxu1 }
 0x475   : > { %v973_v16 = vmul.f32 0.35355338, %v967_v15  ;;  %v4408_v17 = vpop.f32.mrb[5].mxu1  ;;  %v981_v18 = vsel %vm977_vm6, %v5701_v14, -inf  ;;  %v1251_v15 = vpop.permute.xlu0 %1250 }
 0x476   : > { %982 = vmax.xlane.f32.xlu0 %v981_v18 }
 0x477   : > { %v5706_v20 = vadd.f32 %v973_v16, %v5693_v5 }
 0x478   : > { %v1199_v21 = vpop.f32.mrb[6].mxu1 }
 0x479   : > { %v1213_v23 = vmul.f32 0.35355338, %v1199_v21  ;;  %v4432_v26 = vpop.f32.mrb[7].mxu1  ;;  %v984_v27 = vsel %vm977_vm6, %v5706_v20, -inf }
 0x47a   : > { %985 = vmax.xlane.f32.xlu0 %v984_v27 }
 0x47b   : > { %v5711_v28 = vadd.f32 %v1213_v23, %v5693_v5 }
 0x47c   : > { %v1204_v30 = vpop.f32.mrb[8].mxu1 }
 0x47d   : > { %v1214_v31 = vmul.f32 0.35355338, %v1204_v30  ;;  %v4435_v33 = vpop.f32.mrb[9].mxu1  ;;  %v1219_v34 = vsel %vm977_vm6, %v5711_v28, -inf  ;;  %v5057_v30 = vunpack.i.h.bf16 %v5055_v13 }
 0x47e   : > { %1220 = vmax.xlane.f32.xlu0 %v1219_v34 }
 0x47f   : > { %v5716_v35 = vadd.f32 %v1214_v31, %v5693_v5  ;;  %v5056_v31 = vunpack.i.l.bf16 %v5055_v13 }
 0x480   : > { %v1209_v36 = vpop.f32.mrb[10].mxu1 }
 0x481   : > { %v1215_v37 = vmul.f32 0.35355338, %v1209_v36  ;;  %v4438_v38 = vpop.f32.mrb[11].mxu1  ;;  %v1222_v39 = vsel %vm977_vm6, %v5716_v35, -inf }
 0x482   : > { %1223 = vmax.xlane.f32.xlu1 %v1222_v39 }
 0x483   : > { %v5721_v40 = vadd.f32 %v1215_v37, %v5693_v5 }
 0x484   : > { %v1440_v41 = vpop.f32.mrb[12].mxu1 }
 0x485   : > { %v1454_v42 = vmul.f32 0.35355338, %v1440_v41  ;;  %v4462_v43 = vpop.f32.mrb[13].mxu1  ;;  %v1225_v44 = vsel %vm977_vm6, %v5721_v40, -inf }
 0x486   : > { %1226 = vmax.xlane.f32.xlu0 %v1225_v44  ;;  %v5061_v43 = vunpack.i.l.bf16 %v5666_v61 }
 0x487   : > { %v5726_v45 = vadd.f32 %v1454_v42, %v5693_v5  ;;  %v5062_v42 = vunpack.i.h.bf16 %v5666_v61 }
 0x488   : > { %v1445_v46 = vpop.f32.mrb[14].mxu1 }
 0x489   : > { %v4465_v47 = vpop.f32.mrb[15].mxu1  ;;  %v1460_v48 = vsel %vm977_vm6, %v5726_v45, -inf  ;;  %v1455_v4 = vmul.f32 0.35355338, %v1445_v46 }
 0x48a   : > { %1461 = vmax.xlane.f32.xlu0 %v1460_v48  ;;  %v4849_v48 = vpack.c.bf16 %v5062_v42, %v5061_v43 }
 0x48b   : > { %v5748_v8 = vadd.f32 %v1455_v4, %v5693_v5 }
 0x48c   : > { %v1450_v49 = vpop.f32.mrb[16].mxu1 }
 0x48d   : > { %v1456_v50 = vmul.f32 0.35355338, %v1450_v49  ;;  %v4468_v51 = vpop.f32.mrb[17].mxu1  ;;  %v1463_v10 = vsel %vm977_vm6, %v5748_v8, -inf }
 0x48f   : > { %v5731_v52 = vadd.f32 %v1456_v50, %v5693_v5 }
 0x490   : > { %v1681_v53 = vpop.f32.mrb[18].mxu1 }
 0x491   : > { %v1695_v54 = vmul.f32 0.35355338, %v1681_v53  ;;  %v4492_v55 = vpop.f32.mrb[19].mxu1  ;;  %v1466_v56 = vsel %vm977_vm6, %v5731_v52, -inf }
 0x492   : > { %1467 = vmax.xlane.f32.xlu0 %v1466_v56 }
 0x493   : > { %1491 = vrot.lane.b32.xlu1 %v5582_v25, %s6617_s23  ;;  %v5738_v57 = vadd.f32 %v1695_v54, %v5693_v5  ;;  %s6619_s23 = smov 40  }
 0x494   : > { %v1686_v58 = vpop.f32.mrb[20].mxu1 }
 0x495   : > { %v4495_v59 = vpop.f32.mrb[21].mxu1  ;;  %v1701_v60 = vsel %vm977_vm6, %v5738_v57, -inf  ;;  %v1696_v7 = vmul.f32 0.35355338, %v1686_v58 }
 0x496   : > { %1702 = vmax.xlane.f32.xlu0 %v1701_v60 }
 0x497   : > { %v5755_v11 = vadd.f32 %v1696_v7, %v5693_v5 }
 0x498   : > { %v1691_v62 = vpop.f32.mrb[22].mxu1 }
 0x499   : > { %v1697_v63 = vmul.f32 0.35355338, %v1691_v62  ;;  %v4498_v0 = vpop.f32.mrb[23].mxu1  ;;  %v1704_v12 = vsel %vm977_vm6, %v5755_v11, -inf }
 0x49b   : > { %v5743_v1 = vadd.f32 %v1697_v63, %v5693_v5 }
 0x49d   : > { %v1707_v2 = vsel %vm977_vm6, %v5743_v1, -inf }
 0x49e   : > { %1708 = vmax.xlane.f32.xlu0 %v1707_v2 }
 0x4b4   : > { %5064 = vrot.lane.b32.xlu0 %v5580_v22, %s6619_s23 }
 0x4b7   : > { %1464 = vmax.xlane.f32.xlu1 %v1463_v10 }
 0x4bb   : > { %1705 = vmax.xlane.f32.xlu1 %v1704_v12 }
 0x4cc   : > { %1732 = vrot.lane.b32.xlu1 %v5582_v25, %s6619_s23  ;;  %s6663_s23 = smov 80  }
 0x4ff   : > { %v980_v16 = vpop.xlane.xlu1 %979 }
 0x500   : > { %v987_v17 = vsub.f32 %v5696_v9, %v980_v16  ;;  %v4842_v9 = vpack.c.bf16 %v5057_v30, %v5056_v31 }
 0x502   : > { %v990_v22 = vmul.f32 1.442695, %v987_v17 }
 0x503   : > { %v983_v18 = vpop.xlane.xlu0 %982 }
 0x504   : > { %5114 = vpow2.f32 %v990_v22  ;;  %v988_v21 = vsub.f32 %v5701_v14, %v983_v18 }
 0x506   : > { %v992_v23 = vmul.f32 1.442695, %v988_v21 }
 0x507   : > { %v986_v26 = vpop.xlane.xlu0 %985 }
 0x508   : > { %5116 = vpow2.f32 %v992_v23  ;;  %v989_v27 = vsub.f32 %v5706_v20, %v986_v26 }
 0x50a   : > { %v994_v33 = vmul.f32 1.442695, %v989_v27 }
 0x50b   : > { %v1221_v34 = vpop.xlane.xlu0 %1220 }
 0x50c   : > { %5118 = vpow2.f32 %v994_v33  ;;  %v1228_v25 = vsub.f32 %v5711_v28, %v1221_v34 }
 0x50e   : > { %v5765_v36 = vpop.eup %5114  ;;  %v1231_v37 = vmul.f32 1.442695, %v1228_v25 }
 0x50f   : > { %4416 = vmatmul.mubr.msk.f32.vlgmr.msra.gmra.mrb[12].mxu0 %vm977_vm6, %v5765_v36  ;;  %v1224_v14 = vpop.xlane.xlu1 %1223  ;;  %v996_v25 = vsel %vm977_vm6, %v5765_v36, 0.0 }
 0x510   : > { %5120 = vpow2.f32 %v1231_v37  ;;  %4843 = vmatpush3.bf16.msra.mxu0 %v4842_v9  ;;  %v1229_v38 = vsub.f32 %v5716_v35, %v1224_v14  ;;  %4418 = vmatprep.mubr.msk.f32.mxu0 %vm5307_vm0, %v5308_v6 }
 0x511   : > { %4443 = vmatprep.subr.mxu0 %v5308_v6 }
 0x512   : > { %v5773_v20 = vpop.eup %5116  ;;  %v1233_v28 = vmul.f32 1.442695, %v1229_v38 }
 0x513   : > { %4419 = vmatmul.mubr.msk.f32.gmra.mrb[14].mxu0 %vm977_vm6, %v5773_v20  ;;  %v1227_v39 = vpop.xlane.xlu0 %1226  ;;  %v999_v9 = vsel %vm977_vm6, %v5773_v20, 0.0 }
 0x514   : > { %5122 = vpow2.f32 %v1233_v28  ;;  %4444 = vmatpush3.msra.mxu0 %v1251_v15  ;;  %v1230_v41 = vsub.f32 %v5721_v40, %v1227_v39  ;;  %4421 = vmatprep.mubr.msk.f32.mxu0 %vm5307_vm0, %v5308_v6 }
 0x515   : > { %4848 = vmatprep.subr.bf16.mxu0 %v5306_v3 }
 0x516   : > { %v5781_v35 = vpop.eup %5118  ;;  %v1235_v44 = vmul.f32 1.442695, %v1230_v41 }
 0x517   : > { %4422 = vmatmul.mubr.msk.f32.gmra.mrb[16].mxu0 %vm977_vm6, %v5781_v35  ;;  %v1462_v46 = vpop.xlane.xlu0 %1461  ;;  %v1002_v37 = vsel %vm977_vm6, %v5781_v35, 0.0 }
 0x518   : > { %5124 = vpow2.f32 %v1235_v44  ;;  %v1469_v47 = vsub.f32 %v5726_v45, %v1462_v46  ;;  %4445 = vmatprep.mubr.msk.f32.mxu0 %vm5307_vm0, %v5308_v6  ;;  %v1492_v45 = vpop.permute.xlu1 %1491 }
 0x51a   : > { %v5121_v40 = vpop.eup %5120  ;;  %v1472_v49 = vmul.f32 1.442695, %v1469_v47 }
 0x51b   : > { %4446 = vmatmul.mubr.msk.f32.vlgmr.msra.gmra.mrb[18].mxu0 %vm977_vm6, %v5121_v40  ;;  %v1237_v50 = vsel %vm977_vm6, %v5121_v40, 0.0  ;;  %v1878_v40 = vld [vmem:[%s6592_s7] sm:$0xff] }
 0x51c   : > { %5126 = vpow2.f32 %v1472_v49  ;;  %4850 = vmatpush3.bf16.msra.mxu0 %v4849_v48  ;;  %1238 = vadd.xlane.f32.xlu1 %v1237_v50  ;;  %v1879_v48 = vld [vmem:[%s6592_s7 + $0x8] sm:$0xff]  ;;  %v1880_v49 = vld [vmem:[%s6592_s7 + $0x10] sm:$0xff] }
 0x51d   : > { %4448 = vmatprep.mubr.msk.f32.mxu0 %vm5307_vm0, %v5308_v6  ;;  %4473 = vmatprep.subr.mxu0 %v5308_v6  ;;  %v4859_v50 = vpack.c.bf16 %v1879_v48, %v1878_v40 }
 0x51e   : > { %v5123_v61 = vpop.eup %5122 }
 0x51f   : > { %4449 = vmatmul.mubr.msk.f32.gmra.mrb[20].mxu0 %vm977_vm6, %v5123_v61  ;;  %v1468_v51 = vpop.xlane.xlu0 %1467  ;;  %v1240_v53 = vsel %vm977_vm6, %v5123_v61, 0.0  ;;  %v1881_v61 = vld [vmem:[%s6592_s7 + $0x18] sm:$0xff]  ;;  %4860 = vmatpush3.bf16.msra.mxu1 %v4859_v50 }
 0x520   : > { %4474 = vmatpush3.msra.mxu0 %v1492_v45  ;;  %1241 = vadd.xlane.f32.xlu1 %v1240_v53  ;;  %v1471_v10 = vsub.f32 %v5731_v52, %v1468_v51 }
 0x521   : > { %4451 = vmatprep.mubr.msk.f32.mxu0 %vm5307_vm0, %v5308_v6  ;;  %4855 = vmatprep.subr.bf16.mxu0 %v5306_v3 }
 0x522   : > { %v5125_v54 = vpop.eup %5124  ;;  %v1476_v17 = vmul.f32 1.442695, %v1471_v10  ;;  %4861 = vmatprep.subr.bf16.mxu1 %v5306_v3 }
 0x523   : > { %4452 = vmatmul.mubr.msk.f32.gmra.mrb[22].mxu0 %vm977_vm6, %v5125_v54  ;;  %v1703_v55 = vpop.xlane.xlu0 %1702  ;;  %v1243_v27 = vsel %vm977_vm6, %v5125_v54, 0.0 }
 0x524   : > { %v1710_v56 = vsub.f32 %v5738_v57, %v1703_v55  ;;  %4475 = vmatprep.mubr.msk.f32.mxu0 %vm5307_vm0, %v5308_v6  ;;  %v4862_v55 = vpack.c.bf16 %v1881_v61, %v1880_v49 }
 0x526   : > { %v5127_v58 = vpop.eup %5126  ;;  %v1713_v59 = vmul.f32 1.442695, %v1710_v56  ;;  %4863 = vmatpush3.bf16.msra.mxu1 %v4862_v55 }
 0x527   : > { %4476 = vmatmul.mubr.msk.f32.vlgmr.msra.gmra.mrb[24].mxu0 %vm977_vm6, %v5127_v58  ;;  %v1478_v60 = vsel %vm977_vm6, %v5127_v58, 0.0  ;;  %4870 = vmatprep.subr.bf16.mxu1 %v5306_v3 }
 0x528   : > { %5128 = vpow2.f32 %v1713_v59  ;;  %1479 = vadd.xlane.f32.xlu0 %v1478_v60  ;;  %4478 = vmatprep.mubr.msk.f32.mxu0 %vm5307_vm0, %v5308_v6 }
 0x52b   : > { %v1709_v62 = vpop.xlane.xlu0 %1708 }
 0x52c   : > { %v1712_v15 = vsub.f32 %v5743_v1, %v1709_v62 }
 0x52e   : > { %v1717_v21 = vmul.f32 1.442695, %v1712_v15 }
 0x52f   : > { %v5065_v63 = vpop.permute.xlu0 %5064 }
 0x530   : > { %v5067_v0 = vunpack.i.h.bf16 %v5065_v63  ;;  %v5066_v2 = vunpack.i.l.bf16 %v5065_v63 }
 0x532   : > { %v5129_v4 = vpop.eup %5128  ;;  %v4856_v57 = vpack.c.bf16 %v5067_v0, %v5066_v2 }
 0x533   : > { %v1719_v7 = vsel %vm977_vm6, %v5129_v4, 0.0 }
 0x534   : > { %1720 = vadd.xlane.f32.xlu1 %v1719_v7  ;;  %4857 = vmatpush3.bf16.msra.mxu0 %v4856_v57 }
 0x535   : > { %4503 = vmatprep.subr.mxu0 %v5308_v6 }
 0x544   : > { %v1465_v12 = vpop.xlane.xlu1 %1464 }
 0x545   : > { %v1470_v13 = vsub.f32 %v5748_v8, %v1465_v12 }
 0x547   : > { %v1474_v16 = vmul.f32 1.442695, %v1470_v13 }
 0x548   : > { %v1706_v22 = vpop.xlane.xlu1 %1705 }
 0x549   : > { %5130 = vpow2.f32 %v1474_v16  ;;  %v1711_v18 = vsub.f32 %v5755_v11, %v1706_v22 }
 0x54a   : > { %5132 = vpow2.f32 %v1476_v17 }
 0x54b   : > { %v1715_v23 = vmul.f32 1.442695, %v1711_v18 }
 0x54c   : > { %v1733_v26 = vpop.permute.xlu1 %1732 }
 0x54d   : > { %5134 = vpow2.f32 %v1715_v23  ;;  %4504 = vmatpush3.msra.mxu0 %v1733_v26 }
 0x54e   : > { %4864 = vmatprep.subr.bf16.mxu0 %v5306_v3  ;;  %5136 = vpow2.f32 %v1717_v21 }
 0x553   : > { %v5131_v52 = vpop.eup %5130 }
 0x554   : > { %4479 = vmatmul.mubr.msk.f32.gmra.mrb[26].mxu0 %vm977_vm6, %v5131_v52  ;;  %v1481_v1 = vsel %vm977_vm6, %v5131_v52, 0.0  ;;  %v5133_v8 = vpop.eup %5132 }
 0x555   : > { %1482 = vadd.xlane.f32.xlu1 %v1481_v1  ;;  %4481 = vmatprep.mubr.msk.f32.mxu0 %vm5307_vm0, %v5308_v6  ;;  %v1484_v33 = vsel %vm977_vm6, %v5133_v8, 0.0 }
 0x557   : > { %v5135_v11 = vpop.eup %5134 }
 0x558   : > { %4482 = vmatmul.mubr.msk.f32.gmra.mrb[28].mxu0 %vm977_vm6, %v5133_v8  ;;  %v1722_v30 = vsel %vm977_vm6, %v5135_v11, 0.0  ;;  %v5137_v31 = vpop.eup %5136 }
 0x559   : > { %1244 = vadd.xlane.f32.xlu1 %v1243_v27  ;;  %1723 = vadd.xlane.f32.xlu0 %v1722_v30  ;;  %v1725_v34 = vsel %vm977_vm6, %v5137_v31, 0.0 }
 0x55a   : > { %4505 = vmatprep.mubr.msk.f32.mxu0 %vm5307_vm0, %v5308_v6 }
 0x55c   : > { %4506 = vmatmul.mubr.msk.f32.vlgmr.msra.gmra.mrb[30].mxu0 %vm977_vm6, %v5129_v4 }
 0x55d   : > { %1485 = vadd.xlane.f32.xlu0 %v1484_v33  ;;  %1726 = vadd.xlane.f32.xlu1 %v1725_v34 }
 0x55e   : > { %4508 = vmatprep.mubr.msk.f32.mxu0 %vm5307_vm0, %v5308_v6 }
 0x560   : > { %4509 = vmatmul.mubr.msk.f32.gmra.mrb[32].mxu0 %vm977_vm6, %v5135_v11 }
 0x561   : > { %997 = vadd.xlane.f32.xlu0 %v996_v25  ;;  %1000 = vadd.xlane.f32.xlu1 %v999_v9 }
 0x562   : > { %4511 = vmatprep.mubr.msk.f32.mxu0 %vm5307_vm0, %v5308_v6 }
 0x564   : > { %4512 = vmatmul.mubr.msk.f32.gmra.mrb[34].mxu0 %vm977_vm6, %v5137_v31 }
 0x565   : > { %1003 = vadd.xlane.f32.xlu0 %v1002_v37  ;;  %4539 = vmatprep.mubr.msk.f32.mxu0 %vm5307_vm0, %v5308_v6 }
 0x5a9   : > { %v1239_v14 = vpop.xlane.xlu1 %1238 }
 0x5aa   : > { %5138 = vrcp.f32 %v1239_v14 }
 0x5ad   : > { %v1242_v20 = vpop.xlane.xlu1 %1241 }
 0x5ae   : > { %5140 = vrcp.f32 %v1242_v20 }
 0x5b4   : > { %v5139_v44 = vpop.eup %5138 }
 0x5b5   : > { %v1480_v43 = vpop.xlane.xlu0 %1479 }
 0x5b6   : > { %5142 = vrcp.f32 %v1480_v43 }
 0x5b8   : > { %v5141_v45 = vpop.eup %5140 }
 0x5c0   : > { %v5143_v59 = vpop.eup %5142 }
 0x5c1   : > { %v1721_v0 = vpop.xlane.xlu1 %1720 }
 0x5c2   : > { %5144 = vrcp.f32 %v1721_v0 }
 0x5cc   : > { %v5145_v17 = vpop.eup %5144 }
 0x5e2   : > { %v5841_v38 = vpop.f32.mrb[12].mxu0  ;;  %v1483_v2 = vpop.xlane.xlu1 %1482 }
 0x5e3   : > { %v4417_v36 = vpop.f32.mrb[13].mxu0  ;;  %5146 = vrcp.f32 %v1483_v2 }
 0x5e6   : > { %v5843_v28 = vpop.f32.mrb[14].mxu0  ;;  %v1724_v4 = vpop.xlane.xlu0 %1723 }
 0x5e7   : > { %v4420_v39 = vpop.f32.mrb[15].mxu0  ;;  %v1245_v7 = vpop.xlane.xlu1 %1244  ;;  %5148 = vrcp.f32 %v1724_v4 }
 0x5e8   : > { %5150 = vrcp.f32 %v1245_v7 }
 0x5ea   : > { %v5845_v41 = vpop.f32.mrb[16].mxu0  ;;  %v1486_v12 = vpop.xlane.xlu0 %1485 }
 0x5eb   : > { %v4423_v42 = vpop.f32.mrb[17].mxu0  ;;  %5152 = vrcp.f32 %v1486_v12  ;;  %v1727_v16 = vpop.xlane.xlu1 %1726 }
 0x5ec   : > { %5154 = vrcp.f32 %v1727_v16 }
 0x5ed   : > { %v5147_v23 = vpop.eup %5146 }
 0x5ee   : > { %v1330_v35 = vpop.f32.mrb[18].mxu0  ;;  %v998_v14 = vpop.xlane.xlu0 %997 }
 0x5ef   : > { %v1347_v46 = vmul.f32 %v5139_v44, %v1330_v35  ;;  %v4447_v47 = vpop.f32.mrb[19].mxu0  ;;  %5156 = vrcp.f32 %v998_v14  ;;  %v1001_v36 = vpop.xlane.xlu1 %1000 }
 0x5f0   : > { %5158 = vrcp.f32 %v1001_v36  ;;  %v2045_v36 = vld [vmem:[%s6596_s11 + $0x10] sm:$0xff] }
 0x5f1   : > { %1835 = vrot.lane.b32.xlu1 %v1347_v46, %s6640_s28  ;;  %v5149_v26 = vpop.eup %5148 }
 0x5f2   : > { %v1335_v51 = vpop.f32.mrb[20].mxu0  ;;  %v5151_v27 = vpop.eup %5150 }
 0x5f3   : > { %v1348_v53 = vmul.f32 %v5141_v45, %v1335_v51  ;;  %v4450_v54 = vpop.f32.mrb[21].mxu0  ;;  %v1004_v39 = vpop.xlane.xlu0 %1003 }
 0x5f4   : > { %5160 = vrcp.f32 %v1004_v39 }
 0x5f5   : > { %1837 = vrot.lane.b32.xlu1 %v1348_v53, %s6640_s28  ;;  %v5153_v30 = vpop.eup %5152 }
 0x5f6   : > { %v1340_v56 = vpop.f32.mrb[22].mxu0  ;;  %v5155_v9 = vpop.eup %5154 }
 0x5f7   : > { %v4453_v58 = vpop.f32.mrb[23].mxu0  ;;  %v1349_v33 = vmul.f32 %v5151_v27, %v1340_v56 }
 0x5f9   : > { %v5157_v42 = vpop.eup %5156 }
 0x5fa   : > { %v1571_v60 = vpop.f32.mrb[24].mxu0  ;;  %v1106_v44 = vmul.f32 %v5157_v42, %v5841_v38  ;;  %v5159_v46 = vpop.eup %5158  ;;  %v2158_v42 = vld [vmem:[%s6598_s13] sm:$0xff] }
 0x5fb   : > { %v1588_v62 = vmul.f32 %v5143_v59, %v1571_v60  ;;  %v4477_v63 = vpop.f32.mrb[25].mxu0  ;;  %v1107_v50 = vmul.f32 %v5159_v46, %v5843_v28  ;;  %v2161_v46 = vld [vmem:[%s6598_s13 + $0x18] sm:$0xff] }
 0x5fd   : > { %1847 = vrot.lane.b32.xlu0 %v1588_v62, %s6638_s24 }
 0x5fe   : > { %v5161_v61 = vpop.eup %5160 }
 0x5ff   : > { %v1108_v55 = vmul.f32 %v5161_v61, %v5845_v41  ;;  %v4057_v41 = vld [vmem:[%s6593_s8] ss:$0 sm:$0xff] }
 0x627   : > { %v1576_v57 = vpop.f32.mrb[26].mxu0 }
 0x628   : > { %v4480_v10 = vpop.f32.mrb[27].mxu0  ;;  %v1589_v1 = vmul.f32 %v5147_v23, %v1576_v57 }
 0x62b   : > { %v1581_v13 = vpop.f32.mrb[28].mxu0 }
 0x62c   : > { %v4483_v15 = vpop.f32.mrb[29].mxu0  ;;  %v1590_v34 = vmul.f32 %v5153_v30, %v1581_v13 }
 0x62f   : > { %v1812_v22 = vpop.f32.mrb[30].mxu0 }
 0x630   : > { %v1829_v18 = vmul.f32 %v5145_v17, %v1812_v22  ;;  %v4507_v21 = vpop.f32.mrb[31].mxu0 }
 0x632   : > { %1859 = vrot.lane.b32.xlu1 %v1829_v18, %s6636_s25 }
 0x633   : > { %v1817_v52 = vpop.f32.mrb[32].mxu0 }
 0x634   : > { %v1830_v8 = vmul.f32 %v5149_v26, %v1817_v52  ;;  %v4510_v11 = vpop.f32.mrb[33].mxu0 }
 0x636   : > { %1849 = vrot.lane.b32.xlu1 %v1589_v1, %s6638_s24  ;;  %1861 = vrot.lane.b32.xlu0 %v1830_v8, %s6636_s25 }
 0x637   : > { %v1822_v31 = vpop.f32.mrb[34].mxu0 }
 0x638   : > { %v4513_v25 = vpop.f32.mrb[35].mxu0  ;;  %v1831_v37 = vmul.f32 %v5155_v9, %v1822_v31  ;;  %v2043_v9 = vld [vmem:[%s6596_s11] sm:$0xff] }
 0x63a   : > { %1839 = vrot.lane.b32.xlu1 %v1349_v33, %s6640_s28  ;;  %1851 = vrot.lane.b32.xlu0 %v1590_v34, %s6638_s24  ;;  %s6665_s24 = smov 88   ;;  %s6671_s28 = smov 48  }
 0x63e   : > { %1863 = vrot.lane.b32.xlu1 %v1831_v37, %s6636_s25  ;;  %v2044_v37 = vld [vmem:[%s6596_s11 + $0x8] sm:$0xff]  ;;  %s6666_s25 = smov 112  }
 0x63f   : > { %v4865_v14 = vpack.c.bf16 %v2044_v37, %v2043_v9 }
 0x641   : > { %4866 = vmatpush3.bf16.msra.mxu0 %v4865_v14 }
 0x642   : > { %4867 = vmatprep.subr.bf16.mxu0 %v5306_v3 }
 0x663   : > { %v1836_v20 = vpop.permute.xlu1 %1835 }
 0x664   : > { %v1868_v47 = vsel %vm878_vm3, %v1106_v44, %v1836_v20  ;;  %v2046_v20 = vld [vmem:[%s6596_s11 + $0x18] sm:$0xff]  ;;  %v2160_v44 = vld [vmem:[%s6598_s13 + $0x10] sm:$0xff] }
 0x665   : > { %v4868_v39 = vpack.c.bf16 %v2046_v20, %v2045_v36 }
 0x667   : > { %v1838_v43 = vpop.permute.xlu1 %1837  ;;  %4869 = vmatpush3.bf16.msra.mxu0 %v4868_v39 }
 0x668   : > { %v1869_v38 = vsel %vm878_vm3, %v1107_v50, %v1838_v43  ;;  %4894 = vmatprep.subr.bf16.mxu0 %v5306_v3  ;;  %v2159_v43 = vld [vmem:[%s6598_s13 + $0x8] sm:$0xff] }
 0x66f   : > { %v1848_v35 = vpop.permute.xlu0 %1847 }
 0x670   : > { %v1872_v40 = vsel %vm1871_vm7, %v1868_v47, %v1848_v35  ;;  %v4871_v35 = vpack.c.bf16 %v2159_v43, %v2158_v42  ;;  %v4874_v47 = vpack.c.bf16 %v2161_v46, %v2160_v44 }
 0x6a4   : > { %v1860_v48 = vpop.permute.xlu1 %1859 }
 0x6a5   : > { %v1875_v49 = vsel %vm977_vm6, %v1872_v40, %v1860_v48  ;;  %v2162_v40 = vld [vmem:[%s6598_s13 + $0x20] sm:$0xff]  ;;  %v2163_v48 = vld [vmem:[%s6598_s13 + $0x28] sm:$0xff] }
 0x6a6   : > { %4523 = vmatmul.mubr.msk.f32.vlgmr.msra.gmra.mrb[24].mxu1 %vm710_vm2, %v1875_v49  ;;  %v4877_v49 = vpack.c.bf16 %v2163_v48, %v2162_v40 }
 0x6a7   : > { %4525 = vmatprep.mubr.msk.f32.mxu1 %vm5307_vm0, %v5308_v6  ;;  %4872 = vmatpush3.bf16.msra.mxu1 %v4871_v35 }
 0x6a8   : > { %v1850_v45 = vpop.permute.xlu1 %1849  ;;  %v1862_v51 = vpop.permute.xlu0 %1861  ;;  %4873 = vmatprep.subr.bf16.mxu1 %v5306_v3 }
 0x6a9   : > { %v1873_v53 = vsel %vm1871_vm7, %v1869_v38, %v1850_v45 }
 0x6aa   : > { %v1876_v54 = vsel %vm977_vm6, %v1873_v53, %v1862_v51 }
 0x6ab   : > { %4526 = vmatmul.mubr.msk.f32.gmra.mrb[26].mxu1 %vm710_vm2, %v1876_v54 }
 0x6ac   : > { %v1840_v56 = vpop.permute.xlu1 %1839  ;;  %4528 = vmatprep.mubr.msk.f32.mxu1 %vm5307_vm0, %v5308_v6  ;;  %v1852_v58 = vpop.permute.xlu0 %1851  ;;  %4875 = vmatpush3.bf16.msra.mxu1 %v4874_v47 }
 0x6ad   : > { %v1870_v28 = vsel %vm878_vm3, %v1108_v55, %v1840_v56  ;;  %4876 = vmatprep.subr.bf16.mxu1 %v5306_v3 }
 0x6ae   : > { %v1874_v59 = vsel %vm1871_vm7, %v1870_v28, %v1852_v58  ;;  %v4058_v28 = vld [vmem:[%s6594_s9] ss:$0 sm:$0xff] }
 0x6b0   : > { %v1864_v60 = vpop.permute.xlu1 %1863  ;;  %4878 = vmatpush3.bf16.msra.mxu1 %v4877_v49 }
 0x6b1   : > { %v1877_v62 = vsel %vm977_vm6, %v1874_v59, %v1864_v60  ;;  %4879 = vmatprep.subr.bf16.mxu1 %v5306_v3  ;;  %v4059_v60 = vld [vmem:[%s6595_s10] ss:$0 sm:$0xff] }
 0x6b2   : > { %4529 = vmatmul.mubr.msk.f32.gmra.mrb[28].mxu1 %vm710_vm2, %v1877_v62 }
 0x6b3   : > { %4580 = vmatprep.mubr.msk.f32.mxu1 %vm5307_vm0, %v5308_v6 }
 0x779   : > { %v1957_v63 = vpop.f32.mrb[24].mxu1 }
 0x77a   : > { %v1971_v0 = vadd.f32 %v1957_v63, %v5521_v19  ;;  %v4524_v2 = vpop.f32.mrb[25].mxu1 }
 0x77c   : > { %v5895_v4 = vadd.f32 %v4057_v41, %v1971_v0 }
 0x77e   : > { %v1962_v57 = vpop.f32.mrb[26].mxu1  ;;  %v1986_v7 = vsel %vm710_vm2, %v5895_v4, 0.0 }
 0x77f   : > { %v1972_v10 = vadd.f32 %v1962_v57, %v5528_v24  ;;  %1987 = vadd.xlane.f32.xlu0 %v1986_v7  ;;  %v4527_v12 = vpop.f32.mrb[27].mxu1 }
 0x781   : > { %v5900_v13 = vadd.f32 %v4057_v41, %v1972_v10 }
 0x783   : > { %v1989_v15 = vsel %vm710_vm2, %v5900_v13, 0.0 }
 0x784   : > { %1990 = vadd.xlane.f32.xlu1 %v1989_v15 }
 0x785   : > { %v1967_v16 = vpop.f32.mrb[28].mxu1 }
 0x786   : > { %v1973_v19 = vadd.f32 %v1967_v16, %v5535_v29  ;;  %v4530_v17 = vpop.f32.mrb[29].mxu1  ;;  %v2164_v16 = vld [vmem:[%s6598_s13 + $0x30] sm:$0xff] }
 0x788   : > { %v5905_v22 = vadd.f32 %v4057_v41, %v1973_v19  ;;  %v2165_v19 = vld [vmem:[%s6598_s13 + $0x38] sm:$0xff] }
 0x789   : > { %v4880_v17 = vpack.c.bf16 %v2165_v19, %v2164_v16 }
 0x78a   : > { %v1992_v18 = vsel %vm710_vm2, %v5905_v22, 0.0 }
 0x78b   : > { %1993 = vadd.xlane.f32.xlu0 %v1992_v18  ;;  %4881 = vmatpush3.bf16.msra.mxu1 %v4880_v17  ;;  %v2166_v18 = vld [vmem:[%s6598_s13 + $0x40] sm:$0xff] }
 0x78c   : > { %4882 = vmatprep.subr.bf16.mxu1 %v5306_v3 }
 0x80c   : > { %v1988_v21 = vpop.xlane.xlu0 %1987 }
 0x80d   : > { %v1995_v24 = vmul.f32 0.03125, %v1988_v21  ;;  %v2167_v21 = vld [vmem:[%s6598_s13 + $0x48] sm:$0xff] }
 0x80f   : > { %v1998_v23 = vsub.f32 %v5895_v4, %v1995_v24  ;;  %v4883_v24 = vpack.c.bf16 %v2167_v21, %v2166_v18 }
 0x811   : > { %v1991_v26 = vpop.xlane.xlu1 %1990  ;;  %v2001_v52 = vmul.f32 %v1998_v23, %v1998_v23  ;;  %4884 = vmatpush3.bf16.msra.mxu1 %v4883_v24 }
 0x812   : > { %v1996_v1 = vmul.f32 0.03125, %v1991_v26  ;;  %4885 = vmatprep.subr.bf16.mxu1 %v5306_v3  ;;  %v2169_v26 = vld [vmem:[%s6598_s13 + $0x58] sm:$0xff] }
 0x813   : > { %v2004_v8 = vsel %vm710_vm2, %v2001_v52, 0.0 }
 0x814   : > { %v1999_v11 = vsub.f32 %v5900_v13, %v1996_v1  ;;  %2005 = vadd.xlane.f32.xlu0 %v2004_v8  ;;  %v2170_v1 = vld [vmem:[%s6598_s13 + $0x60] sm:$0xff]  ;;  %v2171_v8 = vld [vmem:[%s6598_s13 + $0x68] sm:$0xff] }
 0x816   : > { %v2002_v29 = vmul.f32 %v1999_v11, %v1999_v11 }
 0x818   : > { %v1994_v27 = vpop.xlane.xlu0 %1993  ;;  %v2007_v30 = vsel %vm710_vm2, %v2002_v29, 0.0  ;;  %v2172_v29 = vld [vmem:[%s6598_s13 + $0x70] sm:$0xff] }
 0x819   : > { %v1997_v31 = vmul.f32 0.03125, %v1994_v27  ;;  %2008 = vadd.xlane.f32.xlu0 %v2007_v30  ;;  %v2173_v27 = vld [vmem:[%s6598_s13 + $0x78] sm:$0xff] }
 0x81a   : > { %v4892_v30 = vpack.c.bf16 %v2173_v27, %v2172_v29  ;;  %v4070_v29 = vld [vmem:[%s6590_s5 + $0x28] sm:$0xff] }
 0x81b   : > { %v2000_v33 = vsub.f32 %v5905_v22, %v1997_v31  ;;  %v4060_v31 = vld [vmem:[%s6597_s12] ss:$0 sm:$0xff] }
 0x81d   : > { %v2003_v34 = vmul.f32 %v2000_v33, %v2000_v33 }
 0x81f   : > { %v2010_v25 = vsel %vm710_vm2, %v2003_v34, 0.0 }
 0x820   : > { %2011 = vadd.xlane.f32.xlu1 %v2010_v25 }
 0x8a1   : > { %v2006_v50 = vpop.xlane.xlu0 %2005 }
 0x8a2   : > { %v2013_v61 = vmul.f32 0.03125, %v2006_v50 }
 0x8a4   : > { %v2016_v38 = vadd.f32 1e-06, %v2013_v61 }
 0x8a6   : > { %5162 = vrsqrt.f32 %v2016_v38  ;;  %v2009_v45 = vpop.xlane.xlu0 %2008 }
 0x8a7   : > { %v2014_v51 = vmul.f32 0.03125, %v2009_v45 }
 0x8a9   : > { %v2017_v53 = vadd.f32 1e-06, %v2014_v51 }
 0x8ab   : > { %5164 = vrsqrt.f32 %v2017_v53 }
 0x8ad   : > { %v2012_v54 = vpop.xlane.xlu1 %2011 }
 0x8ae   : > { %v2015_v55 = vmul.f32 0.03125, %v2012_v54 }
 0x8b0   : > { %v5163_v56 = vpop.eup %5162  ;;  %v2018_v58 = vadd.f32 1e-06, %v2015_v55  ;;  %v4064_v55 = vld [vmem:[%s6599_s14] ss:$0 sm:$0xff] }
 0x8b1   : > { %v2022_v59 = vmul.f32 %v5163_v56, %v1998_v23  ;;  %v2168_v23 = vld [vmem:[%s6598_s13 + $0x50] sm:$0xff] }
 0x8b2   : > { %5166 = vrsqrt.f32 %v2018_v58  ;;  %v4886_v52 = vpack.c.bf16 %v2169_v26, %v2168_v23 }
 0x8b3   : > { %v2031_v62 = vmul.f32 %v4058_v28, %v2022_v59 }
 0x8b4   : > { %4887 = vmatpush3.bf16.msra.mxu1 %v4886_v52 }
 0x8b5   : > { %v5165_v63 = vpop.eup %5164  ;;  %v2040_v41 = vadd.f32 %v4059_v60, %v2031_v62  ;;  %4888 = vmatprep.subr.bf16.mxu1 %v5306_v3 }
 0x8b6   : > { %v2023_v0 = vmul.f32 %v5165_v63, %v1999_v11  ;;  %v4889_v11 = vpack.c.bf16 %v2171_v8, %v2170_v1 }
 0x8b7   : > { %4540 = vmatmul.mubr.msk.f32.vlgmr.msra.gmra.mrb[36].mxu0 %vm710_vm2, %v2040_v41 }
 0x8b8   : > { %4542 = vmatprep.mubr.msk.f32.mxu0 %vm5307_vm0, %v5308_v6  ;;  %v2032_v2 = vmul.f32 %v4058_v28, %v2023_v0  ;;  %4890 = vmatpush3.bf16.msra.mxu1 %v4889_v11  ;;  %v4069_v11 = vld [vmem:[%s6590_s5 + $0x20] sm:$0xff] }
 0x8b9   : > { %4891 = vmatprep.subr.bf16.mxu1 %v5306_v3  ;;  %v4895_v27 = vpack.c.bf16 %v4070_v29, %v4069_v11 }
 0x8ba   : > { %v2041_v57 = vadd.f32 %v4059_v60, %v2032_v2 }
 0x8bb   : > { %4896 = vmatpush3.bf16.msra.mxu0 %v4895_v27 }
 0x8bc   : > { %v5167_v7 = vpop.eup %5166  ;;  %4543 = vmatmul.mubr.msk.f32.gmra.mrb[38].mxu0 %vm710_vm2, %v2041_v57  ;;  %4893 = vmatpush3.bf16.msra.mxu1 %v4892_v30  ;;  %v4071_v30 = vld [vmem:[%s6590_s5 + $0x30] sm:$0xff] }
 0x8bd   : > { %4545 = vmatprep.mubr.msk.f32.mxu0 %vm5307_vm0, %v5308_v6  ;;  %v2024_v10 = vmul.f32 %v5167_v7, %v2000_v33  ;;  %4907 = vmatprep.subr.bf16.mxu1 %v5306_v3 }
 0x8be   : > { %4897 = vmatprep.subr.bf16.mxu0 %v5306_v3 }
 0x8bf   : > { %v2033_v12 = vmul.f32 %v4058_v28, %v2024_v10 }
 0x8c1   : > { %v2042_v15 = vadd.f32 %v4059_v60, %v2033_v12 }
 0x8c3   : > { %4546 = vmatmul.mubr.msk.f32.gmra.mrb[40].mxu0 %vm710_vm2, %v2042_v15 }
 0x8c4   : > { %4597 = vmatprep.mubr.msk.f32.mxu0 %vm5307_vm0, %v5308_v6 }
 0x98a   : > { %v2129_v33 = vpop.f32.mrb[36].mxu0 }
 0x98b   : > { %v2130_v34 = vadd.f32 %v4060_v31, %v2129_v33  ;;  %v4541_v25 = vpop.f32.mrb[37].mxu0 }
 0x98d   : > { %v2146_v9 = vmul.f32 0.70710677, %v2130_v34  ;;  %v2143_v46 = vmul.f32 0.5, %v2130_v34 }
 0x98f   : > { %5168 = verf.f32 %v2146_v9  ;;  %v2134_v37 = vpop.f32.mrb[38].mxu0 }
 0x990   : > { %v2135_v14 = vadd.f32 %v4060_v31, %v2134_v37  ;;  %v4544_v36 = vpop.f32.mrb[39].mxu0 }
 0x992   : > { %v2147_v20 = vmul.f32 0.70710677, %v2135_v14  ;;  %v2144_v49 = vmul.f32 0.5, %v2135_v14 }
 0x994   : > { %5170 = verf.f32 %v2147_v20 }
 0x996   : > { %v2139_v39 = vpop.f32.mrb[40].mxu0 }
 0x997   : > { %v2140_v42 = vadd.f32 %v4060_v31, %v2139_v39  ;;  %v4547_v43 = vpop.f32.mrb[41].mxu0  ;;  %v4072_v31 = vld [vmem:[%s6590_s5 + $0x38] sm:$0xff] }
 0x998   : > { %v4898_v33 = vpack.c.bf16 %v4072_v31, %v4071_v30  ;;  %v4067_v43 = vld [vmem:[%s6659_s2 + $0x1] ss:$0 sm:$0xff] }
 0x999   : > { %v5169_v44 = vpop.eup %5168  ;;  %v2148_v35 = vmul.f32 0.70710677, %v2140_v42  ;;  %v2145_v45 = vmul.f32 0.5, %v2140_v42 }
 0x99a   : > { %v2152_v47 = vadd.f32 1.0, %v5169_v44  ;;  %4899 = vmatpush3.bf16.msra.mxu0 %v4898_v33 }
 0x99b   : > { %5172 = verf.f32 %v2148_v35  ;;  %4900 = vmatprep.subr.bf16.mxu0 %v5306_v3 }
 0x99c   : > { %v2155_v40 = vmul.f32 %v2152_v47, %v2143_v46  ;;  %v4068_v46 = vld [vmem:[%s6589_s4 + $0x1] ss:$0 sm:$0xff] }
 0x99e   : > { %v5171_v48 = vpop.eup %5170  ;;  %4581 = vmatmul.mubr.f32.vlgmr.msra.gmra.mrb[30].mxu1 %v2155_v40 }
 0x99f   : > { %v2153_v50 = vadd.f32 1.0, %v5171_v48  ;;  %4583 = vmatprep.mubr.msk.f32.mxu1 %vm5307_vm0, %v5308_v6 }
 0x9a1   : > { %v2156_v61 = vmul.f32 %v2153_v50, %v2144_v49 }
 0x9a3   : > { %4584 = vmatmul.mubr.f32.gmra.mrb[32].mxu1 %v2156_v61 }
 0x9a4   : > { %4586 = vmatprep.mubr.msk.f32.mxu1 %vm5307_vm0, %v5308_v6 }
 0x9a5   : > { %v5173_v38 = vpop.eup %5172 }
 0x9a6   : > { %v2154_v51 = vadd.f32 1.0, %v5173_v38 }
 0x9a8   : > { %v2157_v53 = vmul.f32 %v2154_v51, %v2145_v45 }
 0x9aa   : > { %4587 = vmatmul.mubr.f32.gmra.mrb[34].mxu1 %v2157_v53 }
 0x9ab   : > { %4642 = vmatprep.mubr.msk.f32.mxu1 %vm5307_vm0, %v5308_v6 }
 0xa71   : > { %v2240_v54 = vpop.f32.mrb[30].mxu1 }
 0xa72   : > { %v2254_v56 = vadd.f32 %v2240_v54, %v5895_v4  ;;  %v4582_v28 = vpop.f32.mrb[31].mxu1 }
 0xa74   : > { %v6013_v58 = vadd.f32 %v4064_v55, %v2254_v56  ;;  %v4074_v56 = vld [vmem:[%s6591_s6 + $0x1] ss:$0 sm:$0xff] }
 0xa76   : > { %v2245_v59 = vpop.f32.mrb[32].mxu1  ;;  %v2271_v60 = vsel %vm710_vm2, %v6013_v58, 0.0 }
 0xa77   : > { %v2255_v62 = vadd.f32 %v2245_v59, %v5900_v13  ;;  %2272 = vadd.xlane.f32.xlu0 %v2271_v60  ;;  %v4585_v63 = vpop.f32.mrb[33].mxu1 }
 0xa79   : > { %v6018_v41 = vadd.f32 %v4064_v55, %v2255_v62 }
 0xa7b   : > { %v2274_v0 = vsel %vm710_vm2, %v6018_v41, 0.0 }
 0xa7c   : > { %2275 = vadd.xlane.f32.xlu1 %v2274_v0 }
 0xa7d   : > { %v2250_v2 = vpop.f32.mrb[34].mxu1 }
 0xa7e   : > { %v2256_v4 = vadd.f32 %v2250_v2, %v5905_v22  ;;  %v4588_v57 = vpop.f32.mrb[35].mxu1 }
 0xa80   : > { %v6023_v7 = vadd.f32 %v4064_v55, %v2256_v4 }
 0xa82   : > { %v2277_v10 = vsel %vm710_vm2, %v6023_v7, 0.0 }
 0xa83   : > { %2278 = vadd.xlane.f32.xlu0 %v2277_v10 }
 0xb04   : > { %v2273_v12 = vpop.xlane.xlu0 %2272 }
 0xb05   : > { %v2280_v13 = vmul.f32 0.03125, %v2273_v12 }
 0xb07   : > { %v2283_v15 = vsub.f32 %v6013_v58, %v2280_v13 }
 0xb09   : > { %v2276_v16 = vpop.xlane.xlu1 %2275  ;;  %v2286_v19 = vmul.f32 %v2283_v15, %v2283_v15 }
 0xb0a   : > { %v2281_v17 = vmul.f32 0.03125, %v2276_v16 }
 0xb0b   : > { %v2289_v18 = vsel %vm710_vm2, %v2286_v19, 0.0 }
 0xb0c   : > { %v2284_v21 = vsub.f32 %v6018_v41, %v2281_v17  ;;  %2290 = vadd.xlane.f32.xlu1 %v2289_v18 }
 0xb0e   : > { %v2287_v22 = vmul.f32 %v2284_v21, %v2284_v21 }
 0xb10   : > { %v2279_v24 = vpop.xlane.xlu0 %2278  ;;  %v2292_v23 = vsel %vm710_vm2, %v2287_v22, 0.0 }
 0xb11   : > { %v2282_v26 = vmul.f32 0.03125, %v2279_v24  ;;  %2293 = vadd.xlane.f32.xlu0 %v2292_v23 }
 0xb13   : > { %v2285_v52 = vsub.f32 %v6023_v7, %v2282_v26 }
 0xb15   : > { %v2288_v1 = vmul.f32 %v2285_v52, %v2285_v52 }
 0xb17   : > { %v2295_v8 = vsel %vm710_vm2, %v2288_v1, 0.0 }
 0xb18   : > { %2296 = vadd.xlane.f32.xlu1 %v2295_v8 }
 0xb99   : > { %v2291_v34 = vpop.xlane.xlu1 %2290 }
 0xb9a   : > { %v2298_v25 = vmul.f32 0.03125, %v2291_v34 }
 0xb9c   : > { %v2301_v9 = vadd.f32 1e-06, %v2298_v25 }
 0xb9e   : > { %5174 = vrsqrt.f32 %v2301_v9  ;;  %v2294_v37 = vpop.xlane.xlu0 %2293 }
 0xb9f   : > { %v2299_v14 = vmul.f32 0.03125, %v2294_v37 }
 0xba1   : > { %v2302_v36 = vadd.f32 1e-06, %v2299_v14 }
 0xba3   : > { %5176 = vrsqrt.f32 %v2302_v36 }
 0xba5   : > { %v2297_v20 = vpop.xlane.xlu1 %2296 }
 0xba6   : > { %v2300_v39 = vmul.f32 0.03125, %v2297_v20 }
 0xba8   : > { %v5175_v42 = vpop.eup %5174  ;;  %v2303_v44 = vadd.f32 1e-06, %v2300_v39 }
 0xba9   : > { %v2307_v35 = vmul.f32 %v5175_v42, %v2283_v15 }
 0xbaa   : > { %5178 = vrsqrt.f32 %v2303_v44 }
 0xbab   : > { %v2316_v47 = vmul.f32 %v4067_v43, %v2307_v35 }
 0xbad   : > { %v5177_v40 = vpop.eup %5176  ;;  %v2325_v48 = vadd.f32 %v4068_v46, %v2316_v47 }
 0xbae   : > { %v2308_v49 = vmul.f32 %v5177_v40, %v2284_v21 }
 0xbaf   : > { %4598 = vmatmul.mubr.msk.f32.vlgmr.msra.gmra.mrb[42].mxu0 %vm710_vm2, %v2325_v48 }
 0xbb0   : > { %4600 = vmatprep.mubr.msk.f32.mxu0 %vm5307_vm0, %v5308_v6  ;;  %v2317_v50 = vmul.f32 %v4067_v43, %v2308_v49 }
 0xbb2   : > { %v2326_v61 = vadd.f32 %v4068_v46, %v2317_v50 }
 0xbb4   : > { %v5179_v38 = vpop.eup %5178  ;;  %4601 = vmatmul.mubr.msk.f32.gmra.mrb[44].mxu0 %vm710_vm2, %v2326_v61 }
 0xbb5   : > { %4603 = vmatprep.mubr.msk.f32.mxu0 %vm5307_vm0, %v5308_v6  ;;  %v2309_v45 = vmul.f32 %v5179_v38, %v2285_v52 }
 0xbb7   : > { %v2318_v51 = vmul.f32 %v4067_v43, %v2309_v45 }
 0xbb9   : > { %v2327_v53 = vadd.f32 %v4068_v46, %v2318_v51 }
 0xbbb   : > { %4604 = vmatmul.mubr.msk.f32.gmra.mrb[46].mxu0 %vm710_vm2, %v2327_v53 }
 0xbbc   : > { %4612 = vmatprep.mubr.msk.f32.mxu0 %vm5307_vm0, %v5308_v6 }
 0xc82   : > { %v2416_v54 = vpop.f32.mrb[42].mxu0 }
 0xc83   : > { %v4599_v55 = vpop.f32.mrb[43].mxu0  ;;  %v2417_v59 = vadd.f32 %v4074_v56, %v2416_v54 }
 0xc87   : > { %v2421_v28 = vpop.f32.mrb[44].mxu0 }
 0xc88   : > { %v6065_v60 = vadd.f32 %v4074_v56, %v2421_v28  ;;  %v4602_v62 = vpop.f32.mrb[45].mxu0 }
 0xc8a   : > { %v6068_v63 = vpack.i.bf16 %v6065_v60, %v2417_v59 }
 0xc8c   : > { %5069 = vrot.lane.b32.xlu0 %v6068_v63, %s6662_s22 }
 0xc8e   : > { %v2426_v0 = vpop.f32.mrb[46].mxu0 }
 0xc8f   : > { %v6072_v2 = vadd.f32 %v4074_v56, %v2426_v0  ;;  %v4605_v4 = vpop.f32.mrb[47].mxu0 }
 0xc90   : > { %5079 = vrot.lane.b32.xlu0 %v6068_v63, %s6663_s23 }
 0xc91   : > { %2437 = vrot.lane.b32.xlu1 %v6072_v2, %s6662_s22  ;;  %s6672_s22 = smov 40  }
 0xc94   : > { %2670 = vrot.lane.b32.xlu0 %v6065_v60, %s6664_s27 }
 0xc95   : > { %5074 = vrot.lane.b32.xlu1 %v6068_v63, %s6665_s24 }
 0xc98   : > { %2919 = vrot.lane.b32.xlu0 %v6072_v2, %s6663_s23  ;;  %s6673_s23 = smov 8  }
 0xc99   : > { %2678 = vrot.lane.b32.xlu1 %v6072_v2, %s6665_s24 }
 0xc9c   : > { %2909 = vrot.lane.b32.xlu0 %v2417_v59, %s6666_s25 }
 0xc9d   : > { %2668 = vrot.lane.b32.xlu1 %v2417_v59, %s6664_s27 }
 0xca0   : > { %2913 = vrot.lane.b32.xlu0 %v6072_v2, %s6666_s25 }
 0xca1   : > { %2672 = vrot.lane.b32.xlu1 %v6072_v2, %s6664_s27  ;;  %s6675_s27 = smov 24  }
 0xca4   : > { %3150 = vrot.lane.b32.xlu0 %v2417_v59, %s6667_s20 }
 0xca5   : > { %5084 = vrot.lane.b32.xlu1 %v6068_v63, %s6668_s0 }
 0xca8   : > { %2568 = vrot.lane.b32.xlu0 %v6072_v2, %s6669_s26 }
 0xca9   : > { %2911 = vrot.lane.b32.xlu1 %v6065_v60, %s6666_s25 }
 0xcad   : > { %3160 = vrot.lane.b32.xlu1 %v6072_v2, %s6668_s0 }
 0xcb1   : > { %5089 = vrot.lane.b32.xlu1 %v6068_v63, %s6669_s26 }
 0xcfe   : > { %v5070_v57 = vpop.permute.xlu0 %5069 }
 0xcff   : > { %v5072_v10 = vunpack.i.h.bf16 %v5070_v57  ;;  %v5071_v12 = vunpack.i.l.bf16 %v5070_v57 }
 0xd01   : > { %v4901_v13 = vpack.c.bf16 %v5072_v10, %v5071_v12 }
 0xd02   : > { %v5080_v16 = vpop.permute.xlu0 %5079 }
 0xd03   : > { %4903 = vmatpush3.bf16.xpose.msk.msra.mxu0 %vm5627_vm4, %v4901_v13  ;;  %v2438_v15 = vpop.permute.xlu1 %2437  ;;  %v5082_v26 = vunpack.i.h.bf16 %v5080_v16  ;;  %v5081_v52 = vunpack.i.l.bf16 %v5080_v16 }
 0xd04   : > { %4610 = vmatprep.subr.mxu0 %v5308_v6 }
 0xd05   : > { %v4915_v11 = vpack.c.bf16 %v5082_v26, %v5081_v52 }
 0xd06   : > { %v2671_v24 = vpop.permute.xlu0 %2670 }
 0xd07   : > { %v5075_v19 = vpop.permute.xlu1 %5074 }
 0xd08   : > { %v5077_v17 = vunpack.i.h.bf16 %v5075_v19  ;;  %v5076_v18 = vunpack.i.l.bf16 %v5075_v19 }
 0xd0a   : > { %v4908_v21 = vpack.c.bf16 %v5077_v17, %v5076_v18  ;;  %v2920_v1 = vpop.permute.xlu0 %2919 }
 0xd0b   : > { %4611 = vmatpush3.xpose.msk.msra.mxu0 %vm878_vm3, %v2438_v15  ;;  %v2679_v22 = vpop.permute.xlu1 %2678 }
 0xd0c   : > { %4910 = vmatpush3.bf16.xpose.msk.msra.mxu1 %vm5627_vm4, %v4908_v21  ;;  %4904 = vmatprep.subr.bf16.mxu0 %v5306_v3 }
 0xd0d   : > { %4640 = vmatprep.subr.mxu1 %v5308_v6 }
 0xd0e   : > { %4613 = vmatmul.mubr.msk.f32.vlgmr.msra.gmra.mrb[48].mxu0 %vm878_vm3, %v2417_v59  ;;  %v2910_v27 = vpop.permute.xlu0 %2909 }
 0xd0f   : > { %v2669_v23 = vpop.permute.xlu1 %2668  ;;  %4615 = vmatprep.mubr.msk.f32.mxu0 %vm5307_vm0, %v5308_v6 }
 0xd12   : > { %4616 = vmatmul.mubr.msk.f32.gmra.mrb[50].mxu0 %vm878_vm3, %v6065_v60  ;;  %v2914_v34 = vpop.permute.xlu0 %2913 }
 0xd13   : > { %v2673_v8 = vpop.permute.xlu1 %2672  ;;  %4618 = vmatprep.mubr.msk.f32.mxu0 %vm5307_vm0, %v5308_v6 }
 0xd14   : > { %4641 = vmatpush3.xpose.msk.msra.mxu1 %vm878_vm3, %v2679_v22 }
 0xd15   : > { %4914 = vmatprep.subr.bf16.mxu1 %v5306_v3 }
 0xd16   : > { %4619 = vmatmul.mubr.msk.f32.gmra.mrb[52].mxu0 %vm878_vm3, %v6072_v2  ;;  %v3151_v20 = vpop.permute.xlu0 %3150 }
 0xd17   : > { %v5085_v29 = vpop.permute.xlu1 %5084  ;;  %4643 = vmatmul.mubr.msk.f32.vlgmr.msra.gmra.mrb[36].mxu1 %vm878_vm3, %v2669_v23  ;;  %4627 = vmatprep.mubr.msk.f32.mxu0 %vm5307_vm0, %v5308_v6 }
 0xd18   : > { %4917 = vmatpush3.bf16.xpose.msk.msra.mxu1 %vm5627_vm4, %v4915_v11  ;;  %4645 = vmatprep.mubr.msk.f32.mxu1 %vm5307_vm0, %v5308_v6  ;;  %v5087_v31 = vunpack.i.h.bf16 %v5085_v29  ;;  %v5086_v33 = vunpack.i.l.bf16 %v5085_v29 }
 0xd19   : > { %4670 = vmatprep.subr.mxu1 %v5308_v6 }
 0xd1a   : > { %v4922_v9 = vpack.c.bf16 %v5087_v31, %v5086_v33  ;;  %v2569_v42 = vpop.permute.xlu0 %2568 }
 0xd1b   : > { %v2912_v30 = vpop.permute.xlu1 %2911  ;;  %4646 = vmatmul.mubr.msk.f32.gmra.mrb[38].mxu1 %vm878_vm3, %v2671_v24 }
 0xd1c   : > { %4648 = vmatprep.mubr.msk.f32.mxu1 %vm5307_vm0, %v5308_v6 }
 0xd1f   : > { %v3161_v25 = vpop.permute.xlu1 %3160  ;;  %4649 = vmatmul.mubr.msk.f32.gmra.mrb[40].mxu1 %vm878_vm3, %v2673_v8 }
 0xd20   : > { %4671 = vmatpush3.xpose.msk.msra.mxu1 %vm878_vm3, %v2920_v1  ;;  %4672 = vmatprep.mubr.msk.f32.mxu1 %vm5307_vm0, %v5308_v6 }
 0xd21   : > { %4921 = vmatprep.subr.bf16.mxu1 %v5306_v3 }
 0xd23   : > { %v5090_v37 = vpop.permute.xlu1 %5089  ;;  %4673 = vmatmul.mubr.msk.f32.vlgmr.msra.gmra.mrb[42].mxu1 %vm878_vm3, %v2910_v27 }
 0xd24   : > { %v5092_v14 = vunpack.i.h.bf16 %v5090_v37  ;;  %v5091_v36 = vunpack.i.l.bf16 %v5090_v37  ;;  %4924 = vmatpush3.bf16.xpose.msk.msra.mxu1 %vm5627_vm4, %v4922_v9  ;;  %4675 = vmatprep.mubr.msk.f32.mxu1 %vm5307_vm0, %v5308_v6 }
 0xd25   : > { %4700 = vmatprep.subr.mxu1 %v5308_v6 }
 0xd26   : > { %v4905_v39 = vpack.c.bf16 %v5092_v14, %v5091_v36 }
 0xd27   : > { %4676 = vmatmul.mubr.msk.f32.gmra.mrb[44].mxu1 %vm878_vm3, %v2912_v30 }
 0xd28   : > { %4906 = vmatpush3.bf16.msra.mxu0 %v4905_v39  ;;  %4678 = vmatprep.mubr.msk.f32.mxu1 %vm5307_vm0, %v5308_v6 }
 0xd29   : > { %4625 = vmatprep.subr.mxu0 %v5308_v6 }
 0xd2b   : > { %4679 = vmatmul.mubr.msk.f32.gmra.mrb[46].mxu1 %vm878_vm3, %v2914_v34 }
 0xd2c   : > { %4626 = vmatpush3.msra.mxu0 %v2569_v42  ;;  %4701 = vmatpush3.xpose.msk.msra.mxu1 %vm878_vm3, %v3161_v25 }
 0xd2d   : > { %4702 = vmatprep.mubr.msk.f32.mxu1 %vm5307_vm0, %v5308_v6  ;;  %4911 = vmatprep.subr.bf16.mxu0 %v5306_v3 }
 0xd2e   : > { %4928 = vmatprep.subr.bf16.mxu1 %v5306_v3 }
 0xd2f   : > { %4703 = vmatmul.mubr.msk.f32.vlgmr.msra.gmra.mrb[48].mxu1 %vm878_vm3, %v3151_v20 }
 0xd30   : > { %4705 = vmatprep.mubr.msk.f32.mxu1 %vm5307_vm0, %v5308_v6 }
 0xde1   : > { %v2517_v32 = vpop.f32.mrb[48].mxu0 }
 0xde2   : > { %v2531_v43 = vmul.f32 0.35355338, %v2517_v32  ;;  %v4614_v44 = vpop.f32.mrb[49].mxu0 }
 0xde4   : > { %v6158_v35 = vadd.f32 %v2531_v43, %v5693_v5 }
 0xde5   : > { %v2522_v46 = vpop.f32.mrb[50].mxu0 }
 0xde6   : > { %v4617_v47 = vpop.f32.mrb[51].mxu0  ;;  %v2537_v40 = vsel %vm977_vm6, %v6158_v35, -inf  ;;  %v2532_v61 = vmul.f32 0.35355338, %v2522_v46 }
 0xde7   : > { %2538 = vmax.xlane.f32.xlu1 %v2537_v40 }
 0xde8   : > { %v6168_v28 = vadd.f32 %v2532_v61, %v5693_v5 }
 0xde9   : > { %v2527_v48 = vpop.f32.mrb[52].mxu0 }
 0xdea   : > { %v4620_v49 = vpop.f32.mrb[53].mxu0  ;;  %v2758_v50 = vpop.f32.mrb[36].mxu1  ;;  %v2533_v54 = vmul.f32 0.35355338, %v2527_v48  ;;  %v2540_v4 = vsel %vm977_vm6, %v6168_v28, -inf }
 0xdeb   : > { %v2772_v38 = vmul.f32 0.35355338, %v2758_v50  ;;  %v4644_v45 = vpop.f32.mrb[37].mxu1 }
 0xdec   : > { %v6173_v57 = vadd.f32 %v2533_v54, %v5693_v5 }
 0xded   : > { %v6163_v51 = vadd.f32 %v2772_v38, %v5693_v5 }
 0xdee   : > { %v2763_v53 = vpop.f32.mrb[38].mxu1  ;;  %v2543_v16 = vsel %vm977_vm6, %v6173_v57, -inf }
 0xdef   : > { %v4647_v55 = vpop.f32.mrb[39].mxu1  ;;  %v2778_v56 = vsel %vm977_vm6, %v6163_v51, -inf  ;;  %v2773_v31 = vmul.f32 0.35355338, %v2763_v53 }
 0xdf0   : > { %2779 = vmax.xlane.f32.xlu0 %v2778_v56 }
 0xdf1   : > { %v6197_v33 = vadd.f32 %v2773_v31, %v5693_v5 }
 0xdf2   : > { %v2768_v59 = vpop.f32.mrb[40].mxu1 }
 0xdf3   : > { %v2774_v62 = vmul.f32 0.35355338, %v2768_v59  ;;  %v4650_v0 = vpop.f32.mrb[41].mxu1  ;;  %v2781_v9 = vsel %vm977_vm6, %v6197_v33, -inf }
 0xdf4   : > { %2541 = vmax.xlane.f32.xlu0 %v2540_v4 }
 0xdf5   : > { %v6176_v12 = vadd.f32 %v2774_v62, %v5693_v5 }
 0xdf6   : > { %v2999_v10 = vpop.f32.mrb[42].mxu1 }
 0xdf7   : > { %v3013_v13 = vmul.f32 0.35355338, %v2999_v10  ;;  %v4674_v15 = vpop.f32.mrb[43].mxu1  ;;  %v2784_v21 = vsel %vm977_vm6, %v6176_v12, -inf }
 0xdf8   : > { %5094 = vrot.lane.b32.xlu1 %v6068_v63, %s6670_s29  ;;  %2544 = vmax.xlane.f32.xlu0 %v2543_v16 }
 0xdf9   : > { %v6183_v17 = vadd.f32 %v3013_v13, %v5693_v5 }
 0xdfa   : > { %v3004_v19 = vpop.f32.mrb[44].mxu1 }
 0xdfb   : > { %v4677_v18 = vpop.f32.mrb[45].mxu1  ;;  %v3019_v26 = vsel %vm977_vm6, %v6183_v17, -inf  ;;  %v3014_v34 = vmul.f32 0.35355338, %v3004_v19 }
 0xdfc   : > { %2785 = vmax.xlane.f32.xlu0 %v2784_v21 }
 0xdfd   : > { %v6200_v25 = vadd.f32 %v3014_v34, %v5693_v5 }
 0xdfe   : > { %v3009_v22 = vpop.f32.mrb[46].mxu1 }
 0xdff   : > { %v3015_v24 = vmul.f32 0.35355338, %v3009_v22  ;;  %v4680_v23 = vpop.f32.mrb[47].mxu1  ;;  %v3022_v37 = vsel %vm977_vm6, %v6200_v25, -inf }
 0xe00   : > { %3020 = vmax.xlane.f32.xlu0 %v3019_v26 }
 0xe01   : > { %v6190_v52 = vadd.f32 %v3015_v24, %v5693_v5 }
 0xe02   : > { %v3240_v1 = vpop.f32.mrb[48].mxu1 }
 0xe03   : > { %v3254_v8 = vmul.f32 0.35355338, %v3240_v1  ;;  %v4704_v11 = vpop.f32.mrb[49].mxu1  ;;  %v3025_v29 = vsel %vm977_vm6, %v6190_v52, -inf }
 0xe04   : > { %3026 = vmax.xlane.f32.xlu0 %v3025_v29 }
 0xe05   : > { %v3257_v27 = vadd.f32 %v3254_v8, %v5693_v5 }
 0xe07   : > { %v3260_v30 = vsel %vm977_vm6, %v3257_v27, -inf }
 0xe08   : > { %3261 = vmax.xlane.f32.xlu0 %v3260_v30 }
 0xe1c   : > { %2782 = vmax.xlane.f32.xlu1 %v2781_v9 }
 0xe1e   : > { %2809 = vrot.lane.b32.xlu0 %v6072_v2, %s6670_s29  ;;  %s4157_s29 = sshll.u32 %s5446_s1, 4  ;;  %s5324_s1 = smov [#allocation2]  }
 0xe1f   : > { %s5246_s26 = sshll.u32 %s5324_s1, 4  ;;  %s5247_s26 = int_to_ptr.vmem [resolvable:$false] %s5246_s26 }
 0xe20   : > { %3023 = vmax.xlane.f32.xlu1 %v3022_v37  ;;  %s5248_s2 = scalar_lea.vmem %s5247_s26, 32 }
 0xe22   : > { %3154 = vrot.lane.b32.xlu0 %v6072_v2, %s6667_s20 }
 0xe31   : > { %5099 = vrot.lane.b32.xlu1 %v6068_v63, %s6671_s28 }
 0xe35   : > { %3050 = vrot.lane.b32.xlu1 %v6072_v2, %s6671_s28 }
 0xe39   : > { %5104 = vrot.lane.b32.xlu1 %v6068_v63, %s6672_s22 }
 0xe3d   : > { %3291 = vrot.lane.b32.xlu1 %v6072_v2, %s6672_s22  ;;  %s6674_s22 = smov 16  }
 0xe41   : > { %3152 = vrot.lane.b32.xlu1 %v6065_v60, %s6667_s20  ;;  %s593_s20 = sand.u32 1, %s5296_s30  }
 0xe42   : > { %s594_s28 = scalar_lea.vmem [#allocation2], %s593_s20  ;;  %s3937_s25 = scalar_lea.sflag [#allocation3], %s593_s20 }
 0xe74   : > { %v2539_v14 = vpop.xlane.xlu1 %2538 }
 0xe75   : > { %v2546_v36 = vsub.f32 %v6158_v35, %v2539_v14 }
 0xe77   : > { %v2549_v20 = vmul.f32 1.442695, %v2546_v36 }
 0xe78   : > { %v5095_v39 = vpop.permute.xlu1 %5094 }
 0xe79   : > { %5180 = vpow2.f32 %v2549_v20  ;;  %v5097_v43 = vunpack.i.h.bf16 %v5095_v39  ;;  %v5096_v44 = vunpack.i.l.bf16 %v5095_v39 }
 0xe7b   : > { %v4912_v40 = vpack.c.bf16 %v5097_v43, %v5096_v44 }
 0xe7d   : > { %v2780_v42 = vpop.xlane.xlu0 %2779 }
 0xe7e   : > { %v2787_v32 = vsub.f32 %v6163_v51, %v2780_v42 }
 0xe80   : > { %v2790_v46 = vmul.f32 1.442695, %v2787_v32 }
 0xe81   : > { %v2542_v47 = vpop.xlane.xlu0 %2541 }
 0xe82   : > { %5182 = vpow2.f32 %v2790_v46  ;;  %v2547_v63 = vsub.f32 %v6168_v28, %v2542_v47 }
 0xe83   : > { %v5181_v2 = vpop.eup %5180 }
 0xe84   : > { %v2551_v48 = vmul.f32 1.442695, %v2547_v63  ;;  %4628 = vmatmul.mubr.msk.f32.vlgmr.msra.gmra.mrb[54].mxu0 %vm977_vm6, %v5181_v2  ;;  %v2555_v16 = vsel %vm977_vm6, %v5181_v2, 0.0 }
 0xe85   : > { %4913 = vmatpush3.bf16.msra.mxu0 %v4912_v40  ;;  %v2545_v60 = vpop.xlane.xlu0 %2544  ;;  %4630 = vmatprep.mubr.msk.f32.mxu0 %vm5307_vm0, %v5308_v6 }
 0xe86   : > { %5184 = vpow2.f32 %v2551_v48  ;;  %v2548_v35 = vsub.f32 %v6173_v57, %v2545_v60  ;;  %4655 = vmatprep.subr.mxu0 %v5308_v6 }
 0xe88   : > { %v2553_v49 = vmul.f32 1.442695, %v2548_v35  ;;  %v4114_v35 = vld [vmem:[%s6592_s7 + $0x20] sm:$0xff] }
 0xe89   : > { %v2786_v50 = vpop.xlane.xlu0 %2785 }
 0xe8a   : > { %5186 = vpow2.f32 %v2553_v49  ;;  %v2789_v19 = vsub.f32 %v6176_v12, %v2786_v50  ;;  %v4115_v49 = vld [vmem:[%s6592_s7 + $0x28] sm:$0xff]  ;;  %v4116_v50 = vld [vmem:[%s6592_s7 + $0x30] sm:$0xff] }
 0xe8c   : > { %v5183_v61 = vpop.eup %5182  ;;  %v2794_v22 = vmul.f32 1.442695, %v2789_v19 }
 0xe8d   : > { %v3021_v38 = vpop.xlane.xlu0 %3020  ;;  %v2796_v45 = vsel %vm977_vm6, %v5183_v61, 0.0 }
 0xe8e   : > { %v3028_v51 = vsub.f32 %v6183_v17, %v3021_v38  ;;  %2797 = vadd.xlane.f32.xlu1 %v2796_v45  ;;  %v4117_v38 = vld [vmem:[%s6592_s7 + $0x38] sm:$0xff] }
 0xe90   : > { %v6230_v53 = vpop.eup %5184  ;;  %v3031_v54 = vmul.f32 1.442695, %v3028_v51 }
 0xe91   : > { %4631 = vmatmul.mubr.msk.f32.gmra.mrb[56].mxu0 %vm977_vm6, %v6230_v53  ;;  %v3027_v55 = vpop.xlane.xlu0 %3026 }
 0xe92   : > { %5188 = vpow2.f32 %v3031_v54  ;;  %4633 = vmatprep.mubr.msk.f32.mxu0 %vm5307_vm0, %v5308_v6  ;;  %v3030_v29 = vsub.f32 %v6190_v52, %v3027_v55  ;;  %v4932_v54 = vpack.c.bf16 %v4117_v38, %v4116_v50 }
 0xe94   : > { %v6236_v56 = vpop.eup %5186  ;;  %v3035_v31 = vmul.f32 1.442695, %v3030_v29 }
 0xe95   : > { %4634 = vmatmul.mubr.msk.f32.gmra.mrb[58].mxu0 %vm977_vm6, %v6236_v56  ;;  %v3262_v28 = vpop.xlane.xlu0 %3261 }
 0xe96   : > { %v3269_v59 = vsub.f32 %v3257_v27, %v3262_v28  ;;  %4657 = vmatprep.mubr.msk.f32.mxu0 %vm5307_vm0, %v5308_v6 }
 0xe98   : > { %v3272_v62 = vmul.f32 1.442695, %v3269_v59 }
 0xe99   : > { %v2810_v0 = vpop.permute.xlu0 %2809 }
 0xe9a   : > { %5190 = vpow2.f32 %v3272_v62  ;;  %4656 = vmatpush3.msra.mxu0 %v2810_v0 }
 0xe9b   : > { %4658 = vmatmul.mubr.msk.f32.vlgmr.msra.gmra.mrb[60].mxu0 %vm977_vm6, %v5183_v61  ;;  %4918 = vmatprep.subr.bf16.mxu0 %v5306_v3  ;;  %v4929_v61 = vpack.c.bf16 %v4115_v49, %v4114_v35  ;;  %v2561_v49 = vsel %vm977_vm6, %v6236_v56, 0.0 }
 0xe9c   : > { %v5189_v4 = vpop.eup %5188  ;;  %4660 = vmatprep.mubr.msk.f32.mxu0 %vm5307_vm0, %v5308_v6 }
 0xe9d   : > { %v3037_v57 = vsel %vm977_vm6, %v5189_v4, 0.0  ;;  %v3155_v36 = vpop.permute.xlu0 %3154  ;;  %4930 = vmatpush3.bf16.msra.mxu1 %v4929_v61  ;;  %v6351_v61 = vld [vmem:[%s6593_s8 + $0x1] ss:$0 sm:$0xff] }
 0xe9e   : > { %3038 = vadd.xlane.f32.xlu0 %v3037_v57  ;;  %4931 = vmatprep.subr.bf16.mxu1 %v5306_v3 }
 0xea1   : > { %4933 = vmatpush3.bf16.msra.mxu1 %v4932_v54 }
 0xea2   : > { %4940 = vmatprep.subr.bf16.mxu1 %v5306_v3 }
 0xea4   : > { %v5191_v10 = vpop.eup %5190 }
 0xea5   : > { %v3278_v13 = vsel %vm977_vm6, %v5191_v10, 0.0 }
 0xea6   : > { %3279 = vadd.xlane.f32.xlu0 %v3278_v13 }
 0xea9   : > { %v2783_v15 = vpop.xlane.xlu1 %2782 }
 0xeaa   : > { %v2788_v17 = vsub.f32 %v6197_v33, %v2783_v15  ;;  %2556 = vadd.xlane.f32.xlu0 %v2555_v16 }
 0xeac   : > { %v2792_v18 = vmul.f32 1.442695, %v2788_v17 }
 0xead   : > { %v3024_v21 = vpop.xlane.xlu1 %3023 }
 0xeae   : > { %5192 = vpow2.f32 %v2792_v18  ;;  %v3029_v23 = vsub.f32 %v6200_v25, %v3024_v21 }
 0xeaf   : > { %5194 = vpow2.f32 %v2794_v22 }
 0xeb0   : > { %v3033_v27 = vmul.f32 1.442695, %v3029_v23 }
 0xeb1   : > { %v5100_v24 = vpop.permute.xlu1 %5099 }
 0xeb2   : > { %v5102_v26 = vunpack.i.h.bf16 %v5100_v24  ;;  %v5101_v1 = vunpack.i.l.bf16 %v5100_v24  ;;  %5196 = vpow2.f32 %v3033_v27 }
 0xeb3   : > { %5198 = vpow2.f32 %v3035_v31 }
 0xeb4   : > { %v4919_v8 = vpack.c.bf16 %v5102_v26, %v5101_v1 }
 0xeb5   : > { %v3051_v11 = vpop.permute.xlu1 %3050 }
 0xeb6   : > { %4920 = vmatpush3.bf16.msra.mxu0 %v4919_v8 }
 0xeb7   : > { %4685 = vmatprep.subr.mxu0 %v5308_v6 }
 0xeb8   : > { %v6254_v12 = vpop.eup %5192 }
 0xeb9   : > { %v5105_v30 = vpop.permute.xlu1 %5104  ;;  %4661 = vmatmul.mubr.msk.f32.gmra.mrb[62].mxu0 %vm977_vm6, %v6254_v12  ;;  %v6261_v33 = vpop.eup %5194  ;;  %v2799_v31 = vsel %vm977_vm6, %v6254_v12, 0.0 }
 0xeba   : > { %4686 = vmatpush3.msra.mxu0 %v3051_v11  ;;  %4663 = vmatprep.mubr.msk.f32.mxu0 %vm5307_vm0, %v5308_v6  ;;  %v5107_v52 = vunpack.i.h.bf16 %v5105_v30  ;;  %v5106_v34 = vunpack.i.l.bf16 %v5105_v30 }
 0xebb   : > { %4925 = vmatprep.subr.bf16.mxu0 %v5306_v3 }
 0xebc   : > { %v4926_v9 = vpack.c.bf16 %v5107_v52, %v5106_v34  ;;  %v6272_v14 = vpop.eup %5196 }
 0xebd   : > { %v3292_v25 = vpop.permute.xlu1 %3291  ;;  %4664 = vmatmul.mubr.msk.f32.gmra.mrb[64].mxu0 %vm977_vm6, %v6261_v33  ;;  %v6283_v20 = vpop.eup %5198  ;;  %v3040_v56 = vsel %vm977_vm6, %v6272_v14, 0.0 }
 0xebe   : > { %4687 = vmatprep.mubr.msk.f32.mxu0 %vm5307_vm0, %v5308_v6  ;;  %v3043_v35 = vsel %vm977_vm6, %v6283_v20, 0.0 }
 0xec1   : > { %v3153_v37 = vpop.permute.xlu1 %3152  ;;  %4688 = vmatmul.mubr.msk.f32.vlgmr.msra.gmra.mrb[66].mxu0 %vm977_vm6, %v5189_v4 }
 0xec2   : > { %4927 = vmatpush3.bf16.msra.mxu0 %v4926_v9  ;;  %4706 = vmatmul.mubr.msk.f32.gmra.mrb[50].mxu1 %vm878_vm3, %v3153_v37 }
 0xec3   : > { %4690 = vmatprep.mubr.msk.f32.mxu0 %vm5307_vm0, %v5308_v6  ;;  %4715 = vmatprep.subr.mxu0 %v5308_v6 }
 0xec4   : > { %4708 = vmatprep.mubr.msk.f32.mxu1 %vm5307_vm0, %v5308_v6 }
 0xec5   : > { %4691 = vmatmul.mubr.msk.f32.gmra.mrb[68].mxu0 %vm977_vm6, %v6272_v14 }
 0xec6   : > { %4716 = vmatpush3.msra.mxu0 %v3292_v25  ;;  %4709 = vmatmul.mubr.msk.f32.gmra.mrb[52].mxu1 %vm878_vm3, %v3155_v36 }
 0xec7   : > { %4693 = vmatprep.mubr.msk.f32.mxu0 %vm5307_vm0, %v5308_v6  ;;  %4734 = vmatprep.mubr.msk.f32.mxu1 %vm5307_vm0, %v5308_v6 }
 0xec8   : > { %4934 = vmatprep.subr.bf16.mxu0 %v5306_v3 }
 0xec9   : > { %4694 = vmatmul.mubr.msk.f32.gmra.mrb[70].mxu0 %vm977_vm6, %v6283_v20 }
 0xeca   : > { %4717 = vmatprep.mubr.msk.f32.mxu0 %vm5307_vm0, %v5308_v6 }
 0xecd   : > { %4718 = vmatmul.mubr.msk.f32.vlgmr.msra.gmra.mrb[72].mxu0 %vm977_vm6, %v5191_v10 }
 0xece   : > { %4720 = vmatprep.mubr.msk.f32.mxu0 %vm5307_vm0, %v5308_v6 }
 0xf1b   : > { %v2798_v32 = vpop.xlane.xlu1 %2797 }
 0xf1c   : > { %5200 = vrcp.f32 %v2798_v32 }
 0xf26   : > { %v5201_v63 = vpop.eup %5200 }
 0xf2b   : > { %v3039_v60 = vpop.xlane.xlu0 %3038 }
 0xf2c   : > { %5202 = vrcp.f32 %v3039_v60 }
 0xf33   : > { %v3280_v59 = vpop.xlane.xlu0 %3279 }
 0xf34   : > { %5204 = vrcp.f32 %v3280_v59 }
 0xf36   : > { %v5203_v62 = vpop.eup %5202 }
 0xf37   : > { %v2557_v52 = vpop.xlane.xlu0 %2556 }
 0xf38   : > { %5206 = vrcp.f32 %v2557_v52 }
 0xf3e   : > { %v5205_v22 = vpop.eup %5204 }
 0xf42   : > { %v5207_v34 = vpop.eup %5206 }
 0xf57   : > { %v6293_v39 = vpop.f32.mrb[54].mxu0 }
 0xf58   : > { %v4629_v42 = vpop.f32.mrb[55].mxu0  ;;  %v2665_v9 = vmul.f32 %v5207_v34, %v6293_v39 }
 0xf64   : > { %v6295_v43 = vpop.f32.mrb[56].mxu0 }
 0xf65   : > { %v4632_v44 = vpop.f32.mrb[57].mxu0 }
 0xf68   : > { %v6297_v46 = vpop.f32.mrb[58].mxu0 }
 0xf69   : > { %v4635_v47 = vpop.f32.mrb[59].mxu0 }
 0xf6e   : > { %v2889_v2 = vpop.f32.mrb[60].mxu0 }
 0xf6f   : > { %v2906_v40 = vmul.f32 %v5201_v63, %v2889_v2  ;;  %v4659_v48 = vpop.f32.mrb[61].mxu0 }
 0xf71   : > { %3394 = vrot.lane.b32.xlu1 %v2906_v40, %s6673_s23 }
 0xf8c   : > { %v6312_v45 = vpop.f32.mrb[62].mxu0 }
 0xf8d   : > { %v4662_v51 = vpop.f32.mrb[63].mxu0 }
 0xf90   : > { %v6315_v55 = vpop.f32.mrb[64].mxu0 }
 0xf91   : > { %v4665_v28 = vpop.f32.mrb[65].mxu0 }
 0xf94   : > { %v3130_v0 = vpop.f32.mrb[66].mxu0 }
 0xf95   : > { %v3147_v4 = vmul.f32 %v5203_v62, %v3130_v0  ;;  %v4689_v57 = vpop.f32.mrb[67].mxu0  ;;  %v3245_v10 = vpop.f32.mrb[50].mxu1  ;;  %v2802_v0 = vsel %vm977_vm6, %v6261_v33, 0.0 }
 0xf96   : > { %v4707_v13 = vpop.f32.mrb[51].mxu1  ;;  %v3255_v29 = vmul.f32 0.35355338, %v3245_v10  ;;  %v2558_v57 = vsel %vm977_vm6, %v6230_v53, 0.0 }
 0xf97   : > { %3406 = vrot.lane.b32.xlu0 %v3147_v4, %s6674_s22 }
 0xf98   : > { %v6319_v15 = vpop.f32.mrb[68].mxu0  ;;  %v3258_v27 = vadd.f32 %v3255_v29, %v5693_v5 }
 0xf99   : > { %v4692_v16 = vpop.f32.mrb[69].mxu0  ;;  %v3250_v19 = vpop.f32.mrb[52].mxu1 }
 0xf9a   : > { %v4710_v17 = vpop.f32.mrb[53].mxu1  ;;  %v3256_v1 = vmul.f32 0.35355338, %v3250_v19  ;;  %v3263_v30 = vsel %vm977_vm6, %v3258_v27, -inf }
 0xf9c   : > { %v6321_v18 = vpop.f32.mrb[70].mxu0  ;;  %v3259_v8 = vadd.f32 %v3256_v1, %v5693_v5 }
 0xf9d   : > { %v4695_v21 = vpop.f32.mrb[71].mxu0 }
 0xf9e   : > { %v3266_v11 = vsel %vm977_vm6, %v3259_v8, -inf }
 0xfa0   : > { %v3371_v24 = vpop.f32.mrb[72].mxu0 }
 0xfa1   : > { %v3388_v23 = vmul.f32 %v5205_v22, %v3371_v24  ;;  %v4719_v26 = vpop.f32.mrb[73].mxu0 }
 0xfa3   : > { %3418 = vrot.lane.b32.xlu1 %v3388_v23, %s6675_s27 }
 0xfb6   : > { %3267 = vmax.xlane.f32.xlu0 %v3266_v11 }
 0xfc7   : > { %3264 = vmax.xlane.f32.xlu1 %v3263_v30 }
 0xfcb   : > { %2800 = vadd.xlane.f32.xlu1 %v2799_v31 }
 0xfe3   : > { %v3395_v25 = vpop.permute.xlu1 %3394 }
 0xfe4   : > { %v3427_v36 = vsel %vm878_vm3, %v2665_v9, %v3395_v25  ;;  %v4127_v25 = vld [vmem:[%s6596_s11 + $0x20] sm:$0xff]  ;;  %v4128_v9 = vld [vmem:[%s6596_s11 + $0x28] sm:$0xff] }
0x1009   : > { %v3407_v37 = vpop.permute.xlu0 %3406 }
0x100a   : > { %v3430_v42 = vsel %vm1871_vm7, %v3427_v36, %v3407_v37  ;;  %v4935_v37 = vpack.c.bf16 %v4128_v9, %v4127_v25  ;;  %v4130_v36 = vld [vmem:[%s6596_s11 + $0x38] sm:$0xff] }
0x100c   : > { %4936 = vmatpush3.bf16.msra.mxu0 %v4935_v37 }
0x100d   : > { %4937 = vmatprep.subr.bf16.mxu0 %v5306_v3 }
0x1015   : > { %v3419_v32 = vpop.permute.xlu1 %3418 }
0x1016   : > { %v3433_v5 = vsel %vm977_vm6, %v3430_v42, %v3419_v32 }
0x1017   : > { %4735 = vmatmul.mubr.msk.f32.vlgmr.msra.gmra.mrb[54].mxu1 %vm710_vm2, %v3433_v5 }
0x1018   : > { %4737 = vmatprep.mubr.msk.f32.mxu1 %vm5307_vm0, %v5308_v6 }
0x1043   : > { %v3268_v12 = vpop.xlane.xlu0 %3267 }
0x1044   : > { %v3271_v47 = vsub.f32 %v3259_v8, %v3268_v12 }
0x1046   : > { %v3276_v40 = vmul.f32 1.442695, %v3271_v47 }
0x1054   : > { %v3265_v44 = vpop.xlane.xlu1 %3264 }
0x1055   : > { %v3270_v63 = vsub.f32 %v3258_v27, %v3265_v44 }
0x1057   : > { %v3274_v2 = vmul.f32 1.442695, %v3270_v63 }
0x1058   : > { %v2801_v20 = vpop.xlane.xlu1 %2800 }
0x1059   : > { %5208 = vpow2.f32 %v3274_v2 }
0x105a   : > { %5210 = vpow2.f32 %v3276_v40 }
0x1063   : > { %v5209_v39 = vpop.eup %5208 }
0x1064   : > { %4721 = vmatmul.mubr.msk.f32.gmra.mrb[74].mxu0 %vm977_vm6, %v5209_v39  ;;  %v3281_v48 = vsel %vm977_vm6, %v5209_v39, 0.0  ;;  %v5211_v60 = vpop.eup %5210 }
0x1065   : > { %3282 = vadd.xlane.f32.xlu1 %v3281_v48  ;;  %4723 = vmatprep.mubr.msk.f32.mxu0 %vm5307_vm0, %v5308_v6  ;;  %v3284_v4 = vsel %vm977_vm6, %v5211_v60, 0.0 }
0x1068   : > { %4724 = vmatmul.mubr.msk.f32.gmra.mrb[76].mxu0 %vm977_vm6, %v5211_v60 }
0x1069   : > { %3044 = vadd.xlane.f32.xlu1 %v3043_v35  ;;  %4751 = vmatprep.mubr.msk.f32.mxu0 %vm5307_vm0, %v5308_v6 }
0x106d   : > { %2562 = vadd.xlane.f32.xlu1 %v2561_v49 }
0x10ea   : > { %v3516_v50 = vpop.f32.mrb[54].mxu1 }
0x10eb   : > { %v3530_v38 = vadd.f32 %v3516_v50, %v6013_v58  ;;  %v4736_v51 = vpop.f32.mrb[55].mxu1 }
0x10ed   : > { %v6355_v54 = vadd.f32 %v6351_v61, %v3530_v38 }
0x10ef   : > { %v3548_v28 = vsel %vm710_vm2, %v6355_v54, 0.0 }
0x10f0   : > { %3549 = vadd.xlane.f32.xlu0 %v3548_v28 }
0x10f2   : > { %v3283_v59 = vpop.xlane.xlu1 %3282 }
0x10f4   : > { %3041 = vadd.xlane.f32.xlu0 %v3040_v56 }
0x10f6   : > { %v3045_v62 = vpop.xlane.xlu1 %3044 }
0x10f8   : > { %2803 = vadd.xlane.f32.xlu0 %v2802_v0 }
0x10fa   : > { %v2563_v58 = vpop.xlane.xlu1 %2562 }
0x10fb   : > { %5212 = vrcp.f32 %v2563_v58 }
0x10fc   : > { %3285 = vadd.xlane.f32.xlu0 %v3284_v4  ;;  %5214 = vrcp.f32 %v2801_v20  ;;  %v4136_v4 = vld [vmem:[%s6598_s13 + $0x80] sm:$0xff] }
0x10fd   : > { %5216 = vrcp.f32 %v3045_v62  ;;  %v6417_v62 = vld [vmem:[%s6595_s10 + $0x1] ss:$0 sm:$0xff] }
0x10fe   : > { %5218 = vrcp.f32 %v3283_v59  ;;  %v6412_v59 = vld [vmem:[%s6594_s9 + $0x1] ss:$0 sm:$0xff] }
0x1100   : > { %2559 = vadd.xlane.f32.xlu0 %v2558_v57  ;;  %v4137_v57 = vld [vmem:[%s6598_s13 + $0x88] sm:$0xff] }
0x1105   : > { %v5213_v10 = vpop.eup %5212 }
0x1106   : > { %v6367_v13 = vmul.f32 %v5213_v10, %v6297_v46  ;;  %v5215_v14 = vpop.eup %5214  ;;  %v4941_v10 = vpack.c.bf16 %v4137_v57, %v4136_v4  ;;  %v4153_v4 = vld [vmem:[%s6599_s14 + $0x1] ss:$0 sm:$0xff] }
0x1107   : > { %v2907_v16 = vmul.f32 %v5215_v14, %v6312_v45  ;;  %v5217_v33 = vpop.eup %5216  ;;  %v4139_v14 = vld [vmem:[%s6598_s13 + $0x98] sm:$0xff] }
0x1108   : > { %v3149_v19 = vmul.f32 %v5217_v33, %v6321_v18  ;;  %v5219_v17 = vpop.eup %5218  ;;  %4942 = vmatpush3.bf16.msra.mxu1 %v4941_v10  ;;  %v4140_v33 = vld [vmem:[%s6598_s13 + $0xa0] sm:$0xff] }
0x1109   : > { %4943 = vmatprep.subr.bf16.mxu1 %v5306_v3 }
0x1116   : > { %3396 = vrot.lane.b32.xlu0 %v2907_v16, %s6673_s23 }
0x111a   : > { %3410 = vrot.lane.b32.xlu0 %v3149_v19, %s6674_s22  ;;  %v4141_v19 = vld [vmem:[%s6598_s13 + $0xa8] sm:$0xff] }
0x1137   : > { %v3376_v53 = vpop.f32.mrb[74].mxu0 }
0x1138   : > { %v3389_v21 = vmul.f32 %v5219_v17, %v3376_v53  ;;  %v4722_v22 = vpop.f32.mrb[75].mxu0  ;;  %v4947_v17 = vpack.c.bf16 %v4141_v19, %v4140_v33  ;;  %v4142_v53 = vld [vmem:[%s6598_s13 + $0xb0] sm:$0xff] }
0x113b   : > { %v3381_v24 = vpop.f32.mrb[76].mxu0 }
0x113c   : > { %v4725_v46 = vpop.f32.mrb[77].mxu0 }
0x113d   : > { %v4145_v46 = vld [vmem:[%s6598_s13 + $0xc8] sm:$0xff] }
0x117d   : > { %v3550_v23 = vpop.xlane.xlu0 %3549 }
0x117e   : > { %v3557_v18 = vmul.f32 0.03125, %v3550_v23 }
0x1180   : > { %v3560_v8 = vsub.f32 %v6355_v54, %v3557_v18  ;;  %v4148_v18 = vld [vmem:[%s6598_s13 + $0xe0] sm:$0xff] }
0x1181   : > { %v3042_v26 = vpop.xlane.xlu0 %3041 }
0x1182   : > { %5220 = vrcp.f32 %v3042_v26  ;;  %v3563_v11 = vmul.f32 %v3560_v8, %v3560_v8  ;;  %v4146_v26 = vld [vmem:[%s6598_s13 + $0xd0] sm:$0xff] }
0x1184   : > { %v3566_v27 = vsel %vm710_vm2, %v3563_v11, 0.0 }
0x1185   : > { %v2804_v29 = vpop.xlane.xlu0 %2803 }
0x1186   : > { %5222 = vrcp.f32 %v2804_v29  ;;  %v4150_v29 = vld [vmem:[%s6598_s13 + $0xf0] sm:$0xff] }
0x1189   : > { %v3286_v30 = vpop.xlane.xlu0 %3285 }
0x118a   : > { %5224 = vrcp.f32 %v3286_v30 }
0x118c   : > { %v5221_v1 = vpop.eup %5220 }
0x118d   : > { %v3148_v45 = vmul.f32 %v5221_v1, %v6319_v15  ;;  %v2560_v32 = vpop.xlane.xlu0 %2559  ;;  %v4147_v1 = vld [vmem:[%s6598_s13 + $0xd8] sm:$0xff] }
0x118e   : > { %5226 = vrcp.f32 %v2560_v32  ;;  %v6488_v32 = vld [vmem:[%s6597_s12 + $0x1] ss:$0 sm:$0xff] }
0x118f   : > { %3408 = vrot.lane.b32.xlu1 %v3148_v45, %s6674_s22  ;;  %v4956_v45 = vpack.c.bf16 %v4147_v1, %v4146_v26  ;;  %s3949_s22 = sshll.u32 %s594_s28, 4  ;;  %s6545_s22 = int_to_ptr.vmem [resolvable:$true] %s3949_s22 }
0x1190   : > { %v5223_v31 = vpop.eup %5222  ;;  %s5242_s0 = scalar_lea.vmem %s6545_s22, 16  ;;  %p5249_p0 = scmp.lt.s32.totalorder %s6545_s22, %s5247_s26 }
0x1191   : > { %v2908_v52 = vmul.f32 %v5223_v31, %v6315_v55  ;;  %v4129_v55 = vld [vmem:[%s6596_s11 + $0x30] sm:$0xff]  ;;  %v3397_v47 = vpop.permute.xlu0 %3396  ;;  %p5243_p11 = scmp.ne.s32.totalorder %s6545_s22, %s5242_s0  ;;  %p5250_p1 = scmp.lt.s32.totalorder %s5248_s2, %s5242_s0 }
0x1192   : > { %v4938_v42 = vpack.c.bf16 %v4130_v36, %v4129_v55 }
0x1193   : > { %3420 = vrot.lane.b32.xlu1 %v3389_v21, %s6675_s27  ;;  %v4143_v21 = vld [vmem:[%s6598_s13 + $0xb8] sm:$0xff]  ;;  %p5244_p12 = pnand %p5243_p11, %p5463_p5  ;;  %p5251_p2 = por %p5250_p1, %p5249_p0 }
0x1194   : > { %v5225_v34 = vpop.eup %5224  ;;  %4939 = vmatpush3.bf16.msra.mxu0 %v4938_v42  ;;  %v4950_v22 = vpack.c.bf16 %v4143_v21, %v4142_v53 }
0x1195   : > { %v3390_v15 = vmul.f32 %v5225_v34, %v3381_v24  ;;  %4964 = vmatprep.subr.bf16.mxu0 %v5306_v3  ;;  %v3411_v50 = vpop.permute.xlu0 %3410  ;;  %v4144_v24 = vld [vmem:[%s6598_s13 + $0xc0] sm:$0xff]  ;;  %p5245_p13 = pneg %p5244_p12 }
0x1196   : > { %v4953_v23 = vpack.c.bf16 %v4145_v46, %v4144_v24 }
0x1197   : > { %p5252_p3 = pnand %p5251_p2, %p5245_p13 }
0x1198   : > { %v5227_v5 = vpop.eup %5226 }
0x1199   : > { %v2666_v12 = vmul.f32 %v5227_v5, %v6295_v43 }
0x119b   : > { %v3428_v63 = vsel %vm878_vm3, %v2666_v12, %v3397_v47 }
0x11b7   : > { %3567 = vadd.xlane.f32.xlu1 %v3566_v27  ;;  %v4151_v27 = vld [vmem:[%s6598_s13 + $0xf8] sm:$0xff] }
0x11b8   : > { %v4962_v30 = vpack.c.bf16 %v4151_v27, %v4150_v29 }
0x11c8   : > { %3398 = vrot.lane.b32.xlu1 %v2908_v52, %s6673_s23 }
0x11cc   : > { %3422 = vrot.lane.b32.xlu1 %v3390_v15, %s6675_s27  ;;  %s6543_s27 = scalar_lea.hbm %s6604_s19, %s4157_s29 }
0x1201   : > { %v3409_v44 = vpop.permute.xlu1 %3408 }
0x1202   : > { %v3431_v2 = vsel %vm1871_vm7, %v3428_v63, %v3409_v44 }
0x1205   : > { %v3421_v40 = vpop.permute.xlu1 %3420 }
0x1206   : > { %v3434_v39 = vsel %vm977_vm6, %v3431_v2, %v3421_v40 }
0x1207   : > { %4738 = vmatmul.mubr.msk.f32.gmra.mrb[56].mxu1 %vm710_vm2, %v3434_v39 }
0x1208   : > { %4740 = vmatprep.mubr.msk.f32.mxu1 %vm5307_vm0, %v5308_v6 }
0x1244   : > { %v3568_v48 = vpop.xlane.xlu1 %3567 }
0x1245   : > { %v3575_v60 = vmul.f32 0.03125, %v3568_v48 }
0x1247   : > { %v3578_v35 = vadd.f32 1e-06, %v3575_v60 }
0x1248   : > { %v3399_v49 = vpop.permute.xlu1 %3398 }
0x1249   : > { %5228 = vrsqrt.f32 %v3578_v35  ;;  %v3429_v43 = vsel %vm878_vm3, %v6367_v13, %v3399_v49  ;;  %v4138_v13 = vld [vmem:[%s6598_s13 + $0x90] sm:$0xff] }
0x124a   : > { %v3432_v38 = vsel %vm1871_vm7, %v3429_v43, %v3411_v50  ;;  %v4944_v16 = vpack.c.bf16 %v4139_v14, %v4138_v13 }
0x124c   : > { %v3423_v51 = vpop.permute.xlu1 %3422  ;;  %4945 = vmatpush3.bf16.msra.mxu1 %v4944_v16 }
0x124d   : > { %v3435_v20 = vsel %vm977_vm6, %v3432_v38, %v3423_v51  ;;  %4946 = vmatprep.subr.bf16.mxu1 %v5306_v3 }
0x124e   : > { %4741 = vmatmul.mubr.msk.f32.gmra.mrb[58].mxu1 %vm710_vm2, %v3435_v20 }
0x124f   : > { %4792 = vmatprep.mubr.msk.f32.mxu1 %vm5307_vm0, %v5308_v6 }
0x1250   : > { %4948 = vmatpush3.bf16.msra.mxu1 %v4947_v17 }
0x1251   : > { %4949 = vmatprep.subr.bf16.mxu1 %v5306_v3 }
0x1253   : > { %v5229_v28 = vpop.eup %5228 }
0x1254   : > { %v3584_v56 = vmul.f32 %v5229_v28, %v3560_v8  ;;  %4951 = vmatpush3.bf16.msra.mxu1 %v4950_v22  ;;  %v4149_v8 = vld [vmem:[%s6598_s13 + $0xe8] sm:$0xff] }
0x1255   : > { %4952 = vmatprep.subr.bf16.mxu1 %v5306_v3  ;;  %v4959_v11 = vpack.c.bf16 %v4149_v8, %v4148_v18  ;;  %v3856_v18 = vld [vmem:[%s6602_s17] sm:$0xff]  ;;  %v3858_v8 = vld [vmem:[%s6602_s17 + $0x10] sm:$0xff] }
0x1256   : > { %v3593_v0 = vmul.f32 %v6412_v59, %v3584_v56 }
0x1258   : > { %v3602_v58 = vadd.f32 %v6417_v62, %v3593_v0  ;;  %4954 = vmatpush3.bf16.msra.mxu1 %v4953_v23 }
0x1259   : > { %4955 = vmatprep.subr.bf16.mxu1 %v5306_v3 }
0x125a   : > { %4752 = vmatmul.mubr.msk.f32.vlgmr.msra.gmra.mrb[78].mxu0 %vm710_vm2, %v3602_v58 }
0x125b   : > { %4754 = vmatprep.mubr.msk.f32.mxu0 %vm5307_vm0, %v5308_v6 }
0x125c   : > { %4957 = vmatpush3.bf16.msra.mxu1 %v4956_v45 }
0x125d   : > { %4958 = vmatprep.subr.bf16.mxu1 %v5306_v3 }
0x1260   : > { %4960 = vmatpush3.bf16.msra.mxu1 %v4959_v11  ;;  %v3859_v11 = vld [vmem:[%s6602_s17 + $0x18] sm:$0xff] }
0x1261   : > { %4961 = vmatprep.subr.bf16.mxu1 %v5306_v3  ;;  %v4968_v29 = vpack.c.bf16 %v3859_v11, %v3858_v8 }
0x1264   : > { %4963 = vmatpush3.bf16.msra.mxu1 %v4962_v30 }
0x12da   : > { %v3521_v31 = vpop.f32.mrb[56].mxu1 }
0x12db   : > { %v3531_v52 = vadd.f32 %v3521_v31, %v6018_v41  ;;  %v4739_v34 = vpop.f32.mrb[57].mxu1 }
0x12dd   : > { %v3542_v15 = vadd.f32 %v6351_v61, %v3531_v52 }
0x12df   : > { %v3551_v25 = vsel %vm710_vm2, %v3542_v15, 0.0 }
0x12e0   : > { %3552 = vadd.xlane.f32.xlu0 %v3551_v25 }
0x1321   : > { %v3526_v9 = vpop.f32.mrb[58].mxu1 }
0x1322   : > { %v3532_v37 = vadd.f32 %v3526_v9, %v6023_v7  ;;  %v4742_v55 = vpop.f32.mrb[59].mxu1 }
0x1324   : > { %v3543_v36 = vadd.f32 %v6351_v61, %v3532_v37 }
0x1326   : > { %v3554_v42 = vsel %vm710_vm2, %v3543_v36, 0.0 }
0x1327   : > { %3555 = vadd.xlane.f32.xlu1 %v3554_v42 }
0x132d   : > { %v3693_v41 = vpop.f32.mrb[78].mxu0 }
0x132e   : > { %v3694_v5 = vadd.f32 %v6488_v32, %v3693_v41  ;;  %v4753_v12 = vpop.f32.mrb[79].mxu0 }
0x1330   : > { %v3710_v44 = vmul.f32 0.70710677, %v3694_v5  ;;  %v3707_v63 = vmul.f32 0.5, %v3694_v5 }
0x1332   : > { %5230 = verf.f32 %v3710_v44 }
0x133c   : > { %v5231_v47 = vpop.eup %5230 }
0x133d   : > { %v3716_v7 = vadd.f32 1.0, %v5231_v47 }
0x133f   : > { %v3719_v2 = vmul.f32 %v3716_v7, %v3707_v63 }
0x1341   : > { %4793 = vmatmul.mubr.f32.vlgmr.msra.gmra.mrb[60].mxu1 %v3719_v2  ;;  %v4155_v2 = vld [vmem:[%s6601_s16] ss:$0 sm:$0xff] }
0x1342   : > { %4795 = vmatprep.mubr.msk.f32.mxu1 %vm5307_vm0, %v5308_v6 }
0x136d   : > { %v3553_v61 = vpop.xlane.xlu0 %3552 }
0x136e   : > { %v3558_v40 = vmul.f32 0.03125, %v3553_v61 }
0x1370   : > { %v3561_v39 = vsub.f32 %v3542_v15, %v3558_v40 }
0x1372   : > { %v3564_v48 = vmul.f32 %v3561_v39, %v3561_v39 }
0x1374   : > { %v3569_v60 = vsel %vm710_vm2, %v3564_v48, 0.0 }
0x1375   : > { %3570 = vadd.xlane.f32.xlu0 %v3569_v60 }
0x13b4   : > { %v3556_v35 = vpop.xlane.xlu1 %3555 }
0x13b5   : > { %v3559_v49 = vmul.f32 0.03125, %v3556_v35 }
0x13b7   : > { %v3562_v43 = vsub.f32 %v3543_v36, %v3559_v49 }
0x13b9   : > { %v3565_v50 = vmul.f32 %v3562_v43, %v3562_v43 }
0x13bb   : > { %v3572_v38 = vsel %vm710_vm2, %v3565_v50, 0.0 }
0x13bc   : > { %3573 = vadd.xlane.f32.xlu0 %v3572_v38 }
0x1402   : > { %v3571_v51 = vpop.xlane.xlu0 %3570 }
0x1403   : > { %v3576_v20 = vmul.f32 0.03125, %v3571_v51 }
0x1405   : > { %v3579_v28 = vadd.f32 1e-06, %v3576_v20 }
0x1407   : > { %5232 = vrsqrt.f32 %v3579_v28 }
0x1411   : > { %v5233_v56 = vpop.eup %5232 }
0x1412   : > { %v3585_v0 = vmul.f32 %v5233_v56, %v3561_v39 }
0x1414   : > { %v3805_v58 = vpop.f32.mrb[60].mxu1  ;;  %v3594_v57 = vmul.f32 %v6412_v59, %v3585_v0 }
0x1415   : > { %v3817_v10 = vadd.f32 %v3805_v58, %v6355_v54  ;;  %v4794_v13 = vpop.f32.mrb[61].mxu1 }
0x1416   : > { %v3603_v14 = vadd.f32 %v6417_v62, %v3594_v57 }
0x1417   : > { %v3826_v16 = vadd.f32 %v4153_v4, %v3817_v10 }
0x1418   : > { %4755 = vmatmul.mubr.msk.f32.gmra.mrb[80].mxu0 %vm710_vm2, %v3603_v14 }
0x1419   : > { %v3829_v33 = vsel %vm710_vm2, %v3826_v16, 0.0  ;;  %4757 = vmatprep.mubr.msk.f32.mxu0 %vm5307_vm0, %v5308_v6 }
0x141a   : > { %3830 = vadd.xlane.f32.xlu0 %v3829_v33 }
0x1449   : > { %v3574_v19 = vpop.xlane.xlu0 %3573 }
0x144a   : > { %v3577_v17 = vmul.f32 0.03125, %v3574_v19 }
0x144c   : > { %v3580_v53 = vadd.f32 1e-06, %v3577_v17 }
0x144e   : > { %5234 = vrsqrt.f32 %v3580_v53 }
0x1458   : > { %v5235_v21 = vpop.eup %5234 }
0x1459   : > { %v3586_v22 = vmul.f32 %v5235_v21, %v3562_v43  ;;  %v3860_v43 = vld [vmem:[%s6603_s18] sm:$0x1] }
0x145b   : > { %v3595_v54 = vmul.f32 %v6412_v59, %v3586_v22  ;;  %v3857_v59 = vld [vmem:[%s6602_s17 + $0x8] sm:$0xff] }
0x145d   : > { %v3604_v24 = vadd.f32 %v6417_v62, %v3595_v54  ;;  %v4965_v62 = vpack.c.bf16 %v3857_v59, %v3856_v18 }
0x145f   : > { %4758 = vmatmul.mubr.msk.f32.gmra.mrb[82].mxu0 %vm710_vm2, %v3604_v24 }
0x1460   : > { %4809 = vmatprep.mubr.msk.f32.mxu0 %vm5307_vm0, %v5308_v6  ;;  %4966 = vmatpush3.bf16.msra.mxu0 %v4965_v62 }
0x1461   : > { %4967 = vmatprep.subr.bf16.mxu0 %v5306_v3 }
0x1464   : > { %4969 = vmatpush3.bf16.msra.mxu0 %v4968_v29 }
0x14a7   : > { %v3831_v46 = vpop.xlane.xlu0 %3830 }
0x14a8   : > { %v3832_v23 = vmul.f32 0.03125, %v3831_v46 }
0x14aa   : > { %v3833_v26 = vsub.f32 %v3826_v16, %v3832_v23 }
0x14ac   : > { %v3834_v1 = vmul.f32 %v3833_v26, %v3833_v26 }
0x14ae   : > { %v3835_v45 = vsel %vm710_vm2, %v3834_v1, 0.0 }
0x14af   : > { %3836 = vadd.xlane.f32.xlu1 %v3835_v45 }
0x14eb   : > { %v3698_v27 = vpop.f32.mrb[80].mxu0 }
0x14ec   : > { %v3699_v30 = vadd.f32 %v6488_v32, %v3698_v27  ;;  %v4756_v31 = vpop.f32.mrb[81].mxu0 }
0x14ee   : > { %v3711_v52 = vmul.f32 0.70710677, %v3699_v30  ;;  %v3708_v15 = vmul.f32 0.5, %v3699_v30 }
0x14f0   : > { %5236 = verf.f32 %v3711_v52 }
0x14fa   : > { %v5237_v34 = vpop.eup %5236 }
0x14fb   : > { %v3717_v25 = vadd.f32 1.0, %v5237_v34 }
0x14fd   : > { %v3720_v3 = vmul.f32 %v3717_v25, %v3708_v15 }
0x14ff   : > { %4796 = vmatmul.mubr.f32.gmra.mrb[62].mxu1 %v3720_v3 }
0x1500   : > { %4798 = vmatprep.mubr.msk.f32.mxu1 %vm5307_vm0, %v5308_v6  ;;  %v4154_v6 = vld [vmem:[%s6600_s15] ss:$0 sm:$0xff] }
0x1532   : > { %v3703_v9 = vpop.f32.mrb[82].mxu0 }
0x1533   : > { %v3704_v37 = vadd.f32 %v6488_v32, %v3703_v9  ;;  %v4759_v55 = vpop.f32.mrb[83].mxu0 }
0x1535   : > { %v3712_v36 = vmul.f32 0.70710677, %v3704_v37  ;;  %v3709_v44 = vmul.f32 0.5, %v3704_v37 }
0x1537   : > { %5238 = verf.f32 %v3712_v36 }
0x153c   : > { %v3837_v42 = vpop.xlane.xlu1 %3836 }
0x153d   : > { %v3838_v41 = vmul.f32 0.03125, %v3837_v42 }
0x153f   : > { %v3839_v5 = vadd.f32 1e-05, %v3838_v41 }
0x1541   : > { %v5239_v12 = vpop.eup %5238  ;;  %5240 = vrsqrt.f32 %v3839_v5 }
0x1542   : > { %v3718_v47 = vadd.f32 1.0, %v5239_v12 }
0x1544   : > { %v3721_v63 = vmul.f32 %v3718_v47, %v3709_v44 }
0x1546   : > { %4799 = vmatmul.mubr.f32.gmra.mrb[64].mxu1 %v3721_v63 }
0x154b   : > { %v5241_v7 = vpop.eup %5240 }
0x154c   : > { %v3841_v32 = vmul.f32 %v5241_v7, %v3833_v26 }
0x154e   : > { %v3848_v61 = vmul.f32 %v4154_v6, %v3841_v32 }
0x1550   : > { %v3855_v40 = vadd.f32 %v4155_v2, %v3848_v61 }
0x1552   : > { %v3862_v39 = vrot.slane %v3855_v40, 6 }
0x1554   : > { %4810 = vmatmul.mubr.msk.f32.vlgmr.msra.gmra.mrb[84].mxu0 %vm710_vm2, %v3862_v39 }
0x15d2   : > { %v3810_v48 = vpop.f32.mrb[62].mxu1 }
0x15d3   : > { %v4797_v60 = vpop.f32.mrb[63].mxu1 }
0x1619   : > { %v3814_v35 = vpop.f32.mrb[64].mxu1 }
0x161a   : > { %v4800_v49 = vpop.f32.mrb[65].mxu1 }
0x1627   : > { %v3931_v50 = vpop.f32.mrb[84].mxu0 }
0x1628   : > { %v3932_v38 = vadd.f32 %v3931_v50, %v3860_v43  ;;  %v4811_v51 = vpop.f32.mrb[85].mxu0 }
0x162a   : > { %3935 = vst [vmem:[%s594_s28] sm:$0x1] %v3932_v38 }
0x162b   : > { %5255 = shalt.err (!%p5252_p3)
}
0x162c   : > { %s5256_s20 = scalar_lea.hbm %s6543_s27, 16  ;;  %s5260_s23 = scalar_lea.hbm %s6604_s19, 32 }
0x162d   : > { %p5257_p4 = scmp.ne.s32.totalorder %s6543_s27, %s5256_s20  ;;  %p5261_p9 = scmp.lt.u32.totalorder %s6543_s27, %s6604_s19 }
0x162e   : > { %p5262_p10 = scmp.lt.u32.totalorder %s5260_s23, %s5256_s20  ;;  %p5264_p12 = scmp.lt.u32.totalorder %s5256_s20, %s6543_s27 }
0x162f   : > { %p5258_p7 = pnand %p5257_p4, %p5463_p5 }
0x1630   : > { %p5263_p11 = por %p5262_p10, %p5261_p9 }
0x1631   : > { %p5259_p8 = pneg %p5258_p7 }
0x1632   : > { %p5265_p13 = por %p5264_p12, %p5263_p11 }
0x1634   : > { %p5266_p0 = pnand %p5265_p13, %p5259_p8 }
0x1636   : > { %5269 = shalt.err (!%p5266_p0)
}
0x1637   : > { %4971 = dma.vmem_to_hbm [thread:$0]  (%p5463_p5), %s6545_s22, 16, %s6543_s27, %s3937_s25  }
0x1638 PF: > { %s6676_s2 = sld [smem:[#allocation5_spill]]  ;;  %p4977_p1 = scmp.ge.s32.totalorder %s5304_s21, 2 }
0x163a   : > { %p4974_p2 = pnand %p4977_p1, %p5467_p6 }
0x163e   : > { %s3961_s26 = sand.u32 1, %s6676_s2  }
0x163f   : > { %s3962_s29 = scalar_lea.sflag [#allocation3], %s3961_s26 }
0x1640   : > { %5287 = dma.done.wait (!%p4974_p2), %s3962_s29, 16  }
0x1641   : > { %5289 = vsyncadd (!%p4974_p2), %s3962_s29, 4294967280  ;;  %s6678_s21 = sld [smem:[#allocation7_spill]]  ;;  %s6679_s20 = sld [smem:[#allocation6_spill]] }
0x1642   : > { %s6680_s28 = sld [smem:[#allocation8_spill]]  ;;  %s6681_s0 = smov %s5296_s30 }
0x1647   : > { %p29_p3 = scmp.ge.s32.totalorder %s6678_s21, 4   ;;  %s6682_s30 = smov %s6679_s20 }
0x1648   : > { %s6683_s20 = smov %s6680_s28 }
0x1649   :  { %31 = sbr.rel (!%p29_p3) target bundleno = 8 (0x8), region = 143 }
0x1650   :  { %3966 = vsyncpa [#allocation3], 1 }
0x1651   :  { %3968 = vsyncpa [#allocation3 + $0x1], 1 }

</bundles_post_ra>
